<compile_context>
chip_gen: v7x
topology: tpu7x:2x2x1
jax: 0.10.0
libtpu: 0.0.40
codegen_flags: <defaults>
</compile_context>

<pallas_src>
import jax
import jax.numpy as jnp
from jax.experimental import pallas as pl
from jax.experimental.pallas import tpu as pltpu


C_OUT = 512   # conv output channels
K_PAD = 48    # padded conv-GEMM reduction dim (C*9 = 36 -> 48)


# ----------------------------------------------------------------------------
# Fused kernel: per grid step, process S strips.  For each strip:
#   conv-GEMM (Wo=256, K)@(K, 512) + bias + ReLU          -> (256, 512)
#   transposed Linear chain W_i(out,in) @ act(in, 512)    -> (128|64|32, 512)
#   final Linear                                          -> (4, 512) lane-dense
# ----------------------------------------------------------------------------
def _fused_kernel(p_ref, cw_ref, cb_ref, w1_ref, b1_ref, w2_ref, b2_ref,
                  w3_ref, b3_ref, w4_ref, b4_ref, o_ref):
    S = p_ref.shape[0]
    for s in range(S):                       # S is tiny (<=2): fully unrolled
        # Conv as GEMM (f32 accumulation).
        y = jnp.dot(p_ref[s], cw_ref[...], preferred_element_type=jnp.float32)
        y = jnp.maximum(y + cb_ref[...], 0.0)                     # (256, 512) f32

        # Linear chain, transposed orientation: PyTorch (out,in) weights as LHS,
        # the 512 conv channels stay on the lane axis throughout -> no transposes.
        h = jnp.dot(w1_ref[...], y.astype(jnp.bfloat16),
                    preferred_element_type=jnp.float32)           # (128, 512)
        h = jnp.maximum(h + b1_ref[...], 0.0)

        h = jnp.dot(w2_ref[...], h.astype(jnp.bfloat16),
                    preferred_element_type=jnp.float32)           # (64, 512)
        h = jnp.maximum(h + b2_ref[...], 0.0)

        h = jnp.dot(w3_ref[...], h.astype(jnp.bfloat16),
                    preferred_element_type=jnp.float32)           # (32, 512)
        h = jnp.maximum(h + b3_ref[...], 0.0)

        o = jnp.dot(w4_ref[...], h.astype(jnp.bfloat16),
                    preferred_element_type=jnp.float32)           # (4, 512)
        o_ref[s] = (o + b4_ref[...]).astype(o_ref.dtype)


# ----------------------------------------------------------------------------
# im2col for Conv2d(k=3, stride=2, pad=0) on NCHW input, strip-major layout.
# Feature order = (c, kh, kw), matching PyTorch's Conv2d weight flattening.
# ----------------------------------------------------------------------------
def im2col_3x3_s2(x):
    """x: (N, C, H, W) -> patches (N*Ho, Wo, C*9)."""
    N, C, H, W = x.shape
    Ho = (H - 3) // 2 + 1
    Wo = (W - 3) // 2 + 1
    cols = [x[:, :, kh:kh + 2 * Ho:2, kw:kw + 2 * Wo:2]
            for kh in range(3) for kw in range(3)]               # each (N,C,Ho,Wo)
    p = jnp.stack(cols, axis=-1)                                 # (N, C, Ho, Wo, 9)
    p = p.transpose(0, 2, 3, 1, 4)                               # (N, Ho, Wo, C, 9)
    return p.reshape(N * Ho, Wo, C * 9), Ho, Wo


# ----------------------------------------------------------------------------
# Deterministic parameter init (PyTorch-style uniform(-1/sqrt(fan_in), ..))
# ----------------------------------------------------------------------------
def init_params(key, c_in):
    def u(k, shape, fan_in):
        bound = 1.0 / jnp.sqrt(jnp.float32(fan_in))
        return jax.random.uniform(k, shape, jnp.float32, -bound, bound)

    keys = jax.random.split(key, 10)
    params = {}
    fan = c_in * 9
    params["conv_w"] = u(keys[0], (C_OUT, c_in, 3, 3), fan)      # PyTorch (out,in,kh,kw)
    params["conv_b"] = u(keys[1], (C_OUT,), fan)
    dims = [(256, 128), (128, 64), (64, 32), (32, 4)]
    for i, (din, dout) in enumerate(dims):
        params[f"w{i}"] = u(keys[2 + 2 * i], (dout, din), din)   # PyTorch (out, in)
        params[f"b{i}"] = u(keys[3 + 2 * i], (dout,), din)
    return params


# ----------------------------------------------------------------------------
# Full forward pass: one fused pallas_call (jitted so the glue fuses too).
# ----------------------------------------------------------------------------
@jax.jit
def toric_code_net_forward(params, x):
    """x: (N, C_in, H, W) float32 -> (N, 512, H_out, 4) float32."""
    N, C, H, W = x.shape
    patches, Ho, Wo = im2col_3x3_s2(x)                           # (N*Ho, Wo, C*9)
    assert Wo == 256, "Linear(256,128) requires conv output width 256"
    K = C * 9
    assert K <= K_PAD

    T = N * Ho                                                   # total strips
    # >=2 "parallel" steps so both v7x TensorCores get work; on single-TC
    # v5e/v6e the extra step costs only one ~0.35us grid-step overhead.
    G = 2 if (T >= 2 and T % 2 == 0) else 1
    S = T // G                                                   # strips per step

    # Kernel operands: bf16 MXU inputs (f32 accumulate), f32 biases.
    p = jnp.pad(patches, ((0, 0), (0, 0), (0, K_PAD - K))).astype(jnp.bfloat16)
    cw = jnp.pad(params["conv_w"].reshape(C_OUT, K).T,
                 ((0, K_PAD - K), (0, 0))).astype(jnp.bfloat16)  # (48, 512)
    cb = params["conv_b"].reshape(1, C_OUT)                      # (1, 512)
    w1 = params["w0"].astype(jnp.bfloat16)                       # (128, 256)
    b1 = params["b0"].reshape(-1, 1)                             # (128, 1)
    w2 = params["w1"].astype(jnp.bfloat16)                       # (64, 128)
    b2 = params["b1"].reshape(-1, 1)
    w3 = params["w2"].astype(jnp.bfloat16)                       # (32, 64)
    b3 = params["b2"].reshape(-1, 1)
    w4 = params["w3"].astype(jnp.bfloat16)                       # (4, 32)
    b4 = params["b3"].reshape(-1, 1)                             # (4, 1)

    cmap = lambda g: (0, 0)                                      # VMEM-resident consts
    out = pl.pallas_call(
        _fused_kernel,
        out_shape=jax.ShapeDtypeStruct((T, 4, C_OUT), jnp.float32),
        grid=(G,),
        in_specs=[
            pl.BlockSpec((S, Wo, K_PAD), lambda g: (g, 0, 0)),   # patches (per step)
            pl.BlockSpec((K_PAD, C_OUT), cmap),                  # conv W
            pl.BlockSpec((1, C_OUT), cmap),                      # conv b (row)
            pl.BlockSpec((128, 256), cmap),                      # w1
            pl.BlockSpec((128, 1), cmap),                        # b1 (column)
            pl.BlockSpec((64, 128), cmap),                       # w2
            pl.BlockSpec((64, 1), cmap),                         # b2
            pl.BlockSpec((32, 64), cmap),                        # w3
            pl.BlockSpec((32, 1), cmap),                         # b3
            pl.BlockSpec((4, 32), cmap),                         # w4
            pl.BlockSpec((4, 1), cmap),                          # b4
        ],
        out_specs=pl.BlockSpec((S, 4, C_OUT), lambda g: (g, 0, 0)),
        compiler_params=pltpu.CompilerParams(dimension_semantics=("parallel",)),
    )(p, cw, cb, w1, b1, w2, b2, w3, b3, w4, b4)

    # (N*Ho, 4, 512) -> (N, 512, Ho, 4); tiny relayout, fused under jit.
    return out.reshape(N, Ho, 4, C_OUT).transpose(0, 3, 1, 2)


# ----------------------------------------------------------------------------
# Pure-JAX reference with identical numerics (bf16 MXU inputs, f32 accum).
# ----------------------------------------------------------------------------
def reference_forward(params, x):
    N, C, H, W = x.shape
    Ho = (H - 3) // 2 + 1
    Wo = (W - 3) // 2 + 1
    cols = [x[:, :, kh:kh + 2 * Ho:2, kw:kw + 2 * Wo:2]
            for kh in range(3) for kw in range(3)]
    p = jnp.stack(cols, axis=-1)
    p = p.transpose(0, 2, 3, 1, 4).reshape(N, Ho, Wo, C * 9)     # (N, Ho, Wo, C*9)
    cw = params["conv_w"].reshape(C_OUT, C * 9).T
    y = jnp.dot(p.astype(jnp.bfloat16), cw.astype(jnp.bfloat16),
                preferred_element_type=jnp.float32) + params["conv_b"]
    y = jnp.maximum(y, 0.0)                                      # (N, Ho, Wo, 512)
    y = y.transpose(0, 3, 1, 2)                                  # NCHW: (N, 512, Ho, 256)
    relus = [True, True, True, False]
    for i in range(4):
        w = params[f"w{i}"].T
        y = jnp.dot(y.astype(jnp.bfloat16), w.astype(jnp.bfloat16),
                    preferred_element_type=jnp.float32) + params[f"b{i}"]
        if relus[i]:
            y = jnp.maximum(y, 0.0)
    return y                                                     # (N, 512, Ho, 4)


if __name__ == "__main__":
    key = jax.random.PRNGKey(0)
    k_param, k_x = jax.random.split(key)

    # Shapes consistent with the module: batch=2, C_in=4, H=5, W=513 so the
    # conv output width is 256 (required by the Linear(256,128) that follows).
    N, C, H, W = 2, 4, 5, 513
    x = (jax.random.uniform(k_x, (N, C, H, W)) < 0.1).astype(jnp.float32)

    params = init_params(k_param, C)

    out = toric_code_net_forward(params, x)
    out = jax.block_until_ready(out)

    ref = reference_forward(params, x)
    assert out.shape == (N, C_OUT, 2, 4), out.shape
    assert jnp.allclose(out, ref, rtol=1e-3, atol=1e-3), \
        float(jnp.max(jnp.abs(out - ref)))

    print("KERNEL_OK")
</pallas_src>

<mosaic_0001>
module attributes {stable_mosaic.version = 11 : i64} {
  func.func @_fused_kernel(%arg0: i32, %arg1: memref<2x256x48xbf16, #tpu.memory_space<vmem>>, %arg2: memref<48x512xbf16, #tpu.memory_space<vmem>>, %arg3: memref<1x512xf32, #tpu.memory_space<vmem>>, %arg4: memref<128x256xbf16, #tpu.memory_space<vmem>>, %arg5: memref<128x1xf32, #tpu.memory_space<vmem>>, %arg6: memref<64x128xbf16, #tpu.memory_space<vmem>>, %arg7: memref<64x1xf32, #tpu.memory_space<vmem>>, %arg8: memref<32x64xbf16, #tpu.memory_space<vmem>>, %arg9: memref<32x1xf32, #tpu.memory_space<vmem>>, %arg10: memref<4x32xbf16, #tpu.memory_space<vmem>>, %arg11: memref<4x1xf32, #tpu.memory_space<vmem>>, %arg12: memref<2x4x512xf32, #tpu.memory_space<vmem>>) attributes {dimension_semantics = [#tpu.dimension_semantics<parallel>], iteration_bounds = array<i64: 2>, scalar_prefetch = 0 : i64, scratch_operands = 0 : i64, tpu.core_type = #tpu.core_type<tc>, window_params = [{transform_indices = @transform_0, window_bounds = array<i64: 2, 256, 48>}, {pipeline_mode = #tpu.pipeline_mode<synchronous>, transform_indices = @transform_1, window_bounds = array<i64: 48, 512>}, {pipeline_mode = #tpu.pipeline_mode<synchronous>, transform_indices = @transform_2, window_bounds = array<i64: 1, 512>}, {pipeline_mode = #tpu.pipeline_mode<synchronous>, transform_indices = @transform_3, window_bounds = array<i64: 128, 256>}, {pipeline_mode = #tpu.pipeline_mode<synchronous>, transform_indices = @transform_4, window_bounds = array<i64: 128, 1>}, {pipeline_mode = #tpu.pipeline_mode<synchronous>, transform_indices = @transform_5, window_bounds = array<i64: 64, 128>}, {pipeline_mode = #tpu.pipeline_mode<synchronous>, transform_indices = @transform_6, window_bounds = array<i64: 64, 1>}, {pipeline_mode = #tpu.pipeline_mode<synchronous>, transform_indices = @transform_7, window_bounds = array<i64: 32, 64>}, {pipeline_mode = #tpu.pipeline_mode<synchronous>, transform_indices = @transform_8, window_bounds = array<i64: 32, 1>}, {pipeline_mode = #tpu.pipeline_mode<synchronous>, transform_indices = @transform_9, window_bounds = array<i64: 4, 32>}, {pipeline_mode = #tpu.pipeline_mode<synchronous>, transform_indices = @transform_10, window_bounds = array<i64: 4, 1>}, {transform_indices = @transform_11, window_bounds = array<i64: 2, 4, 512>}]} {
    %c0 = arith.constant 0 : index
    %c0_0 = arith.constant 0 : index
    %c0_1 = arith.constant 0 : index
    %0 = vector.load %arg1[%c0, %c0_0, %c0_1] : memref<2x256x48xbf16, #tpu.memory_space<vmem>>, vector<1x256x48xbf16>
    %1 = vector.shape_cast %0 : vector<1x256x48xbf16> to vector<256x48xbf16>
    %c0_2 = arith.constant 0 : index
    %c0_3 = arith.constant 0 : index
    %2 = vector.load %arg2[%c0_2, %c0_3] : memref<48x512xbf16, #tpu.memory_space<vmem>>, vector<48x512xbf16>
    %cst = arith.constant dense<0.000000e+00> : vector<256x512xf32>
    %3 = tpu.matmul %1, %2, %cst {dimension_numbers = #tpu.dot_dimension_numbers<[1], [0], [0], [1], [0, 0, 1, 1], [], []>} : vector<256x48xbf16>, vector<48x512xbf16>, vector<256x512xf32> -> vector<256x512xf32>
    %c0_4 = arith.constant 0 : index
    %c0_5 = arith.constant 0 : index
    %4 = vector.load %arg3[%c0_4, %c0_5] : memref<1x512xf32, #tpu.memory_space<vmem>>, vector<1x512xf32>
    %5 = vector.broadcast %4 : vector<1x512xf32> to vector<256x512xf32>
    %6 = arith.addf %3, %5 : vector<256x512xf32>
    %cst_6 = arith.constant 0.000000e+00 : f32
    %7 = vector.broadcast %cst_6 : f32 to vector<256x512xf32>
    %8 = arith.maximumf %6, %7 : vector<256x512xf32>
    %c0_7 = arith.constant 0 : index
    %c0_8 = arith.constant 0 : index
    %9 = vector.load %arg4[%c0_7, %c0_8] : memref<128x256xbf16, #tpu.memory_space<vmem>>, vector<128x256xbf16>
    %10 = arith.truncf %8 : vector<256x512xf32> to vector<256x512xbf16>
    %cst_9 = arith.constant dense<0.000000e+00> : vector<128x512xf32>
    %11 = tpu.matmul %9, %10, %cst_9 {dimension_numbers = #tpu.dot_dimension_numbers<[1], [0], [0], [1], [0, 0, 1, 1], [], []>} : vector<128x256xbf16>, vector<256x512xbf16>, vector<128x512xf32> -> vector<128x512xf32>
    %c0_10 = arith.constant 0 : index
    %c0_11 = arith.constant 0 : index
    %12 = vector.load %arg5[%c0_10, %c0_11] : memref<128x1xf32, #tpu.memory_space<vmem>>, vector<128x1xf32>
    %13 = vector.broadcast %12 : vector<128x1xf32> to vector<128x512xf32>
    %14 = arith.addf %11, %13 : vector<128x512xf32>
    %cst_12 = arith.constant 0.000000e+00 : f32
    %15 = vector.broadcast %cst_12 : f32 to vector<128x512xf32>
    %16 = arith.maximumf %14, %15 : vector<128x512xf32>
    %c0_13 = arith.constant 0 : index
    %c0_14 = arith.constant 0 : index
    %17 = vector.load %arg6[%c0_13, %c0_14] : memref<64x128xbf16, #tpu.memory_space<vmem>>, vector<64x128xbf16>
    %18 = arith.truncf %16 : vector<128x512xf32> to vector<128x512xbf16>
    %cst_15 = arith.constant dense<0.000000e+00> : vector<64x512xf32>
    %19 = tpu.matmul %17, %18, %cst_15 {dimension_numbers = #tpu.dot_dimension_numbers<[1], [0], [0], [1], [0, 0, 1, 1], [], []>} : vector<64x128xbf16>, vector<128x512xbf16>, vector<64x512xf32> -> vector<64x512xf32>
    %c0_16 = arith.constant 0 : index
    %c0_17 = arith.constant 0 : index
    %20 = vector.load %arg7[%c0_16, %c0_17] : memref<64x1xf32, #tpu.memory_space<vmem>>, vector<64x1xf32>
    %21 = vector.broadcast %20 : vector<64x1xf32> to vector<64x512xf32>
    %22 = arith.addf %19, %21 : vector<64x512xf32>
    %cst_18 = arith.constant 0.000000e+00 : f32
    %23 = vector.broadcast %cst_18 : f32 to vector<64x512xf32>
    %24 = arith.maximumf %22, %23 : vector<64x512xf32>
    %c0_19 = arith.constant 0 : index
    %c0_20 = arith.constant 0 : index
    %25 = vector.load %arg8[%c0_19, %c0_20] : memref<32x64xbf16, #tpu.memory_space<vmem>>, vector<32x64xbf16>
    %26 = arith.truncf %24 : vector<64x512xf32> to vector<64x512xbf16>
    %cst_21 = arith.constant dense<0.000000e+00> : vector<32x512xf32>
    %27 = tpu.matmul %25, %26, %cst_21 {dimension_numbers = #tpu.dot_dimension_numbers<[1], [0], [0], [1], [0, 0, 1, 1], [], []>} : vector<32x64xbf16>, vector<64x512xbf16>, vector<32x512xf32> -> vector<32x512xf32>
    %c0_22 = arith.constant 0 : index
    %c0_23 = arith.constant 0 : index
    %28 = vector.load %arg9[%c0_22, %c0_23] : memref<32x1xf32, #tpu.memory_space<vmem>>, vector<32x1xf32>
    %29 = vector.broadcast %28 : vector<32x1xf32> to vector<32x512xf32>
    %30 = arith.addf %27, %29 : vector<32x512xf32>
    %cst_24 = arith.constant 0.000000e+00 : f32
    %31 = vector.broadcast %cst_24 : f32 to vector<32x512xf32>
    %32 = arith.maximumf %30, %31 : vector<32x512xf32>
    %c0_25 = arith.constant 0 : index
    %c0_26 = arith.constant 0 : index
    %33 = vector.load %arg10[%c0_25, %c0_26] : memref<4x32xbf16, #tpu.memory_space<vmem>>, vector<4x32xbf16>
    %34 = arith.truncf %32 : vector<32x512xf32> to vector<32x512xbf16>
    %cst_27 = arith.constant dense<0.000000e+00> : vector<4x512xf32>
    %35 = tpu.matmul %33, %34, %cst_27 {dimension_numbers = #tpu.dot_dimension_numbers<[1], [0], [0], [1], [0, 0, 1, 1], [], []>} : vector<4x32xbf16>, vector<32x512xbf16>, vector<4x512xf32> -> vector<4x512xf32>
    %c0_28 = arith.constant 0 : index
    %c0_29 = arith.constant 0 : index
    %36 = vector.load %arg11[%c0_28, %c0_29] : memref<4x1xf32, #tpu.memory_space<vmem>>, vector<4x1xf32>
    %37 = vector.broadcast %36 : vector<4x1xf32> to vector<4x512xf32>
    %38 = arith.addf %35, %37 : vector<4x512xf32>
    %c0_30 = arith.constant 0 : index
    %c0_31 = arith.constant 0 : index
    %c0_32 = arith.constant 0 : index
    %39 = vector.load %arg12[%c0_30, %c0_31, %c0_32] : memref<2x4x512xf32, #tpu.memory_space<vmem>>, vector<1x4x512xf32>
    %40 = vector.shape_cast %39 : vector<1x4x512xf32> to vector<4x512xf32>
    %41 = vector.shape_cast %38 : vector<4x512xf32> to vector<1x4x512xf32>
    tpu.vector_store %arg12[%c0_30, %c0_31, %c0_32], %41 {strides = array<i32>} : memref<2x4x512xf32, #tpu.memory_space<vmem>>, vector<1x4x512xf32>,
    %c1 = arith.constant 1 : index
    %c0_33 = arith.constant 0 : index
    %c0_34 = arith.constant 0 : index
    %42 = vector.load %arg1[%c1, %c0_33, %c0_34] : memref<2x256x48xbf16, #tpu.memory_space<vmem>>, vector<1x256x48xbf16>
    %43 = vector.shape_cast %42 : vector<1x256x48xbf16> to vector<256x48xbf16>
    %c0_35 = arith.constant 0 : index
    %c0_36 = arith.constant 0 : index
    %44 = vector.load %arg2[%c0_35, %c0_36] : memref<48x512xbf16, #tpu.memory_space<vmem>>, vector<48x512xbf16>
    %cst_37 = arith.constant dense<0.000000e+00> : vector<256x512xf32>
    %45 = tpu.matmul %43, %44, %cst_37 {dimension_numbers = #tpu.dot_dimension_numbers<[1], [0], [0], [1], [0, 0, 1, 1], [], []>} : vector<256x48xbf16>, vector<48x512xbf16>, vector<256x512xf32> -> vector<256x512xf32>
    %c0_38 = arith.constant 0 : index
    %c0_39 = arith.constant 0 : index
    %46 = vector.load %arg3[%c0_38, %c0_39] : memref<1x512xf32, #tpu.memory_space<vmem>>, vector<1x512xf32>
    %47 = vector.broadcast %46 : vector<1x512xf32> to vector<256x512xf32>
    %48 = arith.addf %45, %47 : vector<256x512xf32>
    %cst_40 = arith.constant 0.000000e+00 : f32
    %49 = vector.broadcast %cst_40 : f32 to vector<256x512xf32>
    %50 = arith.maximumf %48, %49 : vector<256x512xf32>
    %c0_41 = arith.constant 0 : index
    %c0_42 = arith.constant 0 : index
    %51 = vector.load %arg4[%c0_41, %c0_42] : memref<128x256xbf16, #tpu.memory_space<vmem>>, vector<128x256xbf16>
    %52 = arith.truncf %50 : vector<256x512xf32> to vector<256x512xbf16>
    %cst_43 = arith.constant dense<0.000000e+00> : vector<128x512xf32>
    %53 = tpu.matmul %51, %52, %cst_43 {dimension_numbers = #tpu.dot_dimension_numbers<[1], [0], [0], [1], [0, 0, 1, 1], [], []>} : vector<128x256xbf16>, vector<256x512xbf16>, vector<128x512xf32> -> vector<128x512xf32>
    %c0_44 = arith.constant 0 : index
    %c0_45 = arith.constant 0 : index
    %54 = vector.load %arg5[%c0_44, %c0_45] : memref<128x1xf32, #tpu.memory_space<vmem>>, vector<128x1xf32>
    %55 = vector.broadcast %54 : vector<128x1xf32> to vector<128x512xf32>
    %56 = arith.addf %53, %55 : vector<128x512xf32>
    %cst_46 = arith.constant 0.000000e+00 : f32
    %57 = vector.broadcast %cst_46 : f32 to vector<128x512xf32>
    %58 = arith.maximumf %56, %57 : vector<128x512xf32>
    %c0_47 = arith.constant 0 : index
    %c0_48 = arith.constant 0 : index
    %59 = vector.load %arg6[%c0_47, %c0_48] : memref<64x128xbf16, #tpu.memory_space<vmem>>, vector<64x128xbf16>
    %60 = arith.truncf %58 : vector<128x512xf32> to vector<128x512xbf16>
    %cst_49 = arith.constant dense<0.000000e+00> : vector<64x512xf32>
    %61 = tpu.matmul %59, %60, %cst_49 {dimension_numbers = #tpu.dot_dimension_numbers<[1], [0], [0], [1], [0, 0, 1, 1], [], []>} : vector<64x128xbf16>, vector<128x512xbf16>, vector<64x512xf32> -> vector<64x512xf32>
    %c0_50 = arith.constant 0 : index
    %c0_51 = arith.constant 0 : index
    %62 = vector.load %arg7[%c0_50, %c0_51] : memref<64x1xf32, #tpu.memory_space<vmem>>, vector<64x1xf32>
    %63 = vector.broadcast %62 : vector<64x1xf32> to vector<64x512xf32>
    %64 = arith.addf %61, %63 : vector<64x512xf32>
    %cst_52 = arith.constant 0.000000e+00 : f32
    %65 = vector.broadcast %cst_52 : f32 to vector<64x512xf32>
    %66 = arith.maximumf %64, %65 : vector<64x512xf32>
    %c0_53 = arith.constant 0 : index
    %c0_54 = arith.constant 0 : index
    %67 = vector.load %arg8[%c0_53, %c0_54] : memref<32x64xbf16, #tpu.memory_space<vmem>>, vector<32x64xbf16>
    %68 = arith.truncf %66 : vector<64x512xf32> to vector<64x512xbf16>
    %cst_55 = arith.constant dense<0.000000e+00> : vector<32x512xf32>
    %69 = tpu.matmul %67, %68, %cst_55 {dimension_numbers = #tpu.dot_dimension_numbers<[1], [0], [0], [1], [0, 0, 1, 1], [], []>} : vector<32x64xbf16>, vector<64x512xbf16>, vector<32x512xf32> -> vector<32x512xf32>
    %c0_56 = arith.constant 0 : index
    %c0_57 = arith.constant 0 : index
    %70 = vector.load %arg9[%c0_56, %c0_57] : memref<32x1xf32, #tpu.memory_space<vmem>>, vector<32x1xf32>
    %71 = vector.broadcast %70 : vector<32x1xf32> to vector<32x512xf32>
    %72 = arith.addf %69, %71 : vector<32x512xf32>
    %cst_58 = arith.constant 0.000000e+00 : f32
    %73 = vector.broadcast %cst_58 : f32 to vector<32x512xf32>
    %74 = arith.maximumf %72, %73 : vector<32x512xf32>
    %c0_59 = arith.constant 0 : index
    %c0_60 = arith.constant 0 : index
    %75 = vector.load %arg10[%c0_59, %c0_60] : memref<4x32xbf16, #tpu.memory_space<vmem>>, vector<4x32xbf16>
    %76 = arith.truncf %74 : vector<32x512xf32> to vector<32x512xbf16>
    %cst_61 = arith.constant dense<0.000000e+00> : vector<4x512xf32>
    %77 = tpu.matmul %75, %76, %cst_61 {dimension_numbers = #tpu.dot_dimension_numbers<[1], [0], [0], [1], [0, 0, 1, 1], [], []>} : vector<4x32xbf16>, vector<32x512xbf16>, vector<4x512xf32> -> vector<4x512xf32>
    %c0_62 = arith.constant 0 : index
    %c0_63 = arith.constant 0 : index
    %78 = vector.load %arg11[%c0_62, %c0_63] : memref<4x1xf32, #tpu.memory_space<vmem>>, vector<4x1xf32>
    %79 = vector.broadcast %78 : vector<4x1xf32> to vector<4x512xf32>
    %80 = arith.addf %77, %79 : vector<4x512xf32>
    %c1_64 = arith.constant 1 : index
    %c0_65 = arith.constant 0 : index
    %c0_66 = arith.constant 0 : index
    %81 = vector.load %arg12[%c1_64, %c0_65, %c0_66] : memref<2x4x512xf32, #tpu.memory_space<vmem>>, vector<1x4x512xf32>
    %82 = vector.shape_cast %81 : vector<1x4x512xf32> to vector<4x512xf32>
    %83 = vector.shape_cast %80 : vector<4x512xf32> to vector<1x4x512xf32>
    tpu.vector_store %arg12[%c1_64, %c0_65, %c0_66], %83 {strides = array<i32>} : memref<2x4x512xf32, #tpu.memory_space<vmem>>, vector<1x4x512xf32>,
    return
  }
  func.func @transform_0(%arg0: i32) -> (i32, i32, i32) {
    %c0_i32 = arith.constant 0 : i32
    %c0_i32_0 = arith.constant 0 : i32
    %c0_i32_1 = arith.constant 0 : i32
    return %arg0, %c0_i32, %c0_i32_0 : i32, i32, i32
  }
  func.func @transform_1(%arg0: i32) -> (i32, i32) {
    %c0_i32 = arith.constant 0 : i32
    %c0_i32_0 = arith.constant 0 : i32
    %c0_i32_1 = arith.constant 0 : i32
    return %c0_i32, %c0_i32_0 : i32, i32
  }
  func.func @transform_2(%arg0: i32) -> (i32, i32) {
    %c0_i32 = arith.constant 0 : i32
    %c0_i32_0 = arith.constant 0 : i32
    %c0_i32_1 = arith.constant 0 : i32
    return %c0_i32, %c0_i32_0 : i32, i32
  }
  func.func @transform_3(%arg0: i32) -> (i32, i32) {
    %c0_i32 = arith.constant 0 : i32
    %c0_i32_0 = arith.constant 0 : i32
    %c0_i32_1 = arith.constant 0 : i32
    return %c0_i32, %c0_i32_0 : i32, i32
  }
  func.func @transform_4(%arg0: i32) -> (i32, i32) {
    %c0_i32 = arith.constant 0 : i32
    %c0_i32_0 = arith.constant 0 : i32
    %c0_i32_1 = arith.constant 0 : i32
    return %c0_i32, %c0_i32_0 : i32, i32
  }
  func.func @transform_5(%arg0: i32) -> (i32, i32) {
    %c0_i32 = arith.constant 0 : i32
    %c0_i32_0 = arith.constant 0 : i32
    %c0_i32_1 = arith.constant 0 : i32
    return %c0_i32, %c0_i32_0 : i32, i32
  }
  func.func @transform_6(%arg0: i32) -> (i32, i32) {
    %c0_i32 = arith.constant 0 : i32
    %c0_i32_0 = arith.constant 0 : i32
    %c0_i32_1 = arith.constant 0 : i32
    return %c0_i32, %c0_i32_0 : i32, i32
  }
  func.func @transform_7(%arg0: i32) -> (i32, i32) {
    %c0_i32 = arith.constant 0 : i32
    %c0_i32_0 = arith.constant 0 : i32
    %c0_i32_1 = arith.constant 0 : i32
    return %c0_i32, %c0_i32_0 : i32, i32
  }
  func.func @transform_8(%arg0: i32) -> (i32, i32) {
    %c0_i32 = arith.constant 0 : i32
    %c0_i32_0 = arith.constant 0 : i32
    %c0_i32_1 = arith.constant 0 : i32
    return %c0_i32, %c0_i32_0 : i32, i32
  }
  func.func @transform_9(%arg0: i32) -> (i32, i32) {
    %c0_i32 = arith.constant 0 : i32
    %c0_i32_0 = arith.constant 0 : i32
    %c0_i32_1 = arith.constant 0 : i32
    return %c0_i32, %c0_i32_0 : i32, i32
  }
  func.func @transform_10(%arg0: i32) -> (i32, i32) {
    %c0_i32 = arith.constant 0 : i32
    %c0_i32_0 = arith.constant 0 : i32
    %c0_i32_1 = arith.constant 0 : i32
    return %c0_i32, %c0_i32_0 : i32, i32
  }
  func.func @transform_11(%arg0: i32) -> (i32, i32, i32) {
    %c0_i32 = arith.constant 0 : i32
    %c0_i32_0 = arith.constant 0 : i32
    %c0_i32_1 = arith.constant 0 : i32
    return %arg0, %c0_i32, %c0_i32_0 : i32, i32, i32
  }
}

</mosaic_0001>

<bundles_post_ra>
// kernel: toric_code_net_forward.1
= control target key start
LH: loop header
LB: loop body
LE: loop exit
PB: predicated region body
PF: predicated region fallthrough
CT: control target
= control target key end

     0   :  { %16 = vsyncpa [#allocation3], 0  ;;  %s5906_s0 = inlined_call_operand.vmem [shape: bf16[4,256,48], index: 0, kind: input, shape index: {}]   ;;  %s5907_s1 = inlined_call_operand.vmem [shape: bf16[48,512], index: 1, kind: input, shape index: {}]   ;;  %s5908_s2 = inlined_call_operand.vmem [shape: f32[1,512], index: 2, kind: input, shape index: {}]   ;;  %s5909_s3 = inlined_call_operand.vmem [shape: bf16[128,256], index: 3, kind: input, shape index: {}]   ;;  %s5910_s4 = inlined_call_operand.vmem [shape: f32[128,1], index: 4, kind: input, shape index: {}]   ;;  %s5911_s5 = inlined_call_operand.vmem [shape: bf16[64,128], index: 5, kind: input, shape index: {}]   ;;  %s5912_s6 = inlined_call_operand.vmem [shape: f32[64,1], index: 6, kind: input, shape index: {}]   ;;  %s5913_s7 = inlined_call_operand.vmem [shape: bf16[32,64], index: 7, kind: input, shape index: {}]   ;;  %s5914_s8 = inlined_call_operand.vmem [shape: f32[32,1], index: 8, kind: input, shape index: {}]   ;;  %s5915_s9 = inlined_call_operand.vmem [shape: bf16[4,32], index: 9, kind: input, shape index: {}]   ;;  %s5916_s10 = inlined_call_operand.vmem [shape: f32[4,1], index: 10, kind: input, shape index: {}]   ;;  %s5917_s11 = inlined_call_operand.hbm [shape: f32[4,4,512], index: 11, kind: output, shape index: {}]  }
   0x1   :  { %18 = vsyncpa [#allocation3 + $0x1], 0  ;;  %s4793_s17 = smov 0   ;;  %s4795_s18 = smov 0  }
   0x2   :  { %s4797_s19 = smov 0   ;;  %s4799_s20 = smov 0  }
   0x3 LB: > { %5921 = sst [smem:[#allocation5_spill]] %s4723_s19  ;;  %s4814_s21 = sadd.s32 4294967295, %s4727_s20   ;;  %s4727_s20 = sphi %s4799_s20, %s5926_s20   ;;  %s4723_s19 = sphi %s4797_s19, %s5928_s19   ;;  %s4719_s18 = sphi %s4795_s18, %s5930_s18   ;;  %s4715_s17 = sphi %s4793_s17, %s5929_s17  }
   0x4   : > { %s4266_s22 = sadd.s32 4294967294, %s4727_s20   ;;  %s4818_s23 = sadd.s32 1, %s4727_s20  }
   0x5   : > { %5922 = sst [smem:[#allocation6_spill]] %s4818_s23  ;;  %s267_s24 = sadd.s32 1, %s4723_s19 }
   0x6   : > { %s264_s25 = ssub.s32 %s4727_s20, %s4818_s23  ;;  %p277_p0 = scmp.ne.s32.totalorder %s4723_s19, %s4719_s18 }
   0x7   : > { %p265_p1 = scmp.eq.s32.totalorder %s264_s25, 0  ;;  %p278_p2 = scmp.eq.s32.totalorder %s4814_s21, 1 }
   0x8   : > { %p283_p3 = scmp.ne.s32.totalorder %s4719_s18, %s4715_s17  ;;  %p284_p4 = scmp.eq.s32.totalorder %s4266_s22, 1 }
   0x9   : > { %s4829_s26 = scalar_select %p265_p1, %s4723_s19, %s267_s24  }
   0xa   : > { %p4831_p5 = por %p278_p2, %p277_p0  ;;  %p4835_p6 = por %p284_p4, %p283_p3 }
   0xb   : > { %5923 = sst [smem:[#allocation7_spill]] %s4829_s26  ;;  %p4269_p7 = scmp.ge.s32.totalorder %s4727_s20, 1 }
   0xc   : > { %p342_p8 = scmp.lt.s32.totalorder %s4727_s20, 3 }
   0xe   : > { %p343_p9 = pnand %p4269_p7, %p342_p8 }
   0xf   : > { %v4537_v0 = vld [vmem:[%s5907_s1 + $0x4] ss:$16 sps:$4 sm:$0xff] (!%p343_p9)   ;;  %s4271_s12 = sshll.u32 (!%p343_p9), %s4814_s21, 1  ;;  %v4539_v1 = vld [vmem:[%s5907_s1 + $0xc] ss:$16 sps:$4 sm:$0xff] (!%p343_p9)   ;;  %v4729_v2 = vmov (!%p343_p9), 0   ;;  %v438_v31 = vlaneseq (!%p343_p9) }
  0x10   : > { %346 = sbr.rel (%p343_p9) target bundleno = 2490 (0x9ba), region = 64  ;;  %679 = vmatprep.mubr.bf16.mxu0 (!%p343_p9), %v4729_v2  ;;  %872 = vmatprep.mubr.bf16.mxu1 (!%p343_p9), %v4729_v2  ;;  %p384_p10 = scmp.lt.s32.totalorder (!%p343_p9), %s4271_s12, 3  ;;  %v4541_v3 = vld [vmem:[%s5907_s1] ss:$16 sps:$4 sm:$0xff] (!%p343_p9)   ;;  %v4542_v4 = vld [vmem:[%s5907_s1 + $0x8] ss:$16 sps:$4 sm:$0xff] (!%p343_p9)  }
  0x11   : > { %647 = vmatprep.subr.bf16.mxu0 (!%p343_p9), %v4537_v0  ;;  %4535 = vset.pattern.permute.xlu0 (!%p343_p9), %v4729_v2  ;;  %v4543_v5 = vld [vmem:[%s5907_s1 + $0x24] ss:$16 sps:$4 sm:$0xff] (!%p343_p9)   ;;  %v4545_v6 = vld [vmem:[%s5907_s1 + $0x2c] ss:$16 sps:$4 sm:$0xff] (!%p343_p9)   ;;  %v4547_v7 = vld [vmem:[%s5907_s1 + $0x20] ss:$16 sps:$4 sm:$0xff] (!%p343_p9)  }
  0x12   : > { %840 = vmatprep.subr.bf16.mxu1 (!%p343_p9), %v4539_v1  ;;  %4536 = vset.pattern.permute.xlu1 (!%p343_p9), %v4729_v2  ;;  %v4548_v8 = vld [vmem:[%s5907_s1 + $0x28] ss:$16 sps:$4 sm:$0xff] (!%p343_p9)   ;;  %v4549_v9 = vld [vmem:[%s5907_s1 + $0x44] ss:$16 sps:$4 sm:$0xff] (!%p343_p9)   ;;  %v4551_v10 = vld [vmem:[%s5907_s1 + $0x4c] ss:$16 sps:$4 sm:$0xff] (!%p343_p9)  }
  0x13   : > { %648 = vmatpush1.bf16.msra.mxu0 (!%p343_p9), %v4541_v3  ;;  %841 = vmatpush1.bf16.msra.mxu1 (!%p343_p9), %v4542_v4  ;;  %v4553_v11 = vld [vmem:[%s5907_s1 + $0x40] ss:$16 sps:$4 sm:$0xff] (!%p343_p9)   ;;  %v4554_v12 = vld [vmem:[%s5907_s1 + $0x48] ss:$16 sps:$4 sm:$0xff] (!%p343_p9)   ;;  %vm598_vm0 = vcmask (!%p343_p9), 392192   ;;  %v4988_v34 = vshrl.u32 (!%p343_p9), %v438_v31, 7 }
  0x14   : > { %649 = vmatprep.subr.bf16.mxu0 (!%p343_p9), %v4543_v5  ;;  %842 = vmatprep.subr.bf16.mxu1 (!%p343_p9), %v4545_v6  ;;  %v4968_v29 = vld [vmem:[%s5910_s4] sm:$0xff] (!%p343_p9)  ;;  %v4974_v30 = vld [vmem:[%s5910_s4 + $0x8] sm:$0xff] (!%p343_p9)  ;;  %v4980_v32 = vld [vmem:[%s5910_s4 + $0x10] sm:$0xff] (!%p343_p9)  ;;  %vm2051_vm1 = vcmask (!%p343_p9), 523264   ;;  %vm2195_vm2 = vcmask (!%p343_p9), 261120   ;;  %s4492_s13 = sshll.u32 (!%p343_p9), %s4814_s21, 9 }
  0x15   : > { %1259 = vperm.xlu0 (!%p343_p9), %4535, %v4968_v29   ;;  %v4985_v33 = vld [vmem:[%s5910_s4 + $0x20] sm:$0xff] (!%p343_p9)  ;;  %1269 = vperm.xlu1 (!%p343_p9), %4536, %v4980_v32   ;;  %v4994_v35 = vld [vmem:[%s5910_s4 + $0x18] sm:$0xff] (!%p343_p9)  ;;  %v4999_v36 = vld [vmem:[%s5910_s4 + $0x30] sm:$0xff] (!%p343_p9)  ;;  %v440_v37 = vsub.s32 (!%p343_p9), 0, %v4988_v34  ;;  %v448_v38 = vsub.s32 (!%p343_p9), 2, %v4988_v34  ;;  %v444_v40 = vsub.s32 (!%p343_p9), 1, %v4988_v34  ;;  %s5859_s15 = scalar_lea.hbm (!%p343_p9), %s5917_s11, %s4492_s13 }
  0x16   : > { %v436_v39 = vld [vmem:[%s5908_s2] sm:$0xf] (!%p343_p9)  ;;  %v452_v41 = vsub.s32 (!%p343_p9), 3, %v4988_v34  ;;  %v5013_v42 = vld [vmem:[%s5910_s4 + $0x28] sm:$0xff] (!%p343_p9)  ;;  %v5041_v50 = vld [vmem:[%s5910_s4 + $0x38] sm:$0xff] (!%p343_p9) }
  0x17   : > { %s5932_s12 = smov (!%p384_p10, %s4271_s12), 3  ;;  %650 = vmatpush1.bf16.msra.mxu0 %v4547_v7  ;;  %843 = vmatpush1.bf16.msra.mxu1 %v4548_v8  ;;  %v5018_v43 = vld [vmem:[%s5910_s4 + $0x40] sm:$0xff]  ;;  %v5022_v44 = vrot.slane %v436_v39, %v440_v37  ;;  %v5026_v45 = vrot.slane %v436_v39, %v448_v38  ;;  %v5032_v46 = vrot.slane %v436_v39, %v444_v40  ;;  %v5046_v51 = vld [vmem:[%s5910_s4 + $0x50] sm:$0xff]  ;;  %v5057_v60 = vld [vmem:[%s5910_s4 + $0x48] sm:$0xff] }
  0x18   : > { %s4490_s24 = sshll.u32 %s5932_s12, 7  ;;  %651 = vmatprep.subr.bf16.mxu0 %v4549_v9  ;;  %844 = vmatprep.subr.bf16.mxu1 %v4551_v10  ;;  %v5036_v47 = vrot.slane %v436_v39, %v452_v41  ;;  %v5062_v61 = vld [vmem:[%s5910_s4 + $0x60] sm:$0xff]  ;;  %v5092_v39 = vld [vmem:[%s5910_s4 + $0x68] sm:$0xff] }
  0x19   : > { %s4882_s23 = scalar_lea.vmem %s5906_s0, %s4490_s24  ;;  %1264 = vperm.xlu0 %4535, %v4974_v30   ;;  %1274 = vperm.xlu1 %4536, %v4994_v35   ;;  %v4573_v5 = vld [vmem:[%s5909_s3 + $0x4] ss:$8 sps:$4 sm:$0xff]  }
  0x1a   : > { %v4555_v13 = vld [vmem:[%s4882_s23] sm:$0xff]   ;;  %v4556_v14 = vld [vmem:[%s4882_s23 + $0x8] sm:$0xff]   ;;  %v4557_v15 = vld [vmem:[%s4882_s23 + $0x10] sm:$0xff]  }
  0x1b   : > { %652 = vmatpush1.bf16.msra.mxu0 %v4553_v11  ;;  %845 = vmatpush1.bf16.msra.mxu1 %v4554_v12  ;;  %v4558_v16 = vld [vmem:[%s4882_s23 + $0x18] sm:$0xff]   ;;  %v4559_v17 = vld [vmem:[%s4882_s23 + $0x20] sm:$0xff]   ;;  %v4560_v18 = vld [vmem:[%s4882_s23 + $0x28] sm:$0xff]  }
  0x1c   : > { %v4561_v19 = vld [vmem:[%s4882_s23 + $0x30] sm:$0xff]   ;;  %v4562_v20 = vld [vmem:[%s4882_s23 + $0x38] sm:$0xff]   ;;  %v4563_v21 = vld [vmem:[%s4882_s23 + $0x40] sm:$0xff]  }
  0x1d   : > { %v4564_v22 = vld [vmem:[%s4882_s23 + $0x48] sm:$0xff]   ;;  %v4565_v23 = vld [vmem:[%s4882_s23 + $0x50] sm:$0xff]   ;;  %v4566_v24 = vld [vmem:[%s4882_s23 + $0x58] sm:$0xff]   ;;  %1279 = vperm.xlu0 %4535, %v4985_v33   ;;  %1284 = vperm.xlu1 %4536, %v5013_v42  }
  0x1e   : > { %4302 = vmatmul.mubr.msk.bf16.vlgmr.msra.gmra.mrb[0].mxu0 %vm598_vm0, %v4555_v13  ;;  %4318 = vmatmul.mubr.msk.bf16.vlgmr.msra.gmra.mrb[0].mxu1 %vm598_vm0, %v4555_v13  ;;  %v4567_v25 = vld [vmem:[%s4882_s23 + $0x60] sm:$0xff]   ;;  %v4568_v26 = vld [vmem:[%s4882_s23 + $0x68] sm:$0xff]   ;;  %v4569_v27 = vld [vmem:[%s4882_s23 + $0x70] sm:$0xff]  }
  0x1f   : > { %689 = vmatprep.mubr.bf16.mxu0 %v4729_v2  ;;  %882 = vmatprep.mubr.bf16.mxu1 %v4729_v2  ;;  %v4570_v28 = vld [vmem:[%s4882_s23 + $0x78] sm:$0xff]  }
  0x21   : > { %1289 = vperm.xlu0 %4535, %v4999_v36   ;;  %1294 = vperm.xlu1 %4536, %v5041_v50  }
  0x25   : > { %1299 = vperm.xlu0 %4535, %v5018_v43   ;;  %1304 = vperm.xlu1 %4536, %v5057_v60  }
  0x26   : > { %4303 = vmatmul.mubr.msk.bf16.gmra.mrb[4].mxu0 %vm598_vm0, %v4556_v14  ;;  %4319 = vmatmul.mubr.msk.bf16.gmra.mrb[4].mxu1 %vm598_vm0, %v4556_v14  ;;  %v5076_v14 = vld [vmem:[%s5910_s4 + $0x58] sm:$0xff] }
  0x27   : > { %699 = vmatprep.mubr.bf16.mxu0 %v4729_v2  ;;  %892 = vmatprep.mubr.bf16.mxu1 %v4729_v2 }
  0x29   : > { %1309 = vperm.xlu0 %4535, %v5046_v51   ;;  %1314 = vperm.xlu1 %4536, %v5076_v14  }
  0x2d   : > { %1319 = vperm.xlu0 %4535, %v5062_v61   ;;  %1324 = vperm.xlu1 %4536, %v5092_v39  }
  0x2e   : > { %4304 = vmatmul.mubr.msk.bf16.gmra.mrb[8].mxu0 %vm598_vm0, %v4557_v15  ;;  %4320 = vmatmul.mubr.msk.bf16.gmra.mrb[8].mxu1 %vm598_vm0, %v4557_v15  ;;  %v5081_v15 = vld [vmem:[%s5910_s4 + $0x70] sm:$0xff] }
  0x2f   : > { %709 = vmatprep.mubr.bf16.mxu0 %v4729_v2  ;;  %902 = vmatprep.mubr.bf16.mxu1 %v4729_v2 }
  0x31   : > { %1329 = vperm.xlu0 %4535, %v5081_v15  }
  0x36   : > { %4305 = vmatmul.mubr.msk.bf16.gmra.mrb[12].mxu0 %vm598_vm0, %v4558_v16  ;;  %4321 = vmatmul.mubr.msk.bf16.gmra.mrb[12].mxu1 %vm598_vm0, %v4558_v16 }
  0x37   : > { %719 = vmatprep.mubr.bf16.mxu0 %v4729_v2  ;;  %912 = vmatprep.mubr.bf16.mxu1 %v4729_v2 }
  0x3e   : > { %4306 = vmatmul.mubr.msk.bf16.gmra.mrb[16].mxu0 %vm598_vm0, %v4559_v17  ;;  %4322 = vmatmul.mubr.msk.bf16.gmra.mrb[16].mxu1 %vm598_vm0, %v4559_v17 }
  0x3f   : > { %729 = vmatprep.mubr.bf16.mxu0 %v4729_v2  ;;  %922 = vmatprep.mubr.bf16.mxu1 %v4729_v2 }
  0x46   : > { %4307 = vmatmul.mubr.msk.bf16.gmra.mrb[20].mxu0 %vm598_vm0, %v4560_v18  ;;  %4323 = vmatmul.mubr.msk.bf16.gmra.mrb[20].mxu1 %vm598_vm0, %v4560_v18 }
  0x47   : > { %739 = vmatprep.mubr.bf16.mxu0 %v4729_v2  ;;  %932 = vmatprep.mubr.bf16.mxu1 %v4729_v2 }
  0x4e   : > { %4308 = vmatmul.mubr.msk.bf16.gmra.mrb[24].mxu0 %vm598_vm0, %v4561_v19  ;;  %4324 = vmatmul.mubr.msk.bf16.gmra.mrb[24].mxu1 %vm598_vm0, %v4561_v19 }
  0x4f   : > { %749 = vmatprep.mubr.bf16.mxu0 %v4729_v2  ;;  %942 = vmatprep.mubr.bf16.mxu1 %v4729_v2 }
  0x56   : > { %4309 = vmatmul.mubr.msk.bf16.gmra.mrb[28].mxu0 %vm598_vm0, %v4562_v20  ;;  %4325 = vmatmul.mubr.msk.bf16.gmra.mrb[28].mxu1 %vm598_vm0, %v4562_v20 }
  0x57   : > { %759 = vmatprep.mubr.bf16.mxu0 %v4729_v2  ;;  %952 = vmatprep.mubr.bf16.mxu1 %v4729_v2 }
  0x5e   : > { %4310 = vmatmul.mubr.msk.bf16.gmra.mrb[32].mxu0 %vm598_vm0, %v4563_v21  ;;  %4326 = vmatmul.mubr.msk.bf16.gmra.mrb[32].mxu1 %vm598_vm0, %v4563_v21 }
  0x5f   : > { %769 = vmatprep.mubr.bf16.mxu0 %v4729_v2  ;;  %962 = vmatprep.mubr.bf16.mxu1 %v4729_v2 }
  0x66   : > { %4311 = vmatmul.mubr.msk.bf16.gmra.mrb[36].mxu0 %vm598_vm0, %v4564_v22  ;;  %4327 = vmatmul.mubr.msk.bf16.gmra.mrb[36].mxu1 %vm598_vm0, %v4564_v22 }
  0x67   : > { %779 = vmatprep.mubr.bf16.mxu0 %v4729_v2  ;;  %972 = vmatprep.mubr.bf16.mxu1 %v4729_v2 }
  0x6e   : > { %4312 = vmatmul.mubr.msk.bf16.gmra.mrb[40].mxu0 %vm598_vm0, %v4565_v23  ;;  %4328 = vmatmul.mubr.msk.bf16.gmra.mrb[40].mxu1 %vm598_vm0, %v4565_v23 }
  0x6f   : > { %789 = vmatprep.mubr.bf16.mxu0 %v4729_v2  ;;  %982 = vmatprep.mubr.bf16.mxu1 %v4729_v2 }
  0x76   : > { %4313 = vmatmul.mubr.msk.bf16.gmra.mrb[44].mxu0 %vm598_vm0, %v4566_v24  ;;  %4329 = vmatmul.mubr.msk.bf16.gmra.mrb[44].mxu1 %vm598_vm0, %v4566_v24 }
  0x77   : > { %799 = vmatprep.mubr.bf16.mxu0 %v4729_v2  ;;  %992 = vmatprep.mubr.bf16.mxu1 %v4729_v2 }
  0x7e   : > { %4314 = vmatmul.mubr.msk.bf16.gmra.mrb[48].mxu0 %vm598_vm0, %v4567_v25  ;;  %4330 = vmatmul.mubr.msk.bf16.gmra.mrb[48].mxu1 %vm598_vm0, %v4567_v25 }
  0x7f   : > { %809 = vmatprep.mubr.bf16.mxu0 %v4729_v2  ;;  %1002 = vmatprep.mubr.bf16.mxu1 %v4729_v2 }
  0x86   : > { %4315 = vmatmul.mubr.msk.bf16.gmra.mrb[52].mxu0 %vm598_vm0, %v4568_v26  ;;  %4331 = vmatmul.mubr.msk.bf16.gmra.mrb[52].mxu1 %vm598_vm0, %v4568_v26 }
  0x87   : > { %819 = vmatprep.mubr.bf16.mxu0 %v4729_v2  ;;  %1012 = vmatprep.mubr.bf16.mxu1 %v4729_v2 }
  0x8e   : > { %4316 = vmatmul.mubr.msk.bf16.gmra.mrb[56].mxu0 %vm598_vm0, %v4569_v27  ;;  %4332 = vmatmul.mubr.msk.bf16.gmra.mrb[56].mxu1 %vm598_vm0, %v4569_v27 }
  0x8f   : > { %829 = vmatprep.mubr.bf16.mxu0 %v4729_v2  ;;  %1022 = vmatprep.mubr.bf16.mxu1 %v4729_v2 }
  0x96   : > { %4317 = vmatmul.mubr.msk.bf16.gmra.mrb[60].mxu0 %vm598_vm0, %v4570_v28  ;;  %4333 = vmatmul.mubr.msk.bf16.gmra.mrb[60].mxu1 %vm598_vm0, %v4570_v28 }
  0x97   : > { %1449 = vmatprep.mubr.bf16.mxu0 %v4573_v5  ;;  %1562 = vmatprep.mubr.bf16.mxu1 %v4573_v5  ;;  %v5113_v5 = vld [vmem:[%s5912_s6 + $0x10] sm:$0xff] }
  0xf1   : > { %v681_v48 = vpop.f32.mrb[0].mxu0  ;;  %v874_v49 = vpop.f32.mrb[0].mxu1 }
  0xf2   : > { %v682_v52 = vadd.f32 %v681_v48, %v5022_v44  ;;  %v875_v53 = vadd.f32 %v874_v49, %v5026_v45  ;;  %v683_v54 = vpop.f32.mrb[1].mxu0  ;;  %v876_v55 = vpop.f32.mrb[1].mxu1  ;;  %v5097_v48 = vld [vmem:[%s5912_s6] sm:$0xff] }
  0xf3   : > { %v684_v56 = vadd.f32 %v683_v54, %v5032_v46  ;;  %v877_v57 = vadd.f32 %v876_v55, %v5036_v47  ;;  %v685_v58 = vpop.f32.mrb[2].mxu0  ;;  %v878_v59 = vpop.f32.mrb[2].mxu1  ;;  %1757 = vperm.xlu0 %4535, %v5097_v48  }
  0xf4   : > { %v686_v62 = vadd.f32 %v685_v58, %v5022_v44  ;;  %v879_v63 = vadd.f32 %v878_v59, %v5026_v45  ;;  %v687_v0 = vpop.f32.mrb[3].mxu0  ;;  %v880_v1 = vpop.f32.mrb[3].mxu1  ;;  %v1033_v6 = vmax.f32 %v682_v52, 0.0  ;;  %v1035_v7 = vmax.f32 %v875_v53, 0.0 }
  0xf5   : > { %v688_v3 = vadd.f32 %v687_v0, %v5032_v46  ;;  %v881_v4 = vadd.f32 %v880_v1, %v5036_v47  ;;  %v1034_v10 = vmax.f32 %v684_v56, 0.0  ;;  %v1036_v11 = vmax.f32 %v877_v57, 0.0 }
  0xf6   : > { %v1037_v8 = vmax.f32 %v686_v62, 0.0  ;;  %v1039_v9 = vmax.f32 %v879_v63, 0.0 }
  0xf7   : > { %v1038_v12 = vmax.f32 %v688_v3, 0.0  ;;  %v1040_v13 = vmax.f32 %v881_v4, 0.0  ;;  %v5108_v4 = vld [vmem:[%s5910_s4 + $0x78] sm:$0xff]  ;;  %1767 = vperm.xlu0 %4535, %v5113_v5  }
  0xf8   : > { %v1177_v16 = vpack.c.bf16 %v1037_v8, %v1033_v6  ;;  %v1179_v17 = vpack.c.bf16 %v1039_v9, %v1035_v7  ;;  %1334 = vperm.xlu1 %4536, %v5108_v4  }
  0xf9   : > { %v1178_v18 = vpack.c.bf16 %v1038_v12, %v1034_v10  ;;  %v1180_v19 = vpack.c.bf16 %v1040_v13, %v1036_v11  ;;  %v691_v20 = vpop.f32.mrb[4].mxu0  ;;  %v884_v21 = vpop.f32.mrb[4].mxu1 }
  0xfa   : > { %v692_v22 = vadd.f32 %v691_v20, %v5022_v44  ;;  %v885_v23 = vadd.f32 %v884_v21, %v5026_v45  ;;  %v693_v24 = vpop.f32.mrb[5].mxu0  ;;  %v886_v25 = vpop.f32.mrb[5].mxu1 }
  0xfb   : > { %v694_v26 = vadd.f32 %v693_v24, %v5032_v46  ;;  %v887_v27 = vadd.f32 %v886_v25, %v5036_v47  ;;  %v695_v28 = vpop.f32.mrb[6].mxu0  ;;  %v888_v31 = vpop.f32.mrb[6].mxu1  ;;  %1417 = vmatprep.subr.bf16.mxu0 %v1178_v18  ;;  %1530 = vmatprep.subr.bf16.mxu1 %v1180_v19 }
  0xfc   : > { %v696_v49 = vadd.f32 %v695_v28, %v5022_v44  ;;  %v889_v52 = vadd.f32 %v888_v31, %v5026_v45  ;;  %v697_v53 = vpop.f32.mrb[7].mxu0  ;;  %v890_v54 = vpop.f32.mrb[7].mxu1  ;;  %1418 = vmatpush1.bf16.msra.mxu0 %v1177_v16  ;;  %1531 = vmatpush1.bf16.msra.mxu1 %v1179_v17  ;;  %v1041_v57 = vmax.f32 %v692_v22, 0.0  ;;  %v1043_v58 = vmax.f32 %v885_v23, 0.0  ;;  %v5124_v22 = vld [vmem:[%s5912_s6 + $0x8] sm:$0xff]  ;;  %v5129_v23 = vld [vmem:[%s5912_s6 + $0x20] sm:$0xff] }
  0xfd   : > { %v698_v55 = vadd.f32 %v697_v53, %v5032_v46  ;;  %v891_v56 = vadd.f32 %v890_v54, %v5036_v47  ;;  %v1042_v63 = vmax.f32 %v694_v26, 0.0  ;;  %v1044_v0 = vmax.f32 %v887_v27, 0.0  ;;  %1762 = vperm.xlu1 %4536, %v5124_v22   ;;  %1777 = vperm.xlu0 %4535, %v5129_v23  }
  0xfe   : > { %v1045_v59 = vmax.f32 %v696_v49, 0.0  ;;  %v1047_v62 = vmax.f32 %v889_v52, 0.0 }
  0xff   : > { %v1046_v1 = vmax.f32 %v698_v55, 0.0  ;;  %v1048_v3 = vmax.f32 %v891_v56, 0.0 }
 0x100   : > { %v1181_v6 = vpack.c.bf16 %v1045_v59, %v1041_v57  ;;  %v1183_v7 = vpack.c.bf16 %v1047_v62, %v1043_v58  ;;  %v5140_v59 = vld [vmem:[%s5912_s6 + $0x18] sm:$0xff]  ;;  %v5145_v62 = vld [vmem:[%s5912_s6 + $0x30] sm:$0xff] }
 0x101   : > { %v1182_v8 = vpack.c.bf16 %v1046_v1, %v1042_v63  ;;  %v1184_v9 = vpack.c.bf16 %v1048_v3, %v1044_v0  ;;  %v701_v10 = vpop.f32.mrb[8].mxu0  ;;  %v894_v11 = vpop.f32.mrb[8].mxu1  ;;  %1772 = vperm.xlu1 %4536, %v5140_v59   ;;  %1787 = vperm.xlu0 %4535, %v5145_v62  }
 0x102   : > { %v702_v12 = vadd.f32 %v701_v10, %v5022_v44  ;;  %v895_v13 = vadd.f32 %v894_v11, %v5026_v45  ;;  %v703_v16 = vpop.f32.mrb[9].mxu0  ;;  %v896_v17 = vpop.f32.mrb[9].mxu1 }
 0x103   : > { %v704_v18 = vadd.f32 %v703_v16, %v5032_v46  ;;  %v897_v19 = vadd.f32 %v896_v17, %v5036_v47  ;;  %v705_v20 = vpop.f32.mrb[10].mxu0  ;;  %v898_v21 = vpop.f32.mrb[10].mxu1  ;;  %1419 = vmatprep.subr.bf16.mxu0 %v1182_v8  ;;  %1532 = vmatprep.subr.bf16.mxu1 %v1184_v9 }
 0x104   : > { %v706_v24 = vadd.f32 %v705_v20, %v5022_v44  ;;  %v899_v25 = vadd.f32 %v898_v21, %v5026_v45  ;;  %v707_v26 = vpop.f32.mrb[11].mxu0  ;;  %v900_v27 = vpop.f32.mrb[11].mxu1  ;;  %1420 = vmatpush1.bf16.msra.mxu0 %v1181_v6  ;;  %1533 = vmatpush1.bf16.msra.mxu1 %v1183_v7  ;;  %v1049_v49 = vmax.f32 %v702_v12, 0.0  ;;  %v1051_v52 = vmax.f32 %v895_v13, 0.0 }
 0x105   : > { %v708_v28 = vadd.f32 %v707_v26, %v5032_v46  ;;  %v901_v31 = vadd.f32 %v900_v27, %v5036_v47  ;;  %v1050_v55 = vmax.f32 %v704_v18, 0.0  ;;  %v1052_v56 = vmax.f32 %v897_v19, 0.0  ;;  %v5156_v18 = vld [vmem:[%s5912_s6 + $0x28] sm:$0xff]  ;;  %v5161_v19 = vld [vmem:[%s5914_s8] sm:$0xff] }
 0x106   : > { %v1053_v53 = vmax.f32 %v706_v24, 0.0  ;;  %v1055_v54 = vmax.f32 %v899_v25, 0.0  ;;  %1782 = vperm.xlu1 %4536, %v5156_v18   ;;  %2023 = vperm.xlu0 %4535, %v5161_v19  }
 0x107   : > { %v1054_v57 = vmax.f32 %v708_v28, 0.0  ;;  %v1056_v58 = vmax.f32 %v901_v31, 0.0 }
 0x108   : > { %v1185_v63 = vpack.c.bf16 %v1053_v53, %v1049_v49  ;;  %v1187_v0 = vpack.c.bf16 %v1055_v54, %v1051_v52 }
 0x109   : > { %v1186_v1 = vpack.c.bf16 %v1054_v57, %v1050_v55  ;;  %v1188_v3 = vpack.c.bf16 %v1056_v58, %v1052_v56  ;;  %v711_v6 = vpop.f32.mrb[12].mxu0  ;;  %v904_v7 = vpop.f32.mrb[12].mxu1  ;;  %v5172_v57 = vld [vmem:[%s5912_s6 + $0x38] sm:$0xff]  ;;  %v5177_v58 = vld [vmem:[%s5914_s8 + $0x10] sm:$0xff] }
 0x10a   : > { %v712_v8 = vadd.f32 %v711_v6, %v5022_v44  ;;  %v905_v9 = vadd.f32 %v904_v7, %v5026_v45  ;;  %v713_v10 = vpop.f32.mrb[13].mxu0  ;;  %v906_v11 = vpop.f32.mrb[13].mxu1  ;;  %1792 = vperm.xlu1 %4536, %v5172_v57   ;;  %2033 = vperm.xlu0 %4535, %v5177_v58  }
 0x10b   : > { %v714_v12 = vadd.f32 %v713_v10, %v5032_v46  ;;  %v907_v13 = vadd.f32 %v906_v11, %v5036_v47  ;;  %v715_v16 = vpop.f32.mrb[14].mxu0  ;;  %v908_v17 = vpop.f32.mrb[14].mxu1  ;;  %1421 = vmatprep.subr.bf16.mxu0 %v1186_v1  ;;  %1534 = vmatprep.subr.bf16.mxu1 %v1188_v3 }
 0x10c   : > { %v716_v20 = vadd.f32 %v715_v16, %v5022_v44  ;;  %v909_v21 = vadd.f32 %v908_v17, %v5026_v45  ;;  %v717_v24 = vpop.f32.mrb[15].mxu0  ;;  %v910_v25 = vpop.f32.mrb[15].mxu1  ;;  %1422 = vmatpush1.bf16.msra.mxu0 %v1185_v63  ;;  %1535 = vmatpush1.bf16.msra.mxu1 %v1187_v0  ;;  %v1057_v28 = vmax.f32 %v712_v8, 0.0  ;;  %v1059_v31 = vmax.f32 %v905_v9, 0.0 }
 0x10d   : > { %v718_v26 = vadd.f32 %v717_v24, %v5032_v46  ;;  %v911_v27 = vadd.f32 %v910_v25, %v5036_v47  ;;  %v1058_v53 = vmax.f32 %v714_v12, 0.0  ;;  %v1060_v54 = vmax.f32 %v907_v13, 0.0 }
 0x10e   : > { %v1061_v49 = vmax.f32 %v716_v20, 0.0  ;;  %v1063_v52 = vmax.f32 %v909_v21, 0.0  ;;  %v5188_v20 = vld [vmem:[%s5914_s8 + $0x8] sm:$0xff]  ;;  %3158 = vperm.xlu0 %4535, %v4968_v29  }
 0x10f   : > { %v1062_v55 = vmax.f32 %v718_v26, 0.0  ;;  %v1064_v56 = vmax.f32 %v911_v27, 0.0  ;;  %2028 = vperm.xlu1 %4536, %v5188_v20  }
 0x110   : > { %v1189_v63 = vpack.c.bf16 %v1061_v49, %v1057_v28  ;;  %v1191_v0 = vpack.c.bf16 %v1063_v52, %v1059_v31 }
 0x111   : > { %v1190_v1 = vpack.c.bf16 %v1062_v55, %v1058_v53  ;;  %v1192_v3 = vpack.c.bf16 %v1064_v56, %v1060_v54  ;;  %v721_v6 = vpop.f32.mrb[16].mxu0  ;;  %v914_v7 = vpop.f32.mrb[16].mxu1 }
 0x112   : > { %v722_v8 = vadd.f32 %v721_v6, %v5022_v44  ;;  %v915_v9 = vadd.f32 %v914_v7, %v5026_v45  ;;  %v723_v10 = vpop.f32.mrb[17].mxu0  ;;  %v916_v11 = vpop.f32.mrb[17].mxu1  ;;  %3168 = vperm.xlu0 %4535, %v4980_v32  }
 0x113   : > { %v724_v12 = vadd.f32 %v723_v10, %v5032_v46  ;;  %v917_v13 = vadd.f32 %v916_v11, %v5036_v47  ;;  %v725_v16 = vpop.f32.mrb[18].mxu0  ;;  %v918_v17 = vpop.f32.mrb[18].mxu1  ;;  %1423 = vmatprep.subr.bf16.mxu0 %v1190_v1  ;;  %1536 = vmatprep.subr.bf16.mxu1 %v1192_v3 }
 0x114   : > { %v726_v21 = vadd.f32 %v725_v16, %v5022_v44  ;;  %v919_v24 = vadd.f32 %v918_v17, %v5026_v45  ;;  %v727_v25 = vpop.f32.mrb[19].mxu0  ;;  %v920_v26 = vpop.f32.mrb[19].mxu1  ;;  %1424 = vmatpush1.bf16.msra.mxu0 %v1189_v63  ;;  %1537 = vmatpush1.bf16.msra.mxu1 %v1191_v0  ;;  %v1065_v31 = vmax.f32 %v722_v8, 0.0  ;;  %v1067_v49 = vmax.f32 %v915_v9, 0.0  ;;  %v5199_v63 = vld [vmem:[%s5914_s8 + $0x18] sm:$0xff] }
 0x115   : > { %v728_v27 = vadd.f32 %v727_v25, %v5032_v46  ;;  %v921_v28 = vadd.f32 %v920_v26, %v5036_v47  ;;  %v1066_v54 = vmax.f32 %v724_v12, 0.0  ;;  %v1068_v55 = vmax.f32 %v917_v13, 0.0  ;;  %2038 = vperm.xlu1 %4536, %v5199_v63  }
 0x116   : > { %v1069_v52 = vmax.f32 %v726_v21, 0.0  ;;  %v1071_v53 = vmax.f32 %v919_v24, 0.0  ;;  %3178 = vperm.xlu0 %4535, %v4985_v33  }
 0x117   : > { %v1070_v56 = vmax.f32 %v728_v27, 0.0  ;;  %v1072_v1 = vmax.f32 %v921_v28, 0.0 }
 0x118   : > { %v1193_v0 = vpack.c.bf16 %v1069_v52, %v1065_v31  ;;  %v1195_v3 = vpack.c.bf16 %v1071_v53, %v1067_v49 }
 0x119   : > { %v1194_v6 = vpack.c.bf16 %v1070_v56, %v1066_v54  ;;  %v1196_v7 = vpack.c.bf16 %v1072_v1, %v1068_v55  ;;  %v731_v8 = vpop.f32.mrb[20].mxu0  ;;  %v924_v9 = vpop.f32.mrb[20].mxu1  ;;  %3163 = vperm.xlu1 %4536, %v4974_v30  }
 0x11a   : > { %v732_v10 = vadd.f32 %v731_v8, %v5022_v44  ;;  %v925_v11 = vadd.f32 %v924_v9, %v5026_v45  ;;  %v733_v29 = vpop.f32.mrb[21].mxu0  ;;  %v926_v12 = vpop.f32.mrb[21].mxu1  ;;  %3188 = vperm.xlu0 %4535, %v4999_v36  }
 0x11b   : > { %v734_v13 = vadd.f32 %v733_v29, %v5032_v46  ;;  %v927_v16 = vadd.f32 %v926_v12, %v5036_v47  ;;  %v735_v17 = vpop.f32.mrb[22].mxu0  ;;  %v928_v21 = vpop.f32.mrb[22].mxu1  ;;  %1425 = vmatprep.subr.bf16.mxu0 %v1194_v6  ;;  %1538 = vmatprep.subr.bf16.mxu1 %v1196_v7 }
 0x11c   : > { %v736_v24 = vadd.f32 %v735_v17, %v5022_v44  ;;  %v929_v25 = vadd.f32 %v928_v21, %v5026_v45  ;;  %v737_v26 = vpop.f32.mrb[23].mxu0  ;;  %v930_v27 = vpop.f32.mrb[23].mxu1  ;;  %1426 = vmatpush1.bf16.msra.mxu0 %v1193_v0  ;;  %1539 = vmatpush1.bf16.msra.mxu1 %v1195_v3  ;;  %v1073_v31 = vmax.f32 %v732_v10, 0.0  ;;  %v1075_v49 = vmax.f32 %v925_v11, 0.0 }
 0x11d   : > { %v738_v28 = vadd.f32 %v737_v26, %v5032_v46  ;;  %v931_v32 = vadd.f32 %v930_v27, %v5036_v47  ;;  %v1074_v54 = vmax.f32 %v734_v13, 0.0  ;;  %v1076_v55 = vmax.f32 %v927_v16, 0.0  ;;  %3173 = vperm.xlu1 %4536, %v4994_v35  }
 0x11e   : > { %v1077_v52 = vmax.f32 %v736_v24, 0.0  ;;  %v1079_v53 = vmax.f32 %v929_v25, 0.0  ;;  %3198 = vperm.xlu0 %4535, %v5018_v43  }
 0x11f   : > { %v1078_v56 = vmax.f32 %v738_v28, 0.0  ;;  %v1080_v1 = vmax.f32 %v931_v32, 0.0 }
 0x120   : > { %v1197_v6 = vpack.c.bf16 %v1077_v52, %v1073_v31  ;;  %v1199_v7 = vpack.c.bf16 %v1079_v53, %v1075_v49 }
 0x121   : > { %v1198_v0 = vpack.c.bf16 %v1078_v56, %v1074_v54  ;;  %v1200_v3 = vpack.c.bf16 %v1080_v1, %v1076_v55  ;;  %v741_v8 = vpop.f32.mrb[24].mxu0  ;;  %v934_v9 = vpop.f32.mrb[24].mxu1  ;;  %3183 = vperm.xlu1 %4536, %v5013_v42  }
 0x122   : > { %v742_v29 = vadd.f32 %v741_v8, %v5022_v44  ;;  %v935_v10 = vadd.f32 %v934_v9, %v5026_v45  ;;  %v743_v11 = vpop.f32.mrb[25].mxu0  ;;  %v936_v12 = vpop.f32.mrb[25].mxu1  ;;  %3208 = vperm.xlu0 %4535, %v5046_v51  }
 0x123   : > { %v744_v30 = vadd.f32 %v743_v11, %v5032_v46  ;;  %v937_v33 = vadd.f32 %v936_v12, %v5036_v47  ;;  %v745_v13 = vpop.f32.mrb[26].mxu0  ;;  %v938_v16 = vpop.f32.mrb[26].mxu1  ;;  %1427 = vmatprep.subr.bf16.mxu0 %v1198_v0  ;;  %1540 = vmatprep.subr.bf16.mxu1 %v1200_v3 }
 0x124   : > { %v746_v17 = vadd.f32 %v745_v13, %v5022_v44  ;;  %v939_v21 = vadd.f32 %v938_v16, %v5026_v45  ;;  %v747_v24 = vpop.f32.mrb[27].mxu0  ;;  %v940_v25 = vpop.f32.mrb[27].mxu1  ;;  %1428 = vmatpush1.bf16.msra.mxu0 %v1197_v6  ;;  %1541 = vmatpush1.bf16.msra.mxu1 %v1199_v7  ;;  %v1081_v26 = vmax.f32 %v742_v29, 0.0  ;;  %v1083_v27 = vmax.f32 %v935_v10, 0.0 }
 0x125   : > { %v748_v35 = vadd.f32 %v747_v24, %v5032_v46  ;;  %v941_v36 = vadd.f32 %v940_v25, %v5036_v47  ;;  %v1082_v31 = vmax.f32 %v744_v30, 0.0  ;;  %v1084_v49 = vmax.f32 %v937_v33, 0.0  ;;  %3193 = vperm.xlu1 %4536, %v5041_v50  }
 0x126   : > { %v1085_v28 = vmax.f32 %v746_v17, 0.0  ;;  %v1087_v32 = vmax.f32 %v939_v21, 0.0  ;;  %3218 = vperm.xlu0 %4535, %v5062_v61  }
 0x127   : > { %v1086_v52 = vmax.f32 %v748_v35, 0.0  ;;  %v1088_v53 = vmax.f32 %v941_v36, 0.0 }
 0x128   : > { %v1201_v54 = vpack.c.bf16 %v1085_v28, %v1081_v26  ;;  %v1203_v55 = vpack.c.bf16 %v1087_v32, %v1083_v27 }
 0x129   : > { %v1202_v56 = vpack.c.bf16 %v1086_v52, %v1082_v31  ;;  %v1204_v1 = vpack.c.bf16 %v1088_v53, %v1084_v49  ;;  %v751_v6 = vpop.f32.mrb[28].mxu0  ;;  %v944_v7 = vpop.f32.mrb[28].mxu1  ;;  %3203 = vperm.xlu1 %4536, %v5057_v60  }
 0x12a   : > { %v752_v0 = vadd.f32 %v751_v6, %v5022_v44  ;;  %v945_v3 = vadd.f32 %v944_v7, %v5026_v45  ;;  %v753_v8 = vpop.f32.mrb[29].mxu0  ;;  %v946_v9 = vpop.f32.mrb[29].mxu1  ;;  %3228 = vperm.xlu0 %4535, %v5081_v15  }
 0x12b   : > { %v754_v42 = vadd.f32 %v753_v8, %v5032_v46  ;;  %v947_v43 = vadd.f32 %v946_v9, %v5036_v47  ;;  %v755_v29 = vpop.f32.mrb[30].mxu0  ;;  %v948_v10 = vpop.f32.mrb[30].mxu1  ;;  %1429 = vmatprep.subr.bf16.mxu0 %v1202_v56  ;;  %1542 = vmatprep.subr.bf16.mxu1 %v1204_v1 }
 0x12c   : > { %v756_v11 = vadd.f32 %v755_v29, %v5022_v44  ;;  %v949_v12 = vadd.f32 %v948_v10, %v5026_v45  ;;  %v757_v30 = vpop.f32.mrb[31].mxu0  ;;  %v950_v33 = vpop.f32.mrb[31].mxu1  ;;  %1430 = vmatpush1.bf16.msra.mxu0 %v1201_v54  ;;  %1543 = vmatpush1.bf16.msra.mxu1 %v1203_v55  ;;  %v1089_v13 = vmax.f32 %v752_v0, 0.0  ;;  %v1091_v16 = vmax.f32 %v945_v3, 0.0 }
 0x12d   : > { %v758_v50 = vadd.f32 %v757_v30, %v5032_v46  ;;  %v951_v51 = vadd.f32 %v950_v33, %v5036_v47  ;;  %v1090_v24 = vmax.f32 %v754_v42, 0.0  ;;  %v1092_v25 = vmax.f32 %v947_v43, 0.0  ;;  %3213 = vperm.xlu1 %4536, %v5076_v14  }
 0x12e   : > { %v1093_v17 = vmax.f32 %v756_v11, 0.0  ;;  %v1095_v21 = vmax.f32 %v949_v12, 0.0  ;;  %3656 = vperm.xlu0 %4535, %v5097_v48  }
 0x12f   : > { %v1094_v35 = vmax.f32 %v758_v50, 0.0  ;;  %v1096_v36 = vmax.f32 %v951_v51, 0.0 }
 0x130   : > { %v1205_v26 = vpack.c.bf16 %v1093_v17, %v1089_v13  ;;  %v1207_v27 = vpack.c.bf16 %v1095_v21, %v1091_v16 }
 0x131   : > { %v1206_v28 = vpack.c.bf16 %v1094_v35, %v1090_v24  ;;  %v1208_v32 = vpack.c.bf16 %v1096_v36, %v1092_v25  ;;  %v761_v31 = vpop.f32.mrb[32].mxu0  ;;  %v954_v49 = vpop.f32.mrb[32].mxu1  ;;  %3223 = vperm.xlu1 %4536, %v5092_v39  }
 0x132   : > { %v762_v52 = vadd.f32 %v761_v31, %v5022_v44  ;;  %v955_v53 = vadd.f32 %v954_v49, %v5026_v45  ;;  %v763_v54 = vpop.f32.mrb[33].mxu0  ;;  %v956_v55 = vpop.f32.mrb[33].mxu1  ;;  %3666 = vperm.xlu0 %4535, %v5113_v5  }
 0x133   : > { %v764_v60 = vadd.f32 %v763_v54, %v5032_v46  ;;  %v957_v61 = vadd.f32 %v956_v55, %v5036_v47  ;;  %v765_v56 = vpop.f32.mrb[34].mxu0  ;;  %v958_v1 = vpop.f32.mrb[34].mxu1  ;;  %1431 = vmatprep.subr.bf16.mxu0 %v1206_v28  ;;  %1544 = vmatprep.subr.bf16.mxu1 %v1208_v32 }
 0x134   : > { %v766_v6 = vadd.f32 %v765_v56, %v5022_v44  ;;  %v959_v7 = vadd.f32 %v958_v1, %v5026_v45  ;;  %v767_v0 = vpop.f32.mrb[35].mxu0  ;;  %v960_v3 = vpop.f32.mrb[35].mxu1  ;;  %1432 = vmatpush1.bf16.msra.mxu0 %v1205_v26  ;;  %1545 = vmatpush1.bf16.msra.mxu1 %v1207_v27  ;;  %v1097_v8 = vmax.f32 %v762_v52, 0.0  ;;  %v1099_v9 = vmax.f32 %v955_v53, 0.0 }
 0x135   : > { %v768_v14 = vadd.f32 %v767_v0, %v5032_v46  ;;  %v961_v15 = vadd.f32 %v960_v3, %v5036_v47  ;;  %v1098_v29 = vmax.f32 %v764_v60, 0.0  ;;  %v1100_v10 = vmax.f32 %v957_v61, 0.0  ;;  %3233 = vperm.xlu1 %4536, %v5108_v4  }
 0x136   : > { %v1101_v42 = vmax.f32 %v766_v6, 0.0  ;;  %v1103_v43 = vmax.f32 %v959_v7, 0.0  ;;  %3676 = vperm.xlu0 %4535, %v5129_v23  }
 0x137   : > { %v1102_v11 = vmax.f32 %v768_v14, 0.0  ;;  %v1104_v12 = vmax.f32 %v961_v15, 0.0 }
 0x138   : > { %v1209_v30 = vpack.c.bf16 %v1101_v42, %v1097_v8  ;;  %v1211_v33 = vpack.c.bf16 %v1103_v43, %v1099_v9 }
 0x139   : > { %v1210_v50 = vpack.c.bf16 %v1102_v11, %v1098_v29  ;;  %v1212_v51 = vpack.c.bf16 %v1104_v12, %v1100_v10  ;;  %v771_v13 = vpop.f32.mrb[36].mxu0  ;;  %v964_v16 = vpop.f32.mrb[36].mxu1  ;;  %3661 = vperm.xlu1 %4536, %v5124_v22  }
 0x13a   : > { %v772_v17 = vadd.f32 %v771_v13, %v5022_v44  ;;  %v965_v21 = vadd.f32 %v964_v16, %v5026_v45  ;;  %v773_v24 = vpop.f32.mrb[37].mxu0  ;;  %v966_v25 = vpop.f32.mrb[37].mxu1  ;;  %3686 = vperm.xlu0 %4535, %v5145_v62  }
 0x13b   : > { %v774_v39 = vadd.f32 %v773_v24, %v5032_v46  ;;  %v967_v48 = vadd.f32 %v966_v25, %v5036_v47  ;;  %v775_v35 = vpop.f32.mrb[38].mxu0  ;;  %v968_v36 = vpop.f32.mrb[38].mxu1  ;;  %1433 = vmatprep.subr.bf16.mxu0 %v1210_v50  ;;  %1546 = vmatprep.subr.bf16.mxu1 %v1212_v51 }
 0x13c   : > { %v776_v26 = vadd.f32 %v775_v35, %v5022_v44  ;;  %v969_v27 = vadd.f32 %v968_v36, %v5026_v45  ;;  %v777_v28 = vpop.f32.mrb[39].mxu0  ;;  %v970_v32 = vpop.f32.mrb[39].mxu1  ;;  %1434 = vmatpush1.bf16.msra.mxu0 %v1209_v30  ;;  %1547 = vmatpush1.bf16.msra.mxu1 %v1211_v33  ;;  %v1105_v31 = vmax.f32 %v772_v17, 0.0  ;;  %v1107_v49 = vmax.f32 %v965_v21, 0.0 }
 0x13d   : > { %v778_v4 = vadd.f32 %v777_v28, %v5032_v46  ;;  %v971_v5 = vadd.f32 %v970_v32, %v5036_v47  ;;  %v1106_v54 = vmax.f32 %v774_v39, 0.0  ;;  %v1108_v55 = vmax.f32 %v967_v48, 0.0  ;;  %3671 = vperm.xlu1 %4536, %v5140_v59  }
 0x13e   : > { %v1109_v52 = vmax.f32 %v776_v26, 0.0  ;;  %v1111_v53 = vmax.f32 %v969_v27, 0.0  ;;  %3922 = vperm.xlu0 %4535, %v5161_v19  }
 0x13f   : > { %v1110_v60 = vmax.f32 %v778_v4, 0.0  ;;  %v1112_v61 = vmax.f32 %v971_v5, 0.0 }
 0x140   : > { %v1213_v56 = vpack.c.bf16 %v1109_v52, %v1105_v31  ;;  %v1215_v1 = vpack.c.bf16 %v1111_v53, %v1107_v49  ;;  %v2189_v31 = vld [vmem:[%s5916_s10] sm:$0xf] }
 0x141   : > { %v1214_v6 = vpack.c.bf16 %v1110_v60, %v1106_v54  ;;  %v1216_v7 = vpack.c.bf16 %v1112_v61, %v1108_v55  ;;  %v781_v0 = vpop.f32.mrb[40].mxu0  ;;  %v974_v3 = vpop.f32.mrb[40].mxu1  ;;  %3681 = vperm.xlu1 %4536, %v5156_v18  }
 0x142   : > { %v782_v14 = vadd.f32 %v781_v0, %v5022_v44  ;;  %v975_v15 = vadd.f32 %v974_v3, %v5026_v45  ;;  %v783_v8 = vpop.f32.mrb[41].mxu0  ;;  %v976_v9 = vpop.f32.mrb[41].mxu1  ;;  %3932 = vperm.xlu0 %4535, %v5177_v58  }
 0x143   : > { %v784_v22 = vadd.f32 %v783_v8, %v5032_v46  ;;  %v977_v23 = vadd.f32 %v976_v9, %v5036_v47  ;;  %v785_v42 = vpop.f32.mrb[42].mxu0  ;;  %v978_v43 = vpop.f32.mrb[42].mxu1  ;;  %1435 = vmatprep.subr.bf16.mxu0 %v1214_v6  ;;  %1548 = vmatprep.subr.bf16.mxu1 %v1216_v7 }
 0x144   : > { %v786_v29 = vadd.f32 %v785_v42, %v5022_v44  ;;  %v979_v10 = vadd.f32 %v978_v43, %v5026_v45  ;;  %v787_v11 = vpop.f32.mrb[43].mxu0  ;;  %v980_v12 = vpop.f32.mrb[43].mxu1  ;;  %1436 = vmatpush1.bf16.msra.mxu0 %v1213_v56  ;;  %1549 = vmatpush1.bf16.msra.mxu1 %v1215_v1  ;;  %v1113_v30 = vmax.f32 %v782_v14, 0.0  ;;  %v1115_v33 = vmax.f32 %v975_v15, 0.0 }
 0x145   : > { %v788_v59 = vadd.f32 %v787_v11, %v5032_v46  ;;  %v981_v62 = vadd.f32 %v980_v12, %v5036_v47  ;;  %v1114_v13 = vmax.f32 %v784_v22, 0.0  ;;  %v1116_v16 = vmax.f32 %v977_v23, 0.0  ;;  %3691 = vperm.xlu1 %4536, %v5172_v57  }
 0x146   : > { %v1117_v50 = vmax.f32 %v786_v29, 0.0  ;;  %v1119_v51 = vmax.f32 %v979_v10, 0.0  ;;  %2192 = vperm.xlu0 %4535, %v2189_v31  }
 0x147   : > { %v1118_v17 = vmax.f32 %v788_v59, 0.0  ;;  %v1120_v21 = vmax.f32 %v981_v62, 0.0  ;;  %v4087_v59 = vld [vmem:[%s5916_s10] sm:$0xf] }
 0x148   : > { %v1217_v24 = vpack.c.bf16 %v1117_v50, %v1113_v30  ;;  %v1219_v25 = vpack.c.bf16 %v1119_v51, %v1115_v33 }
 0x149   : > { %v1218_v39 = vpack.c.bf16 %v1118_v17, %v1114_v13  ;;  %v1220_v48 = vpack.c.bf16 %v1120_v21, %v1116_v16  ;;  %v791_v35 = vpop.f32.mrb[44].mxu0  ;;  %v984_v36 = vpop.f32.mrb[44].mxu1  ;;  %3927 = vperm.xlu1 %4536, %v5188_v20  }
 0x14a   : > { %v792_v26 = vadd.f32 %v791_v35, %v5022_v44  ;;  %v985_v27 = vadd.f32 %v984_v36, %v5026_v45  ;;  %v793_v28 = vpop.f32.mrb[45].mxu0  ;;  %v986_v32 = vpop.f32.mrb[45].mxu1 }
 0x14b   : > { %v794_v18 = vadd.f32 %v793_v28, %v5032_v46  ;;  %v987_v19 = vadd.f32 %v986_v32, %v5036_v47  ;;  %v795_v4 = vpop.f32.mrb[46].mxu0  ;;  %v988_v5 = vpop.f32.mrb[46].mxu1  ;;  %1437 = vmatprep.subr.bf16.mxu0 %v1218_v39  ;;  %1550 = vmatprep.subr.bf16.mxu1 %v1220_v48 }
 0x14c   : > { %v796_v49 = vadd.f32 %v795_v4, %v5022_v44  ;;  %v989_v52 = vadd.f32 %v988_v5, %v5026_v45  ;;  %v797_v53 = vpop.f32.mrb[47].mxu0  ;;  %v990_v57 = vpop.f32.mrb[47].mxu1  ;;  %1438 = vmatpush1.bf16.msra.mxu0 %v1217_v24  ;;  %1551 = vmatpush1.bf16.msra.mxu1 %v1219_v25  ;;  %v1121_v55 = vmax.f32 %v792_v26, 0.0  ;;  %v1123_v60 = vmax.f32 %v985_v27, 0.0 }
 0x14d   : > { %v798_v58 = vadd.f32 %v797_v53, %v5032_v46  ;;  %v991_v54 = vadd.f32 %v990_v57, %v5036_v47  ;;  %v1122_v1 = vmax.f32 %v794_v18, 0.0  ;;  %v1124_v6 = vmax.f32 %v987_v19, 0.0  ;;  %3937 = vperm.xlu1 %4536, %v5199_v63  }
 0x14e   : > { %v1125_v61 = vmax.f32 %v796_v49, 0.0  ;;  %v1127_v56 = vmax.f32 %v989_v52, 0.0 }
 0x14f   : > { %v1126_v7 = vmax.f32 %v798_v58, 0.0  ;;  %v1128_v0 = vmax.f32 %v991_v54, 0.0 }
 0x150   : > { %v1221_v3 = vpack.c.bf16 %v1125_v61, %v1121_v55  ;;  %v1223_v14 = vpack.c.bf16 %v1127_v56, %v1123_v60 }
 0x151   : > { %v1222_v15 = vpack.c.bf16 %v1126_v7, %v1122_v1  ;;  %v1224_v8 = vpack.c.bf16 %v1128_v0, %v1124_v6  ;;  %v801_v9 = vpop.f32.mrb[48].mxu0  ;;  %v994_v22 = vpop.f32.mrb[48].mxu1  ;;  %4090 = vperm.xlu1 %4536, %v4087_v59  }
 0x152   : > { %v802_v23 = vadd.f32 %v801_v9, %v5022_v44  ;;  %v995_v42 = vadd.f32 %v994_v22, %v5026_v45  ;;  %v803_v43 = vpop.f32.mrb[49].mxu0  ;;  %v996_v29 = vpop.f32.mrb[49].mxu1 }
 0x153   : > { %v804_v20 = vadd.f32 %v803_v43, %v5032_v46  ;;  %v997_v10 = vadd.f32 %v996_v29, %v5036_v47  ;;  %v805_v11 = vpop.f32.mrb[50].mxu0  ;;  %v998_v12 = vpop.f32.mrb[50].mxu1  ;;  %1439 = vmatprep.subr.bf16.mxu0 %v1222_v15  ;;  %1552 = vmatprep.subr.bf16.mxu1 %v1224_v8 }
 0x154   : > { %v806_v62 = vadd.f32 %v805_v11, %v5022_v44  ;;  %v999_v30 = vadd.f32 %v998_v12, %v5026_v45  ;;  %v807_v33 = vpop.f32.mrb[51].mxu0  ;;  %v1000_v50 = vpop.f32.mrb[51].mxu1  ;;  %1440 = vmatpush1.bf16.msra.mxu0 %v1221_v3  ;;  %1553 = vmatpush1.bf16.msra.mxu1 %v1223_v14  ;;  %v1129_v13 = vmax.f32 %v802_v23, 0.0  ;;  %v1131_v16 = vmax.f32 %v995_v42, 0.0 }
 0x155   : > { %v808_v63 = vadd.f32 %v807_v33, %v5032_v46  ;;  %v1001_v51 = vadd.f32 %v1000_v50, %v5036_v47  ;;  %v1130_v24 = vmax.f32 %v804_v20, 0.0  ;;  %v1132_v25 = vmax.f32 %v997_v10, 0.0 }
 0x156   : > { %v1133_v17 = vmax.f32 %v806_v62, 0.0  ;;  %v1135_v21 = vmax.f32 %v999_v30, 0.0 }
 0x157   : > { %v1134_v39 = vmax.f32 %v808_v63, 0.0  ;;  %v1136_v48 = vmax.f32 %v1001_v51, 0.0 }
 0x158   : > { %v1225_v35 = vpack.c.bf16 %v1133_v17, %v1129_v13  ;;  %v1227_v36 = vpack.c.bf16 %v1135_v21, %v1131_v16 }
 0x159   : > { %v1226_v26 = vpack.c.bf16 %v1134_v39, %v1130_v24  ;;  %v1228_v27 = vpack.c.bf16 %v1136_v48, %v1132_v25  ;;  %v811_v28 = vpop.f32.mrb[52].mxu0  ;;  %v1004_v32 = vpop.f32.mrb[52].mxu1 }
 0x15a   : > { %v812_v18 = vadd.f32 %v811_v28, %v5022_v44  ;;  %v1005_v19 = vadd.f32 %v1004_v32, %v5026_v45  ;;  %v813_v4 = vpop.f32.mrb[53].mxu0  ;;  %v1006_v5 = vpop.f32.mrb[53].mxu1 }
 0x15b   : > { %v814_v31 = vadd.f32 %v813_v4, %v5032_v46  ;;  %v1007_v49 = vadd.f32 %v1006_v5, %v5036_v47  ;;  %v815_v52 = vpop.f32.mrb[54].mxu0  ;;  %v1008_v53 = vpop.f32.mrb[54].mxu1  ;;  %1441 = vmatprep.subr.bf16.mxu0 %v1226_v26  ;;  %1554 = vmatprep.subr.bf16.mxu1 %v1228_v27 }
 0x15c   : > { %v816_v57 = vadd.f32 %v815_v52, %v5022_v44  ;;  %v1009_v58 = vadd.f32 %v1008_v53, %v5026_v45  ;;  %v817_v54 = vpop.f32.mrb[55].mxu0  ;;  %v1010_v55 = vpop.f32.mrb[55].mxu1  ;;  %1442 = vmatpush1.bf16.msra.mxu0 %v1225_v35  ;;  %1555 = vmatpush1.bf16.msra.mxu1 %v1227_v36  ;;  %v1137_v56 = vmax.f32 %v812_v18, 0.0  ;;  %v1139_v1 = vmax.f32 %v1005_v19, 0.0 }
 0x15d   : > { %v818_v60 = vadd.f32 %v817_v54, %v5032_v46  ;;  %v1011_v61 = vadd.f32 %v1010_v55, %v5036_v47  ;;  %v1138_v0 = vmax.f32 %v814_v31, 0.0  ;;  %v1140_v3 = vmax.f32 %v1007_v49, 0.0 }
 0x15e   : > { %v1141_v6 = vmax.f32 %v816_v57, 0.0  ;;  %v1143_v7 = vmax.f32 %v1009_v58, 0.0 }
 0x15f   : > { %v1142_v14 = vmax.f32 %v818_v60, 0.0  ;;  %v1144_v15 = vmax.f32 %v1011_v61, 0.0 }
 0x160   : > { %v1229_v8 = vpack.c.bf16 %v1141_v6, %v1137_v56  ;;  %v1231_v9 = vpack.c.bf16 %v1143_v7, %v1139_v1 }
 0x161   : > { %v1230_v22 = vpack.c.bf16 %v1142_v14, %v1138_v0  ;;  %v1232_v23 = vpack.c.bf16 %v1144_v15, %v1140_v3  ;;  %v821_v42 = vpop.f32.mrb[56].mxu0  ;;  %v1014_v43 = vpop.f32.mrb[56].mxu1 }
 0x162   : > { %v822_v29 = vadd.f32 %v821_v42, %v5022_v44  ;;  %v1015_v20 = vadd.f32 %v1014_v43, %v5026_v45  ;;  %v823_v10 = vpop.f32.mrb[57].mxu0  ;;  %v1016_v11 = vpop.f32.mrb[57].mxu1  ;;  %v4576_v42 = vld [vmem:[%s5909_s3 + $0x10] ss:$8 sps:$4 sm:$0xff]   ;;  %v4577_v43 = vld [vmem:[%s5909_s3 + $0x24] ss:$8 sps:$4 sm:$0xff]  }
 0x163   : > { %v824_v12 = vadd.f32 %v823_v10, %v5032_v46  ;;  %v1017_v59 = vadd.f32 %v1016_v11, %v5036_v47  ;;  %v825_v62 = vpop.f32.mrb[58].mxu0  ;;  %v1018_v30 = vpop.f32.mrb[58].mxu1  ;;  %1443 = vmatprep.subr.bf16.mxu0 %v1230_v22  ;;  %1556 = vmatprep.subr.bf16.mxu1 %v1232_v23  ;;  %v4582_v10 = vld [vmem:[%s5909_s3 + $0x30] ss:$8 sps:$4 sm:$0xff]   ;;  %v4583_v11 = vld [vmem:[%s5909_s3 + $0x44] ss:$8 sps:$4 sm:$0xff]  }
 0x164   : > { %v826_v33 = vadd.f32 %v825_v62, %v5022_v44  ;;  %v1019_v50 = vadd.f32 %v1018_v30, %v5026_v45  ;;  %v827_v63 = vpop.f32.mrb[59].mxu0  ;;  %v1020_v51 = vpop.f32.mrb[59].mxu1  ;;  %1444 = vmatpush1.bf16.msra.mxu0 %v1229_v8  ;;  %1557 = vmatpush1.bf16.msra.mxu1 %v1231_v9  ;;  %v1145_v17 = vmax.f32 %v822_v29, 0.0  ;;  %v1147_v21 = vmax.f32 %v1015_v20, 0.0  ;;  %v4579_v29 = vld [vmem:[%s5909_s3 + $0x20] ss:$8 sps:$4 sm:$0xff]  }
 0x165   : > { %v828_v13 = vadd.f32 %v827_v63, %v5032_v46  ;;  %v1021_v16 = vadd.f32 %v1020_v51, %v5036_v47  ;;  %v1146_v39 = vmax.f32 %v824_v12, 0.0  ;;  %v1148_v48 = vmax.f32 %v1017_v59, 0.0  ;;  %v4580_v20 = vld [vmem:[%s5909_s3 + $0x34] ss:$8 sps:$4 sm:$0xff]   ;;  %v4585_v12 = vld [vmem:[%s5909_s3 + $0x40] ss:$8 sps:$4 sm:$0xff]   ;;  %v1260_v51 = vpop.permute.xlu0 %1259 }
 0x166   : > { %v1149_v24 = vmax.f32 %v826_v33, 0.0  ;;  %v1151_v25 = vmax.f32 %v1019_v50, 0.0  ;;  %v4586_v59 = vld [vmem:[%s5909_s3 + $0x54] ss:$8 sps:$4 sm:$0xff]   ;;  %v4588_v62 = vld [vmem:[%s5909_s3 + $0x50] ss:$8 sps:$4 sm:$0xff]  }
 0x167   : > { %v1150_v35 = vmax.f32 %v828_v13, 0.0  ;;  %v1152_v36 = vmax.f32 %v1021_v16, 0.0  ;;  %v4589_v30 = vld [vmem:[%s5909_s3 + $0x64] ss:$8 sps:$4 sm:$0xff]   ;;  %v4591_v33 = vld [vmem:[%s5909_s3 + $0x60] ss:$8 sps:$4 sm:$0xff]   ;;  %v1270_v16 = vpop.permute.xlu1 %1269 }
 0x168   : > { %v1233_v26 = vpack.c.bf16 %v1149_v24, %v1145_v17  ;;  %v1235_v27 = vpack.c.bf16 %v1151_v25, %v1147_v21  ;;  %v4592_v50 = vld [vmem:[%s5909_s3 + $0x74] ss:$8 sps:$4 sm:$0xff]   ;;  %v4594_v63 = vld [vmem:[%s5909_s3 + $0x70] ss:$8 sps:$4 sm:$0xff]  }
 0x169   : > { %v1234_v28 = vpack.c.bf16 %v1150_v35, %v1146_v39  ;;  %v1236_v32 = vpack.c.bf16 %v1152_v36, %v1148_v48  ;;  %v831_v18 = vpop.f32.mrb[60].mxu0  ;;  %v1024_v19 = vpop.f32.mrb[60].mxu1 }
 0x16a   : > { %v832_v4 = vadd.f32 %v831_v18, %v5022_v44  ;;  %v1025_v5 = vadd.f32 %v1024_v19, %v5026_v45  ;;  %v833_v31 = vpop.f32.mrb[61].mxu0  ;;  %v1026_v49 = vpop.f32.mrb[61].mxu1 }
 0x16b   : > { %v834_v52 = vadd.f32 %v833_v31, %v5032_v46  ;;  %v1027_v53 = vadd.f32 %v1026_v49, %v5036_v47  ;;  %v835_v57 = vpop.f32.mrb[62].mxu0  ;;  %v1028_v58 = vpop.f32.mrb[62].mxu1  ;;  %1445 = vmatprep.subr.bf16.mxu0 %v1234_v28  ;;  %1558 = vmatprep.subr.bf16.mxu1 %v1236_v32 }
 0x16c   : > { %v836_v54 = vadd.f32 %v835_v57, %v5022_v44  ;;  %v1029_v55 = vadd.f32 %v1028_v58, %v5026_v45  ;;  %v837_v60 = vpop.f32.mrb[63].mxu0  ;;  %v1030_v61 = vpop.f32.mrb[63].mxu1  ;;  %1446 = vmatpush1.bf16.msra.mxu0 %v1233_v26  ;;  %1559 = vmatpush1.bf16.msra.mxu1 %v1235_v27  ;;  %v1153_v6 = vmax.f32 %v832_v4, 0.0  ;;  %v1155_v7 = vmax.f32 %v1025_v5, 0.0 }
 0x16d   : > { %v838_v56 = vadd.f32 %v837_v60, %v5032_v46  ;;  %v1031_v1 = vadd.f32 %v1030_v61, %v5036_v47  ;;  %v1154_v14 = vmax.f32 %v834_v52, 0.0  ;;  %v1156_v15 = vmax.f32 %v1027_v53, 0.0  ;;  %v4571_v46 = vld [vmem:[%s5909_s3] ss:$8 sps:$4 sm:$0xff]   ;;  %v4574_v47 = vld [vmem:[%s5909_s3 + $0x14] ss:$8 sps:$4 sm:$0xff]   ;;  %v1265_v13 = vpop.permute.xlu0 %1264  ;;  %v1275_v60 = vpop.permute.xlu1 %1274 }
 0x16e   : > { %v1157_v0 = vmax.f32 %v836_v54, 0.0  ;;  %v1159_v3 = vmax.f32 %v1029_v55, 0.0 }
 0x16f   : > { %v1158_v8 = vmax.f32 %v838_v56, 0.0  ;;  %v1160_v9 = vmax.f32 %v1031_v1, 0.0 }
 0x170   : > { %v1237_v22 = vpack.c.bf16 %v1157_v0, %v1153_v6  ;;  %v1239_v44 = vpack.c.bf16 %v1159_v3, %v1155_v7 }
 0x171   : > { %v1238_v23 = vpack.c.bf16 %v1158_v8, %v1154_v14  ;;  %v1240_v45 = vpack.c.bf16 %v1160_v9, %v1156_v15 }
 0x173   : > { %1447 = vmatprep.subr.bf16.mxu0 %v1238_v23  ;;  %1560 = vmatprep.subr.bf16.mxu1 %v1240_v45 }
 0x174   : > { %1448 = vmatpush1.bf16.msra.mxu0 %v1237_v22  ;;  %1561 = vmatpush1.bf16.msra.mxu1 %v1239_v44 }
 0x177   : > { %1450 = vmatmul.mubr.bf16.vlgmr.msra.gmra.mrb[64].mxu0 %v4571_v46  ;;  %1563 = vmatmul.mubr.bf16.vlgmr.msra.gmra.mrb[64].mxu1 %v4571_v46 }
 0x178   : > { %1459 = vmatprep.mubr.bf16.mxu0 %v4574_v47  ;;  %1572 = vmatprep.mubr.bf16.mxu1 %v4574_v47 }
 0x17f   : > { %1460 = vmatmul.mubr.bf16.gmra.mrb[68].mxu0 %v4576_v42  ;;  %1573 = vmatmul.mubr.bf16.gmra.mrb[68].mxu1 %v4576_v42 }
 0x180   : > { %1469 = vmatprep.mubr.bf16.mxu0 %v4577_v43  ;;  %1582 = vmatprep.mubr.bf16.mxu1 %v4577_v43 }
 0x187   : > { %1470 = vmatmul.mubr.bf16.gmra.mrb[72].mxu0 %v4579_v29  ;;  %1583 = vmatmul.mubr.bf16.gmra.mrb[72].mxu1 %v4579_v29 }
 0x188   : > { %1479 = vmatprep.mubr.bf16.mxu0 %v4580_v20  ;;  %1592 = vmatprep.mubr.bf16.mxu1 %v4580_v20 }
 0x18f   : > { %1480 = vmatmul.mubr.bf16.gmra.mrb[76].mxu0 %v4582_v10  ;;  %1593 = vmatmul.mubr.bf16.gmra.mrb[76].mxu1 %v4582_v10 }
 0x190   : > { %1489 = vmatprep.mubr.bf16.mxu0 %v4583_v11  ;;  %1602 = vmatprep.mubr.bf16.mxu1 %v4583_v11 }
 0x197   : > { %1490 = vmatmul.mubr.bf16.gmra.mrb[80].mxu0 %v4585_v12  ;;  %1603 = vmatmul.mubr.bf16.gmra.mrb[80].mxu1 %v4585_v12 }
 0x198   : > { %1499 = vmatprep.mubr.bf16.mxu0 %v4586_v59  ;;  %1612 = vmatprep.mubr.bf16.mxu1 %v4586_v59 }
 0x19f   : > { %1500 = vmatmul.mubr.bf16.gmra.mrb[84].mxu0 %v4588_v62  ;;  %1613 = vmatmul.mubr.bf16.gmra.mrb[84].mxu1 %v4588_v62 }
 0x1a0   : > { %1509 = vmatprep.mubr.bf16.mxu0 %v4589_v30  ;;  %1622 = vmatprep.mubr.bf16.mxu1 %v4589_v30 }
 0x1a7   : > { %1510 = vmatmul.mubr.bf16.gmra.mrb[88].mxu0 %v4591_v33  ;;  %1623 = vmatmul.mubr.bf16.gmra.mrb[88].mxu1 %v4591_v33 }
 0x1a8   : > { %1519 = vmatprep.mubr.bf16.mxu0 %v4592_v50  ;;  %1632 = vmatprep.mubr.bf16.mxu1 %v4592_v50  ;;  %v1280_v50 = vpop.permute.xlu0 %1279 }
 0x1af   : > { %1520 = vmatmul.mubr.bf16.gmra.mrb[92].mxu0 %v4594_v63  ;;  %1633 = vmatmul.mubr.bf16.gmra.mrb[92].mxu1 %v4594_v63  ;;  %v1285_v63 = vpop.permute.xlu1 %1284 }
 0x1b0   : > { %1851 = vmatprep.mubr.bf16.mxu0 %v4729_v2  ;;  %1924 = vmatprep.mubr.bf16.mxu1 %v4729_v2 }
 0x24a   : > { %v1451_v17 = vpop.f32.mrb[64].mxu0  ;;  %v1564_v21 = vpop.f32.mrb[64].mxu1 }
 0x24b   : > { %v1452_v24 = vadd.f32 %v1451_v17, %v1260_v51  ;;  %v1565_v25 = vadd.f32 %v1564_v21, %v1260_v51  ;;  %v1453_v39 = vpop.f32.mrb[65].mxu0  ;;  %v1566_v48 = vpop.f32.mrb[65].mxu1 }
 0x24c   : > { %v1454_v35 = vadd.f32 %v1453_v39, %v1260_v51  ;;  %v1567_v36 = vadd.f32 %v1566_v48, %v1260_v51  ;;  %v1455_v26 = vpop.f32.mrb[66].mxu0  ;;  %v1568_v27 = vpop.f32.mrb[66].mxu1 }
 0x24d   : > { %v1456_v28 = vadd.f32 %v1455_v26, %v1265_v13  ;;  %v1569_v32 = vadd.f32 %v1568_v27, %v1265_v13  ;;  %v1457_v18 = vpop.f32.mrb[67].mxu0  ;;  %v1570_v19 = vpop.f32.mrb[67].mxu1  ;;  %v1643_v31 = vmax.f32 %v1452_v24, 0.0  ;;  %v1645_v49 = vmax.f32 %v1565_v25, 0.0 }
 0x24e   : > { %v1458_v4 = vadd.f32 %v1457_v18, %v1265_v13  ;;  %v1571_v5 = vadd.f32 %v1570_v19, %v1265_v13  ;;  %v1644_v57 = vmax.f32 %v1454_v35, 0.0  ;;  %v1646_v58 = vmax.f32 %v1567_v36, 0.0 }
 0x24f   : > { %v1647_v52 = vmax.f32 %v1456_v28, 0.0  ;;  %v1649_v53 = vmax.f32 %v1569_v32, 0.0 }
 0x250   : > { %v1648_v54 = vmax.f32 %v1458_v4, 0.0  ;;  %v1650_v55 = vmax.f32 %v1571_v5, 0.0 }
 0x251   : > { %v1715_v61 = vpack.c.bf16 %v1647_v52, %v1643_v31  ;;  %v1717_v56 = vpack.c.bf16 %v1649_v53, %v1645_v49 }
 0x252   : > { %v1716_v1 = vpack.c.bf16 %v1648_v54, %v1644_v57  ;;  %v1718_v6 = vpack.c.bf16 %v1650_v55, %v1646_v58  ;;  %v1461_v7 = vpop.f32.mrb[68].mxu0  ;;  %v1574_v0 = vpop.f32.mrb[68].mxu1 }
 0x253   : > { %v1462_v3 = vadd.f32 %v1461_v7, %v1270_v16  ;;  %v1575_v14 = vadd.f32 %v1574_v0, %v1270_v16  ;;  %v1463_v15 = vpop.f32.mrb[69].mxu0  ;;  %v1576_v8 = vpop.f32.mrb[69].mxu1 }
 0x254   : > { %v1464_v9 = vadd.f32 %v1463_v15, %v1270_v16  ;;  %v1577_v22 = vadd.f32 %v1576_v8, %v1270_v16  ;;  %v1465_v44 = vpop.f32.mrb[70].mxu0  ;;  %v1578_v23 = vpop.f32.mrb[70].mxu1  ;;  %1819 = vmatprep.subr.bf16.mxu0 %v1716_v1  ;;  %1892 = vmatprep.subr.bf16.mxu1 %v1718_v6 }
 0x255   : > { %v1466_v45 = vadd.f32 %v1465_v44, %v1275_v60  ;;  %v1579_v46 = vadd.f32 %v1578_v23, %v1275_v60  ;;  %v1467_v47 = vpop.f32.mrb[71].mxu0  ;;  %v1580_v42 = vpop.f32.mrb[71].mxu1  ;;  %1820 = vmatpush1.bf16.msra.mxu0 %v1715_v61  ;;  %1893 = vmatpush1.bf16.msra.mxu1 %v1717_v56  ;;  %v1651_v20 = vmax.f32 %v1462_v3, 0.0  ;;  %v1653_v10 = vmax.f32 %v1575_v14, 0.0 }
 0x256   : > { %v1468_v43 = vadd.f32 %v1467_v47, %v1275_v60  ;;  %v1581_v29 = vadd.f32 %v1580_v42, %v1275_v60  ;;  %v1652_v59 = vmax.f32 %v1464_v9, 0.0  ;;  %v1654_v62 = vmax.f32 %v1577_v22, 0.0  ;;  %v1290_v61 = vpop.permute.xlu0 %1289  ;;  %v1295_v56 = vpop.permute.xlu1 %1294 }
 0x257   : > { %v1655_v11 = vmax.f32 %v1466_v45, 0.0  ;;  %v1657_v12 = vmax.f32 %v1579_v46, 0.0 }
 0x258   : > { %v1656_v30 = vmax.f32 %v1468_v43, 0.0  ;;  %v1658_v33 = vmax.f32 %v1581_v29, 0.0 }
 0x259   : > { %v1719_v51 = vpack.c.bf16 %v1655_v11, %v1651_v20  ;;  %v1721_v13 = vpack.c.bf16 %v1657_v12, %v1653_v10 }
 0x25a   : > { %v1720_v16 = vpack.c.bf16 %v1656_v30, %v1652_v59  ;;  %v1722_v17 = vpack.c.bf16 %v1658_v33, %v1654_v62  ;;  %v1471_v21 = vpop.f32.mrb[72].mxu0  ;;  %v1584_v24 = vpop.f32.mrb[72].mxu1 }
 0x25b   : > { %v1472_v25 = vadd.f32 %v1471_v21, %v1280_v50  ;;  %v1585_v39 = vadd.f32 %v1584_v24, %v1280_v50  ;;  %v1473_v48 = vpop.f32.mrb[73].mxu0  ;;  %v1586_v35 = vpop.f32.mrb[73].mxu1 }
 0x25c   : > { %v1474_v36 = vadd.f32 %v1473_v48, %v1280_v50  ;;  %v1587_v26 = vadd.f32 %v1586_v35, %v1280_v50  ;;  %v1475_v27 = vpop.f32.mrb[74].mxu0  ;;  %v1588_v28 = vpop.f32.mrb[74].mxu1  ;;  %1821 = vmatprep.subr.bf16.mxu0 %v1720_v16  ;;  %1894 = vmatprep.subr.bf16.mxu1 %v1722_v17 }
 0x25d   : > { %v1476_v32 = vadd.f32 %v1475_v27, %v1285_v63  ;;  %v1589_v18 = vadd.f32 %v1588_v28, %v1285_v63  ;;  %v1477_v19 = vpop.f32.mrb[75].mxu0  ;;  %v1590_v4 = vpop.f32.mrb[75].mxu1  ;;  %1822 = vmatpush1.bf16.msra.mxu0 %v1719_v51  ;;  %1895 = vmatpush1.bf16.msra.mxu1 %v1721_v13  ;;  %v1659_v49 = vmax.f32 %v1472_v25, 0.0  ;;  %v1661_v52 = vmax.f32 %v1585_v39, 0.0 }
 0x25e   : > { %v1478_v5 = vadd.f32 %v1477_v19, %v1285_v63  ;;  %v1591_v31 = vadd.f32 %v1590_v4, %v1285_v63  ;;  %v1660_v58 = vmax.f32 %v1474_v36, 0.0  ;;  %v1662_v54 = vmax.f32 %v1587_v26, 0.0  ;;  %v1300_v51 = vpop.permute.xlu0 %1299  ;;  %v1305_v13 = vpop.permute.xlu1 %1304 }
 0x25f   : > { %v1663_v53 = vmax.f32 %v1476_v32, 0.0  ;;  %v1665_v57 = vmax.f32 %v1589_v18, 0.0 }
 0x260   : > { %v1664_v55 = vmax.f32 %v1478_v5, 0.0  ;;  %v1666_v60 = vmax.f32 %v1591_v31, 0.0 }
 0x261   : > { %v1723_v1 = vpack.c.bf16 %v1663_v53, %v1659_v49  ;;  %v1725_v6 = vpack.c.bf16 %v1665_v57, %v1661_v52 }
 0x262   : > { %v1724_v7 = vpack.c.bf16 %v1664_v55, %v1660_v58  ;;  %v1726_v0 = vpack.c.bf16 %v1666_v60, %v1662_v54  ;;  %v1481_v3 = vpop.f32.mrb[76].mxu0  ;;  %v1594_v14 = vpop.f32.mrb[76].mxu1 }
 0x263   : > { %v1482_v15 = vadd.f32 %v1481_v3, %v1290_v61  ;;  %v1595_v8 = vadd.f32 %v1594_v14, %v1290_v61  ;;  %v1483_v9 = vpop.f32.mrb[77].mxu0  ;;  %v1596_v22 = vpop.f32.mrb[77].mxu1 }
 0x264   : > { %v1484_v44 = vadd.f32 %v1483_v9, %v1290_v61  ;;  %v1597_v23 = vadd.f32 %v1596_v22, %v1290_v61  ;;  %v1485_v45 = vpop.f32.mrb[78].mxu0  ;;  %v1598_v46 = vpop.f32.mrb[78].mxu1  ;;  %1823 = vmatprep.subr.bf16.mxu0 %v1724_v7  ;;  %1896 = vmatprep.subr.bf16.mxu1 %v1726_v0 }
 0x265   : > { %v1486_v47 = vadd.f32 %v1485_v45, %v1295_v56  ;;  %v1599_v42 = vadd.f32 %v1598_v46, %v1295_v56  ;;  %v1487_v43 = vpop.f32.mrb[79].mxu0  ;;  %v1600_v29 = vpop.f32.mrb[79].mxu1  ;;  %1824 = vmatpush1.bf16.msra.mxu0 %v1723_v1  ;;  %1897 = vmatpush1.bf16.msra.mxu1 %v1725_v6  ;;  %v1667_v11 = vmax.f32 %v1482_v15, 0.0  ;;  %v1669_v12 = vmax.f32 %v1595_v8, 0.0 }
 0x266   : > { %v1488_v20 = vadd.f32 %v1487_v43, %v1295_v56  ;;  %v1601_v10 = vadd.f32 %v1600_v29, %v1295_v56  ;;  %v1668_v30 = vmax.f32 %v1484_v44, 0.0  ;;  %v1670_v33 = vmax.f32 %v1597_v23, 0.0  ;;  %v1310_v1 = vpop.permute.xlu0 %1309  ;;  %v1315_v6 = vpop.permute.xlu1 %1314 }
 0x267   : > { %v1671_v59 = vmax.f32 %v1486_v47, 0.0  ;;  %v1673_v62 = vmax.f32 %v1599_v42, 0.0 }
 0x268   : > { %v1672_v50 = vmax.f32 %v1488_v20, 0.0  ;;  %v1674_v63 = vmax.f32 %v1601_v10, 0.0 }
 0x269   : > { %v1727_v16 = vpack.c.bf16 %v1671_v59, %v1667_v11  ;;  %v1729_v17 = vpack.c.bf16 %v1673_v62, %v1669_v12 }
 0x26a   : > { %v1728_v21 = vpack.c.bf16 %v1672_v50, %v1668_v30  ;;  %v1730_v24 = vpack.c.bf16 %v1674_v63, %v1670_v33  ;;  %v1491_v25 = vpop.f32.mrb[80].mxu0  ;;  %v1604_v39 = vpop.f32.mrb[80].mxu1 }
 0x26b   : > { %v1492_v48 = vadd.f32 %v1491_v25, %v1300_v51  ;;  %v1605_v35 = vadd.f32 %v1604_v39, %v1300_v51  ;;  %v1493_v36 = vpop.f32.mrb[81].mxu0  ;;  %v1606_v26 = vpop.f32.mrb[81].mxu1 }
 0x26c   : > { %v1494_v27 = vadd.f32 %v1493_v36, %v1300_v51  ;;  %v1607_v28 = vadd.f32 %v1606_v26, %v1300_v51  ;;  %v1495_v32 = vpop.f32.mrb[82].mxu0  ;;  %v1608_v18 = vpop.f32.mrb[82].mxu1  ;;  %1825 = vmatprep.subr.bf16.mxu0 %v1728_v21  ;;  %1898 = vmatprep.subr.bf16.mxu1 %v1730_v24 }
 0x26d   : > { %v1496_v19 = vadd.f32 %v1495_v32, %v1305_v13  ;;  %v1609_v4 = vadd.f32 %v1608_v18, %v1305_v13  ;;  %v1497_v5 = vpop.f32.mrb[83].mxu0  ;;  %v1610_v31 = vpop.f32.mrb[83].mxu1  ;;  %1826 = vmatpush1.bf16.msra.mxu0 %v1727_v16  ;;  %1899 = vmatpush1.bf16.msra.mxu1 %v1729_v17  ;;  %v1675_v53 = vmax.f32 %v1492_v48, 0.0  ;;  %v1677_v57 = vmax.f32 %v1605_v35, 0.0 }
 0x26e   : > { %v1498_v49 = vadd.f32 %v1497_v5, %v1305_v13  ;;  %v1611_v52 = vadd.f32 %v1610_v31, %v1305_v13  ;;  %v1676_v55 = vmax.f32 %v1494_v27, 0.0  ;;  %v1678_v60 = vmax.f32 %v1607_v28, 0.0  ;;  %v1320_v16 = vpop.permute.xlu0 %1319  ;;  %v1325_v17 = vpop.permute.xlu1 %1324 }
 0x26f   : > { %v1679_v58 = vmax.f32 %v1496_v19, 0.0  ;;  %v1681_v54 = vmax.f32 %v1609_v4, 0.0 }
 0x270   : > { %v1680_v61 = vmax.f32 %v1498_v49, 0.0  ;;  %v1682_v56 = vmax.f32 %v1611_v52, 0.0 }
 0x271   : > { %v1731_v7 = vpack.c.bf16 %v1679_v58, %v1675_v53  ;;  %v1733_v0 = vpack.c.bf16 %v1681_v54, %v1677_v57 }
 0x272   : > { %v1732_v3 = vpack.c.bf16 %v1680_v61, %v1676_v55  ;;  %v1734_v14 = vpack.c.bf16 %v1682_v56, %v1678_v60  ;;  %v1501_v15 = vpop.f32.mrb[84].mxu0  ;;  %v1614_v8 = vpop.f32.mrb[84].mxu1 }
 0x273   : > { %v1502_v9 = vadd.f32 %v1501_v15, %v1310_v1  ;;  %v1615_v22 = vadd.f32 %v1614_v8, %v1310_v1  ;;  %v1503_v44 = vpop.f32.mrb[85].mxu0  ;;  %v1616_v23 = vpop.f32.mrb[85].mxu1 }
 0x274   : > { %v1504_v45 = vadd.f32 %v1503_v44, %v1310_v1  ;;  %v1617_v46 = vadd.f32 %v1616_v23, %v1310_v1  ;;  %v1505_v47 = vpop.f32.mrb[86].mxu0  ;;  %v1618_v42 = vpop.f32.mrb[86].mxu1  ;;  %1827 = vmatprep.subr.bf16.mxu0 %v1732_v3  ;;  %1900 = vmatprep.subr.bf16.mxu1 %v1734_v14 }
 0x275   : > { %v1506_v43 = vadd.f32 %v1505_v47, %v1315_v6  ;;  %v1619_v29 = vadd.f32 %v1618_v42, %v1315_v6  ;;  %v1507_v20 = vpop.f32.mrb[87].mxu0  ;;  %v1620_v10 = vpop.f32.mrb[87].mxu1  ;;  %1828 = vmatpush1.bf16.msra.mxu0 %v1731_v7  ;;  %1901 = vmatpush1.bf16.msra.mxu1 %v1733_v0  ;;  %v1683_v59 = vmax.f32 %v1502_v9, 0.0  ;;  %v1685_v62 = vmax.f32 %v1615_v22, 0.0 }
 0x276   : > { %v1508_v11 = vadd.f32 %v1507_v20, %v1315_v6  ;;  %v1621_v12 = vadd.f32 %v1620_v10, %v1315_v6  ;;  %v1684_v50 = vmax.f32 %v1504_v45, 0.0  ;;  %v1686_v63 = vmax.f32 %v1617_v46, 0.0  ;;  %v1330_v7 = vpop.permute.xlu0 %1329  ;;  %v1335_v0 = vpop.permute.xlu1 %1334 }
 0x277   : > { %v1687_v30 = vmax.f32 %v1506_v43, 0.0  ;;  %v1689_v33 = vmax.f32 %v1619_v29, 0.0 }
 0x278   : > { %v1688_v51 = vmax.f32 %v1508_v11, 0.0  ;;  %v1690_v13 = vmax.f32 %v1621_v12, 0.0 }
 0x279   : > { %v1735_v21 = vpack.c.bf16 %v1687_v30, %v1683_v59  ;;  %v1737_v24 = vpack.c.bf16 %v1689_v33, %v1685_v62 }
 0x27a   : > { %v1736_v25 = vpack.c.bf16 %v1688_v51, %v1684_v50  ;;  %v1738_v39 = vpack.c.bf16 %v1690_v13, %v1686_v63  ;;  %v1511_v48 = vpop.f32.mrb[88].mxu0  ;;  %v1624_v35 = vpop.f32.mrb[88].mxu1 }
 0x27b   : > { %v1512_v36 = vadd.f32 %v1511_v48, %v1320_v16  ;;  %v1625_v26 = vadd.f32 %v1624_v35, %v1320_v16  ;;  %v1513_v27 = vpop.f32.mrb[89].mxu0  ;;  %v1626_v28 = vpop.f32.mrb[89].mxu1  ;;  %v4595_v48 = vld [vmem:[%s5911_s5] sm:$0xff]   ;;  %v4596_v35 = vld [vmem:[%s5911_s5 + $0x8] sm:$0xff]  }
 0x27c   : > { %v1514_v32 = vadd.f32 %v1513_v27, %v1320_v16  ;;  %v1627_v18 = vadd.f32 %v1626_v28, %v1320_v16  ;;  %v1515_v19 = vpop.f32.mrb[90].mxu0  ;;  %v1628_v4 = vpop.f32.mrb[90].mxu1  ;;  %1829 = vmatprep.subr.bf16.mxu0 %v1736_v25  ;;  %1902 = vmatprep.subr.bf16.mxu1 %v1738_v39 }
 0x27d   : > { %v1516_v5 = vadd.f32 %v1515_v19, %v1325_v17  ;;  %v1629_v31 = vadd.f32 %v1628_v4, %v1325_v17  ;;  %v1517_v49 = vpop.f32.mrb[91].mxu0  ;;  %v1630_v52 = vpop.f32.mrb[91].mxu1  ;;  %1830 = vmatpush1.bf16.msra.mxu0 %v1735_v21  ;;  %1903 = vmatpush1.bf16.msra.mxu1 %v1737_v24  ;;  %v1691_v58 = vmax.f32 %v1512_v36, 0.0  ;;  %v1693_v54 = vmax.f32 %v1625_v26, 0.0  ;;  %v4597_v36 = vld [vmem:[%s5911_s5 + $0x10] sm:$0xff]   ;;  %v4598_v26 = vld [vmem:[%s5911_s5 + $0x18] sm:$0xff]  }
 0x27e   : > { %v1518_v53 = vadd.f32 %v1517_v49, %v1325_v17  ;;  %v1631_v57 = vadd.f32 %v1630_v52, %v1325_v17  ;;  %v1692_v61 = vmax.f32 %v1514_v32, 0.0  ;;  %v1694_v56 = vmax.f32 %v1627_v18, 0.0  ;;  %v1758_v27 = vpop.permute.xlu0 %1757  ;;  %v1763_v28 = vpop.permute.xlu1 %1762 }
 0x27f   : > { %v1695_v55 = vmax.f32 %v1516_v5, 0.0  ;;  %v1697_v60 = vmax.f32 %v1629_v31, 0.0 }
 0x280   : > { %v1696_v1 = vmax.f32 %v1518_v53, 0.0  ;;  %v1698_v6 = vmax.f32 %v1631_v57, 0.0 }
 0x281   : > { %v1739_v3 = vpack.c.bf16 %v1695_v55, %v1691_v58  ;;  %v1741_v14 = vpack.c.bf16 %v1697_v60, %v1693_v54 }
 0x282   : > { %v1740_v15 = vpack.c.bf16 %v1696_v1, %v1692_v61  ;;  %v1742_v8 = vpack.c.bf16 %v1698_v6, %v1694_v56  ;;  %v1521_v9 = vpop.f32.mrb[92].mxu0  ;;  %v1634_v22 = vpop.f32.mrb[92].mxu1 }
 0x283   : > { %v1522_v44 = vadd.f32 %v1521_v9, %v1330_v7  ;;  %v1635_v23 = vadd.f32 %v1634_v22, %v1330_v7  ;;  %v1523_v45 = vpop.f32.mrb[93].mxu0  ;;  %v1636_v46 = vpop.f32.mrb[93].mxu1 }
 0x284   : > { %v1524_v47 = vadd.f32 %v1523_v45, %v1330_v7  ;;  %v1637_v42 = vadd.f32 %v1636_v46, %v1330_v7  ;;  %v1525_v43 = vpop.f32.mrb[94].mxu0  ;;  %v1638_v29 = vpop.f32.mrb[94].mxu1  ;;  %1831 = vmatprep.subr.bf16.mxu0 %v1740_v15  ;;  %1904 = vmatprep.subr.bf16.mxu1 %v1742_v8 }
 0x285   : > { %v1526_v20 = vadd.f32 %v1525_v43, %v1335_v0  ;;  %v1639_v10 = vadd.f32 %v1638_v29, %v1335_v0  ;;  %v1527_v11 = vpop.f32.mrb[95].mxu0  ;;  %v1640_v12 = vpop.f32.mrb[95].mxu1  ;;  %1832 = vmatpush1.bf16.msra.mxu0 %v1739_v3  ;;  %1905 = vmatpush1.bf16.msra.mxu1 %v1741_v14  ;;  %v1699_v30 = vmax.f32 %v1522_v44, 0.0  ;;  %v1701_v33 = vmax.f32 %v1635_v23, 0.0 }
 0x286   : > { %v1528_v59 = vadd.f32 %v1527_v11, %v1335_v0  ;;  %v1641_v62 = vadd.f32 %v1640_v12, %v1335_v0  ;;  %v1700_v51 = vmax.f32 %v1524_v47, 0.0  ;;  %v1702_v13 = vmax.f32 %v1637_v42, 0.0  ;;  %v1768_v9 = vpop.permute.xlu0 %1767  ;;  %v1773_v22 = vpop.permute.xlu1 %1772 }
 0x287   : > { %v1703_v50 = vmax.f32 %v1526_v20, 0.0  ;;  %v1705_v63 = vmax.f32 %v1639_v10, 0.0 }
 0x288   : > { %v1704_v16 = vmax.f32 %v1528_v59, 0.0  ;;  %v1706_v17 = vmax.f32 %v1641_v62, 0.0 }
 0x289   : > { %v1743_v21 = vpack.c.bf16 %v1703_v50, %v1699_v30  ;;  %v1745_v24 = vpack.c.bf16 %v1705_v63, %v1701_v33 }
 0x28a   : > { %v1744_v25 = vpack.c.bf16 %v1704_v16, %v1700_v51  ;;  %v1746_v39 = vpack.c.bf16 %v1706_v17, %v1702_v13 }
 0x28c   : > { %1833 = vmatprep.subr.bf16.mxu0 %v1744_v25  ;;  %1906 = vmatprep.subr.bf16.mxu1 %v1746_v39 }
 0x28d   : > { %1834 = vmatpush1.bf16.msra.mxu0 %v1743_v21  ;;  %1907 = vmatpush1.bf16.msra.mxu1 %v1745_v24 }
 0x290   : > { %1852 = vmatmul.mubr.bf16.vlgmr.msra.gmra.mrb[96].mxu0 %v4595_v48  ;;  %1925 = vmatmul.mubr.bf16.vlgmr.msra.gmra.mrb[96].mxu1 %v4595_v48 }
 0x291   : > { %1861 = vmatprep.mubr.bf16.mxu0 %v4729_v2  ;;  %1934 = vmatprep.mubr.bf16.mxu1 %v4729_v2 }
 0x298   : > { %1862 = vmatmul.mubr.bf16.gmra.mrb[100].mxu0 %v4596_v35  ;;  %1935 = vmatmul.mubr.bf16.gmra.mrb[100].mxu1 %v4596_v35 }
 0x299   : > { %1871 = vmatprep.mubr.bf16.mxu0 %v4729_v2  ;;  %1944 = vmatprep.mubr.bf16.mxu1 %v4729_v2 }
 0x2a0   : > { %1872 = vmatmul.mubr.bf16.gmra.mrb[104].mxu0 %v4597_v36  ;;  %1945 = vmatmul.mubr.bf16.gmra.mrb[104].mxu1 %v4597_v36  ;;  %v1778_v36 = vpop.permute.xlu0 %1777 }
 0x2a1   : > { %1881 = vmatprep.mubr.bf16.mxu0 %v4729_v2  ;;  %1954 = vmatprep.mubr.bf16.mxu1 %v4729_v2 }
 0x2a8   : > { %1882 = vmatmul.mubr.bf16.gmra.mrb[108].mxu0 %v4598_v26  ;;  %1955 = vmatmul.mubr.bf16.gmra.mrb[108].mxu1 %v4598_v26  ;;  %v1783_v26 = vpop.permute.xlu1 %1782 }
 0x2a9   : > { %2090 = vmatprep.mubr.bf16.mxu0 %v4729_v2  ;;  %2143 = vmatprep.mubr.bf16.mxu1 %v4729_v2 }
 0x363   : > { %v1853_v32 = vpop.f32.mrb[96].mxu0  ;;  %v1926_v18 = vpop.f32.mrb[96].mxu1 }
 0x364   : > { %v1854_v19 = vadd.f32 %v1853_v32, %v1758_v27  ;;  %v1927_v4 = vadd.f32 %v1926_v18, %v1758_v27  ;;  %v1855_v5 = vpop.f32.mrb[97].mxu0  ;;  %v1928_v31 = vpop.f32.mrb[97].mxu1 }
 0x365   : > { %v1856_v49 = vadd.f32 %v1855_v5, %v1758_v27  ;;  %v1929_v52 = vadd.f32 %v1928_v31, %v1758_v27  ;;  %v1857_v53 = vpop.f32.mrb[98].mxu0  ;;  %v1930_v57 = vpop.f32.mrb[98].mxu1 }
 0x366   : > { %v1858_v58 = vadd.f32 %v1857_v53, %v1763_v28  ;;  %v1931_v54 = vadd.f32 %v1930_v57, %v1763_v28  ;;  %v1859_v55 = vpop.f32.mrb[99].mxu0  ;;  %v1932_v60 = vpop.f32.mrb[99].mxu1  ;;  %v1965_v1 = vmax.f32 %v1854_v19, 0.0  ;;  %v1967_v6 = vmax.f32 %v1927_v4, 0.0 }
 0x367   : > { %v1860_v61 = vadd.f32 %v1859_v55, %v1763_v28  ;;  %v1933_v56 = vadd.f32 %v1932_v60, %v1763_v28  ;;  %v1966_v3 = vmax.f32 %v1856_v49, 0.0  ;;  %v1968_v14 = vmax.f32 %v1929_v52, 0.0 }
 0x368   : > { %v1969_v7 = vmax.f32 %v1858_v58, 0.0  ;;  %v1971_v0 = vmax.f32 %v1931_v54, 0.0 }
 0x369   : > { %v1970_v15 = vmax.f32 %v1860_v61, 0.0  ;;  %v1972_v8 = vmax.f32 %v1933_v56, 0.0 }
 0x36a   : > { %v2001_v44 = vpack.c.bf16 %v1969_v7, %v1965_v1  ;;  %v2003_v23 = vpack.c.bf16 %v1971_v0, %v1967_v6 }
 0x36b   : > { %v2002_v45 = vpack.c.bf16 %v1970_v15, %v1966_v3  ;;  %v2004_v46 = vpack.c.bf16 %v1972_v8, %v1968_v14  ;;  %v1863_v47 = vpop.f32.mrb[100].mxu0  ;;  %v1936_v42 = vpop.f32.mrb[100].mxu1 }
 0x36c   : > { %v1864_v43 = vadd.f32 %v1863_v47, %v1768_v9  ;;  %v1937_v29 = vadd.f32 %v1936_v42, %v1768_v9  ;;  %v1865_v20 = vpop.f32.mrb[101].mxu0  ;;  %v1938_v10 = vpop.f32.mrb[101].mxu1 }
 0x36d   : > { %v1866_v11 = vadd.f32 %v1865_v20, %v1768_v9  ;;  %v1939_v12 = vadd.f32 %v1938_v10, %v1768_v9  ;;  %v1867_v59 = vpop.f32.mrb[102].mxu0  ;;  %v1940_v62 = vpop.f32.mrb[102].mxu1  ;;  %2058 = vmatprep.subr.bf16.mxu0 %v2002_v45  ;;  %2111 = vmatprep.subr.bf16.mxu1 %v2004_v46 }
 0x36e   : > { %v1868_v30 = vadd.f32 %v1867_v59, %v1773_v22  ;;  %v1941_v33 = vadd.f32 %v1940_v62, %v1773_v22  ;;  %v1869_v50 = vpop.f32.mrb[103].mxu0  ;;  %v1942_v63 = vpop.f32.mrb[103].mxu1  ;;  %2059 = vmatpush1.bf16.msra.mxu0 %v2001_v44  ;;  %2112 = vmatpush1.bf16.msra.mxu1 %v2003_v23  ;;  %v1973_v16 = vmax.f32 %v1864_v43, 0.0  ;;  %v1975_v17 = vmax.f32 %v1937_v29, 0.0 }
 0x36f   : > { %v1870_v51 = vadd.f32 %v1869_v50, %v1773_v22  ;;  %v1943_v13 = vadd.f32 %v1942_v63, %v1773_v22  ;;  %v1974_v25 = vmax.f32 %v1866_v11, 0.0  ;;  %v1976_v39 = vmax.f32 %v1939_v12, 0.0  ;;  %v1788_v44 = vpop.permute.xlu0 %1787  ;;  %v1793_v23 = vpop.permute.xlu1 %1792 }
 0x370   : > { %v1977_v21 = vmax.f32 %v1868_v30, 0.0  ;;  %v1979_v24 = vmax.f32 %v1941_v33, 0.0 }
 0x371   : > { %v1978_v48 = vmax.f32 %v1870_v51, 0.0  ;;  %v1980_v35 = vmax.f32 %v1943_v13, 0.0 }
 0x372   : > { %v2005_v27 = vpack.c.bf16 %v1977_v21, %v1973_v16  ;;  %v2007_v28 = vpack.c.bf16 %v1979_v24, %v1975_v17 }
 0x373   : > { %v2006_v32 = vpack.c.bf16 %v1978_v48, %v1974_v25  ;;  %v2008_v18 = vpack.c.bf16 %v1980_v35, %v1976_v39  ;;  %v1873_v19 = vpop.f32.mrb[104].mxu0  ;;  %v1946_v4 = vpop.f32.mrb[104].mxu1 }
 0x374   : > { %v1874_v5 = vadd.f32 %v1873_v19, %v1778_v36  ;;  %v1947_v31 = vadd.f32 %v1946_v4, %v1778_v36  ;;  %v1875_v49 = vpop.f32.mrb[105].mxu0  ;;  %v1948_v52 = vpop.f32.mrb[105].mxu1  ;;  %v4599_v19 = vld [vmem:[%s5913_s7] sm:$0xff]   ;;  %v4600_v4 = vld [vmem:[%s5913_s7 + $0x8] sm:$0xff]  }
 0x375   : > { %v1876_v53 = vadd.f32 %v1875_v49, %v1778_v36  ;;  %v1949_v57 = vadd.f32 %v1948_v52, %v1778_v36  ;;  %v1877_v58 = vpop.f32.mrb[106].mxu0  ;;  %v1950_v54 = vpop.f32.mrb[106].mxu1  ;;  %2060 = vmatprep.subr.bf16.mxu0 %v2006_v32  ;;  %2113 = vmatprep.subr.bf16.mxu1 %v2008_v18 }
 0x376   : > { %v1878_v55 = vadd.f32 %v1877_v58, %v1783_v26  ;;  %v1951_v60 = vadd.f32 %v1950_v54, %v1783_v26  ;;  %v1879_v61 = vpop.f32.mrb[107].mxu0  ;;  %v1952_v56 = vpop.f32.mrb[107].mxu1  ;;  %2061 = vmatpush1.bf16.msra.mxu0 %v2005_v27  ;;  %2114 = vmatpush1.bf16.msra.mxu1 %v2007_v28  ;;  %v1981_v7 = vmax.f32 %v1874_v5, 0.0  ;;  %v1983_v0 = vmax.f32 %v1947_v31, 0.0 }
 0x377   : > { %v1880_v1 = vadd.f32 %v1879_v61, %v1783_v26  ;;  %v1953_v6 = vadd.f32 %v1952_v56, %v1783_v26  ;;  %v1982_v15 = vmax.f32 %v1876_v53, 0.0  ;;  %v1984_v8 = vmax.f32 %v1949_v57, 0.0  ;;  %v2024_v5 = vpop.permute.xlu0 %2023  ;;  %v2029_v31 = vpop.permute.xlu1 %2028 }
 0x378   : > { %v1985_v3 = vmax.f32 %v1878_v55, 0.0  ;;  %v1987_v14 = vmax.f32 %v1951_v60, 0.0 }
 0x379   : > { %v1986_v9 = vmax.f32 %v1880_v1, 0.0  ;;  %v1988_v22 = vmax.f32 %v1953_v6, 0.0 }
 0x37a   : > { %v2009_v45 = vpack.c.bf16 %v1985_v3, %v1981_v7  ;;  %v2011_v46 = vpack.c.bf16 %v1987_v14, %v1983_v0 }
 0x37b   : > { %v2010_v47 = vpack.c.bf16 %v1986_v9, %v1982_v15  ;;  %v2012_v42 = vpack.c.bf16 %v1988_v22, %v1984_v8  ;;  %v1883_v43 = vpop.f32.mrb[108].mxu0  ;;  %v1956_v29 = vpop.f32.mrb[108].mxu1 }
 0x37c   : > { %v1884_v20 = vadd.f32 %v1883_v43, %v1788_v44  ;;  %v1957_v10 = vadd.f32 %v1956_v29, %v1788_v44  ;;  %v1885_v11 = vpop.f32.mrb[109].mxu0  ;;  %v1958_v12 = vpop.f32.mrb[109].mxu1 }
 0x37d   : > { %v1886_v59 = vadd.f32 %v1885_v11, %v1788_v44  ;;  %v1959_v62 = vadd.f32 %v1958_v12, %v1788_v44  ;;  %v1887_v30 = vpop.f32.mrb[110].mxu0  ;;  %v1960_v33 = vpop.f32.mrb[110].mxu1  ;;  %2062 = vmatprep.subr.bf16.mxu0 %v2010_v47  ;;  %2115 = vmatprep.subr.bf16.mxu1 %v2012_v42 }
 0x37e   : > { %v1888_v50 = vadd.f32 %v1887_v30, %v1793_v23  ;;  %v1961_v63 = vadd.f32 %v1960_v33, %v1793_v23  ;;  %v1889_v51 = vpop.f32.mrb[111].mxu0  ;;  %v1962_v13 = vpop.f32.mrb[111].mxu1  ;;  %2063 = vmatpush1.bf16.msra.mxu0 %v2009_v45  ;;  %2116 = vmatpush1.bf16.msra.mxu1 %v2011_v46  ;;  %v1989_v21 = vmax.f32 %v1884_v20, 0.0  ;;  %v1991_v24 = vmax.f32 %v1957_v10, 0.0 }
 0x37f   : > { %v1890_v16 = vadd.f32 %v1889_v51, %v1793_v23  ;;  %v1963_v17 = vadd.f32 %v1962_v13, %v1793_v23  ;;  %v1990_v48 = vmax.f32 %v1886_v59, 0.0  ;;  %v1992_v35 = vmax.f32 %v1959_v62, 0.0  ;;  %v2034_v47 = vpop.permute.xlu0 %2033  ;;  %v2039_v42 = vpop.permute.xlu1 %2038 }
 0x380   : > { %v1993_v25 = vmax.f32 %v1888_v50, 0.0  ;;  %v1995_v39 = vmax.f32 %v1961_v63, 0.0 }
 0x381   : > { %v1994_v36 = vmax.f32 %v1890_v16, 0.0  ;;  %v1996_v26 = vmax.f32 %v1963_v17, 0.0 }
 0x382   : > { %v2013_v27 = vpack.c.bf16 %v1993_v25, %v1989_v21  ;;  %v2015_v28 = vpack.c.bf16 %v1995_v39, %v1991_v24 }
 0x383   : > { %v2014_v32 = vpack.c.bf16 %v1994_v36, %v1990_v48  ;;  %v2016_v18 = vpack.c.bf16 %v1996_v26, %v1992_v35 }
 0x385   : > { %2064 = vmatprep.subr.bf16.mxu0 %v2014_v32  ;;  %2117 = vmatprep.subr.bf16.mxu1 %v2016_v18 }
 0x386   : > { %2065 = vmatpush1.bf16.msra.mxu0 %v2013_v27  ;;  %2118 = vmatpush1.bf16.msra.mxu1 %v2015_v28 }
 0x389   : > { %4356 = vmatmul.mubr.msk.bf16.vlgmr.msra.gmra.mrb[112].mxu0 %vm2051_vm1, %v4599_v19  ;;  %4358 = vmatmul.mubr.msk.bf16.vlgmr.msra.gmra.mrb[112].mxu1 %vm2051_vm1, %v4599_v19 }
 0x38a   : > { %2100 = vmatprep.mubr.bf16.mxu0 %v4729_v2  ;;  %2153 = vmatprep.mubr.bf16.mxu1 %v4729_v2 }
 0x391   : > { %4357 = vmatmul.mubr.msk.bf16.gmra.mrb[116].mxu0 %vm2051_vm1, %v4600_v4  ;;  %4359 = vmatmul.mubr.msk.bf16.gmra.mrb[116].mxu1 %vm2051_vm1, %v4600_v4 }
 0x392   : > { %2231 = vmatprep.mubr.bf16.mxu0 %v4729_v2  ;;  %2272 = vmatprep.mubr.bf16.mxu1 %v4729_v2 }
 0x45c   : > { %v2092_v49 = vpop.f32.mrb[112].mxu0  ;;  %v2145_v52 = vpop.f32.mrb[112].mxu1 }
 0x45d   : > { %v2093_v53 = vadd.f32 %v2092_v49, %v2024_v5  ;;  %v2146_v57 = vadd.f32 %v2145_v52, %v2024_v5  ;;  %v2094_v58 = vpop.f32.mrb[113].mxu0  ;;  %v2147_v54 = vpop.f32.mrb[113].mxu1  ;;  %v4603_v49 = vld [vmem:[%s5907_s1 + $0x4] ss:$16 sps:$4 sm:$0xff]   ;;  %v4606_v52 = vld [vmem:[%s5907_s1 + $0xc] ss:$16 sps:$4 sm:$0xff]  }
 0x45e   : > { %v2095_v55 = vadd.f32 %v2094_v58, %v2024_v5  ;;  %v2148_v60 = vadd.f32 %v2147_v54, %v2024_v5  ;;  %v2096_v61 = vpop.f32.mrb[114].mxu0  ;;  %v2149_v56 = vpop.f32.mrb[114].mxu1  ;;  %v4604_v58 = vld [vmem:[%s5907_s1 + $0x8] ss:$16 sps:$4 sm:$0xff]   ;;  %v4609_v54 = vld [vmem:[%s5907_s1 + $0x24] ss:$16 sps:$4 sm:$0xff]  }
 0x45f   : > { %v2097_v1 = vadd.f32 %v2096_v61, %v2029_v31  ;;  %v2150_v6 = vadd.f32 %v2149_v56, %v2029_v31  ;;  %v2098_v7 = vpop.f32.mrb[115].mxu0  ;;  %v2151_v0 = vpop.f32.mrb[115].mxu1  ;;  %v2164_v15 = vmax.f32 %v2093_v53, 0.0  ;;  %v2166_v8 = vmax.f32 %v2146_v57, 0.0  ;;  %v2180_v53 = vld [vmem:[%s5915_s9] sm:$0x3] }
 0x460   : > { %v2099_v3 = vadd.f32 %v2098_v7, %v2029_v31  ;;  %v2152_v14 = vadd.f32 %v2151_v0, %v2029_v31  ;;  %v2165_v44 = vmax.f32 %v2095_v55, 0.0  ;;  %v2167_v23 = vmax.f32 %v2148_v60, 0.0  ;;  %v4601_v57 = vld [vmem:[%s5907_s1] ss:$16 sps:$4 sm:$0xff]   ;;  %v4612_v55 = vld [vmem:[%s5907_s1 + $0x2c] ss:$16 sps:$4 sm:$0xff]  }
 0x461   : > { %v2168_v9 = vmax.f32 %v2097_v1, 0.0  ;;  %v2170_v22 = vmax.f32 %v2150_v6, 0.0  ;;  %v4607_v60 = vld [vmem:[%s5907_s1 + $0x20] ss:$16 sps:$4 sm:$0xff]   ;;  %v4610_v61 = vld [vmem:[%s5907_s1 + $0x28] ss:$16 sps:$4 sm:$0xff]  }
 0x462   : > { %v2169_v45 = vmax.f32 %v2099_v3, 0.0  ;;  %v2171_v46 = vmax.f32 %v2152_v14, 0.0  ;;  %v4615_v56 = vld [vmem:[%s5907_s1 + $0x44] ss:$16 sps:$4 sm:$0xff]   ;;  %v4618_v1 = vld [vmem:[%s5907_s1 + $0x4c] ss:$16 sps:$4 sm:$0xff]  }
 0x463   : > { %v2181_v43 = vpack.c.bf16 %v2168_v9, %v2164_v15  ;;  %v2183_v29 = vpack.c.bf16 %v2170_v22, %v2166_v8  ;;  %v4613_v6 = vld [vmem:[%s5907_s1 + $0x40] ss:$16 sps:$4 sm:$0xff]   ;;  %v4616_v7 = vld [vmem:[%s5907_s1 + $0x48] ss:$16 sps:$4 sm:$0xff]  }
 0x464   : > { %v2182_v20 = vpack.c.bf16 %v2169_v45, %v2165_v44  ;;  %v2184_v10 = vpack.c.bf16 %v2171_v46, %v2167_v23  ;;  %v2102_v11 = vpop.f32.mrb[116].mxu0  ;;  %v2155_v12 = vpop.f32.mrb[116].mxu1  ;;  %v4619_v0 = vld [vmem:[%s4882_s23 + $0x80] sm:$0xff]   ;;  %v4620_v3 = vld [vmem:[%s4882_s23 + $0x88] sm:$0xff]   ;;  %v4621_v14 = vld [vmem:[%s4882_s23 + $0x90] sm:$0xff]  }
 0x465   : > { %v2103_v59 = vadd.f32 %v2102_v11, %v2034_v47  ;;  %v2156_v62 = vadd.f32 %v2155_v12, %v2034_v47  ;;  %v2104_v30 = vpop.f32.mrb[117].mxu0  ;;  %v2157_v33 = vpop.f32.mrb[117].mxu1  ;;  %v4622_v15 = vld [vmem:[%s4882_s23 + $0x98] sm:$0xff]   ;;  %v4623_v8 = vld [vmem:[%s4882_s23 + $0xa0] sm:$0xff]   ;;  %v4624_v9 = vld [vmem:[%s4882_s23 + $0xa8] sm:$0xff]  }
 0x466   : > { %v2105_v50 = vadd.f32 %v2104_v30, %v2034_v47  ;;  %v2158_v63 = vadd.f32 %v2157_v33, %v2034_v47  ;;  %v2106_v51 = vpop.f32.mrb[118].mxu0  ;;  %v2159_v13 = vpop.f32.mrb[118].mxu1  ;;  %2199 = vmatprep.subr.bf16.mxu0 %v2182_v20  ;;  %2240 = vmatprep.subr.bf16.mxu1 %v2184_v10  ;;  %v4625_v22 = vld [vmem:[%s4882_s23 + $0xb0] sm:$0xff]   ;;  %v4626_v44 = vld [vmem:[%s4882_s23 + $0xb8] sm:$0xff]   ;;  %v4627_v23 = vld [vmem:[%s4882_s23 + $0xc0] sm:$0xff]  }
 0x467   : > { %v2107_v16 = vadd.f32 %v2106_v51, %v2039_v42  ;;  %v2160_v17 = vadd.f32 %v2159_v13, %v2039_v42  ;;  %v2108_v21 = vpop.f32.mrb[119].mxu0  ;;  %v2161_v24 = vpop.f32.mrb[119].mxu1  ;;  %2200 = vmatpush1.bf16.msra.mxu0 %v2181_v43  ;;  %2241 = vmatpush1.bf16.msra.mxu1 %v2183_v29  ;;  %v2172_v48 = vmax.f32 %v2103_v59, 0.0  ;;  %v2174_v35 = vmax.f32 %v2156_v62, 0.0  ;;  %v4628_v45 = vld [vmem:[%s4882_s23 + $0xc8] sm:$0xff]   ;;  %v4629_v46 = vld [vmem:[%s4882_s23 + $0xd0] sm:$0xff]  }
 0x468   : > { %v2109_v25 = vadd.f32 %v2108_v21, %v2039_v42  ;;  %v2162_v39 = vadd.f32 %v2161_v24, %v2039_v42  ;;  %v2173_v27 = vmax.f32 %v2105_v50, 0.0  ;;  %v2175_v28 = vmax.f32 %v2158_v63, 0.0  ;;  %v4630_v47 = vld [vmem:[%s4882_s23 + $0xd8] sm:$0xff]   ;;  %v4631_v42 = vld [vmem:[%s4882_s23 + $0xe0] sm:$0xff]   ;;  %v4632_v43 = vld [vmem:[%s4882_s23 + $0xe8] sm:$0xff]   ;;  %v5522_v20 = vpop.permute.xlu0 %3158 }
 0x469   : > { %v2176_v36 = vmax.f32 %v2107_v16, 0.0  ;;  %v2178_v26 = vmax.f32 %v2160_v17, 0.0  ;;  %v4633_v29 = vld [vmem:[%s4882_s23 + $0xf0] sm:$0xff]   ;;  %v4634_v10 = vld [vmem:[%s4882_s23 + $0xf8] sm:$0xff]   ;;  %s380_s23 = sand.u32 1, %s4719_s18  }
 0x46a   : > { %v2177_v32 = vmax.f32 %v2109_v25, 0.0  ;;  %v2179_v18 = vmax.f32 %v2162_v39, 0.0  ;;  %s4270_s19 = sshll.u32 %s380_s23, 5  ;;  %s5865_s12 = scalar_lea.sflag [#allocation3], %s380_s23 }
 0x46b   : > { %v2185_v19 = vpack.c.bf16 %v2176_v36, %v2172_v48  ;;  %v2187_v4 = vpack.c.bf16 %v2178_v26, %v2174_v35  ;;  %s5556_s26 = scalar_lea.vmem [#allocation2], %s4270_s19  ;;  %s4730_s19 = smov [#allocation2]  }
 0x46c   : > { %v2186_v5 = vpack.c.bf16 %v2177_v32, %v2173_v27  ;;  %v2188_v31 = vpack.c.bf16 %v2179_v18, %v2175_v28  ;;  %v5525_v11 = vpop.permute.xlu0 %3168  ;;  %s4204_s30 = sshll.u32 %s5556_s26, 4  ;;  %s4669_s22 = sshll.u32 %s4730_s19, 4  ;;  %s5854_s30 = int_to_ptr.vmem [resolvable:$true] %s4204_s30  ;;  %s4670_s22 = int_to_ptr.vmem [resolvable:$false] %s4669_s22 }
 0x46d   : > { %s4665_s16 = scalar_lea.vmem %s5854_s30, 512  ;;  %s4671_s24 = scalar_lea.vmem %s4670_s22, 1024 }
 0x46e   : > { %2201 = vmatprep.subr.bf16.mxu0 %v2186_v5  ;;  %2242 = vmatprep.subr.bf16.mxu1 %v2188_v31  ;;  %p4666_p11 = scmp.ne.s32.totalorder %s5854_s30, %s4665_s16  ;;  %p4672_p0 = scmp.lt.s32.totalorder %s5854_s30, %s4670_s22 }
 0x46f   : > { %2202 = vmatpush1.bf16.msra.mxu0 %v2185_v19  ;;  %2243 = vmatpush1.bf16.msra.mxu1 %v2187_v4  ;;  %p4673_p1 = scmp.lt.s32.totalorder %s4671_s24, %s4665_s16 }
 0x470   : > { %2546 = vmatprep.subr.bf16.mxu0 %v4603_v49  ;;  %2739 = vmatprep.subr.bf16.mxu1 %v4606_v52  ;;  %v5529_v12 = vpop.permute.xlu0 %3178  ;;  %v2336_v49 = vld [vmem:[%s5908_s2] sm:$0xf]  ;;  %p4667_p12 = pnand %p4666_p11, %p4831_p5 }
 0x471   : > { %v5565_v52 = vrot.slane %v2336_v49, %v440_v37  ;;  %p4674_p2 = por %p4673_p1, %p4672_p0 }
 0x472   : > { %4360 = vmatmul.mubr.msk.bf16.vlgmr.msra.gmra.mrb[120].mxu0 %vm2195_vm2, %v2180_v53  ;;  %4361 = vmatmul.mubr.msk.bf16.vlgmr.msra.gmra.mrb[120].mxu1 %vm2195_vm2, %v2180_v53  ;;  %v5569_v53 = vrot.slane %v2336_v49, %v448_v38  ;;  %p4668_p13 = pneg %p4667_p12 }
 0x473   : > { %2547 = vmatpush1.bf16.msra.mxu0 %v4601_v57  ;;  %2740 = vmatpush1.bf16.msra.mxu1 %v4604_v58  ;;  %v5573_v57 = vrot.slane %v2336_v49, %v444_v40  ;;  %v5577_v58 = vrot.slane %v2336_v49, %v452_v41 }
 0x474   : > { %2548 = vmatprep.subr.bf16.mxu0 %v4609_v54  ;;  %2741 = vmatprep.subr.bf16.mxu1 %v4612_v55  ;;  %v5531_v59 = vpop.permute.xlu0 %3188  ;;  %p4675_p3 = pnand %p4674_p2, %p4668_p13 }
 0x475   : > { %2578 = vmatprep.mubr.bf16.mxu0 %v4729_v2  ;;  %2771 = vmatprep.mubr.bf16.mxu1 %v4729_v2 }
 0x477   : > { %2549 = vmatpush1.bf16.msra.mxu0 %v4607_v60  ;;  %2742 = vmatpush1.bf16.msra.mxu1 %v4610_v61 }
 0x478   : > { %2550 = vmatprep.subr.bf16.mxu0 %v4615_v56  ;;  %2743 = vmatprep.subr.bf16.mxu1 %v4618_v1  ;;  %v5533_v62 = vpop.permute.xlu0 %3198 }
 0x47b   : > { %2551 = vmatpush1.bf16.msra.mxu0 %v4613_v6  ;;  %2744 = vmatpush1.bf16.msra.mxu1 %v4616_v7 }
 0x47c   : > { %v5535_v30 = vpop.permute.xlu0 %3208 }
 0x47e   : > { %4422 = vmatmul.mubr.msk.bf16.vlgmr.msra.gmra.mrb[124].mxu0 %vm598_vm0, %v4619_v0  ;;  %4438 = vmatmul.mubr.msk.bf16.vlgmr.msra.gmra.mrb[124].mxu1 %vm598_vm0, %v4619_v0 }
 0x47f   : > { %2588 = vmatprep.mubr.bf16.mxu0 %v4729_v2  ;;  %2781 = vmatprep.mubr.bf16.mxu1 %v4729_v2 }
 0x480   : > { %v5537_v33 = vpop.permute.xlu0 %3218 }
 0x484   : > { %v5539_v50 = vpop.permute.xlu0 %3228 }
 0x486   : > { %4423 = vmatmul.mubr.msk.bf16.gmra.mrb[128].mxu0 %vm598_vm0, %v4620_v3  ;;  %4439 = vmatmul.mubr.msk.bf16.gmra.mrb[128].mxu1 %vm598_vm0, %v4620_v3 }
 0x487   : > { %2598 = vmatprep.mubr.bf16.mxu0 %v4729_v2  ;;  %2791 = vmatprep.mubr.bf16.mxu1 %v4729_v2 }
 0x488   : > { %v5541_v63 = vpop.permute.xlu0 %3656 }
 0x48c   : > { %v5543_v51 = vpop.permute.xlu0 %3666 }
 0x48e   : > { %4424 = vmatmul.mubr.msk.bf16.gmra.mrb[132].mxu0 %vm598_vm0, %v4621_v14  ;;  %4440 = vmatmul.mubr.msk.bf16.gmra.mrb[132].mxu1 %vm598_vm0, %v4621_v14 }
 0x48f   : > { %2608 = vmatprep.mubr.bf16.mxu0 %v4729_v2  ;;  %2801 = vmatprep.mubr.bf16.mxu1 %v4729_v2 }
 0x490   : > { %v5545_v13 = vpop.permute.xlu0 %3676 }
 0x494   : > { %v5547_v16 = vpop.permute.xlu0 %3686 }
 0x496   : > { %4425 = vmatmul.mubr.msk.bf16.gmra.mrb[136].mxu0 %vm598_vm0, %v4622_v15  ;;  %4441 = vmatmul.mubr.msk.bf16.gmra.mrb[136].mxu1 %vm598_vm0, %v4622_v15  ;;  %v4637_v15 = vld [vmem:[%s5909_s3 + $0x4] ss:$8 sps:$4 sm:$0xff]  }
 0x497   : > { %2618 = vmatprep.mubr.bf16.mxu0 %v4729_v2  ;;  %2811 = vmatprep.mubr.bf16.mxu1 %v4729_v2 }
 0x498   : > { %v5549_v17 = vpop.permute.xlu0 %3922 }
 0x49c   : > { %v5551_v21 = vpop.permute.xlu0 %3932 }
 0x49e   : > { %4426 = vmatmul.mubr.msk.bf16.gmra.mrb[140].mxu0 %vm598_vm0, %v4623_v8  ;;  %4442 = vmatmul.mubr.msk.bf16.gmra.mrb[140].mxu1 %vm598_vm0, %v4623_v8 }
 0x49f   : > { %2628 = vmatprep.mubr.bf16.mxu0 %v4729_v2  ;;  %2821 = vmatprep.mubr.bf16.mxu1 %v4729_v2 }
 0x4a0   : > { %v2193_v24 = vpop.permute.xlu0 %2192 }
 0x4a6   : > { %4427 = vmatmul.mubr.msk.bf16.gmra.mrb[144].mxu0 %vm598_vm0, %v4624_v9  ;;  %4443 = vmatmul.mubr.msk.bf16.gmra.mrb[144].mxu1 %vm598_vm0, %v4624_v9 }
 0x4a7   : > { %2638 = vmatprep.mubr.bf16.mxu0 %v4729_v2  ;;  %2831 = vmatprep.mubr.bf16.mxu1 %v4729_v2 }
 0x4ae   : > { %4428 = vmatmul.mubr.msk.bf16.gmra.mrb[148].mxu0 %vm598_vm0, %v4625_v22  ;;  %4444 = vmatmul.mubr.msk.bf16.gmra.mrb[148].mxu1 %vm598_vm0, %v4625_v22 }
 0x4af   : > { %2648 = vmatprep.mubr.bf16.mxu0 %v4729_v2  ;;  %2841 = vmatprep.mubr.bf16.mxu1 %v4729_v2 }
 0x4b6   : > { %4429 = vmatmul.mubr.msk.bf16.gmra.mrb[152].mxu0 %vm598_vm0, %v4626_v44  ;;  %4445 = vmatmul.mubr.msk.bf16.gmra.mrb[152].mxu1 %vm598_vm0, %v4626_v44 }
 0x4b7   : > { %2658 = vmatprep.mubr.bf16.mxu0 %v4729_v2  ;;  %2851 = vmatprep.mubr.bf16.mxu1 %v4729_v2 }
 0x4be   : > { %4430 = vmatmul.mubr.msk.bf16.gmra.mrb[156].mxu0 %vm598_vm0, %v4627_v23  ;;  %4446 = vmatmul.mubr.msk.bf16.gmra.mrb[156].mxu1 %vm598_vm0, %v4627_v23 }
 0x4bf   : > { %2668 = vmatprep.mubr.bf16.mxu0 %v4729_v2  ;;  %2861 = vmatprep.mubr.bf16.mxu1 %v4729_v2 }
 0x4c6   : > { %4431 = vmatmul.mubr.msk.bf16.gmra.mrb[160].mxu0 %vm598_vm0, %v4628_v45  ;;  %4447 = vmatmul.mubr.msk.bf16.gmra.mrb[160].mxu1 %vm598_vm0, %v4628_v45 }
 0x4c7   : > { %2678 = vmatprep.mubr.bf16.mxu0 %v4729_v2  ;;  %2871 = vmatprep.mubr.bf16.mxu1 %v4729_v2 }
 0x4ce   : > { %4432 = vmatmul.mubr.msk.bf16.gmra.mrb[164].mxu0 %vm598_vm0, %v4629_v46  ;;  %4448 = vmatmul.mubr.msk.bf16.gmra.mrb[164].mxu1 %vm598_vm0, %v4629_v46 }
 0x4cf   : > { %2688 = vmatprep.mubr.bf16.mxu0 %v4729_v2  ;;  %2881 = vmatprep.mubr.bf16.mxu1 %v4729_v2 }
 0x4d6   : > { %4433 = vmatmul.mubr.msk.bf16.gmra.mrb[168].mxu0 %vm598_vm0, %v4630_v47  ;;  %4449 = vmatmul.mubr.msk.bf16.gmra.mrb[168].mxu1 %vm598_vm0, %v4630_v47 }
 0x4d7   : > { %2698 = vmatprep.mubr.bf16.mxu0 %v4729_v2  ;;  %2891 = vmatprep.mubr.bf16.mxu1 %v4729_v2 }
 0x4de   : > { %4434 = vmatmul.mubr.msk.bf16.gmra.mrb[172].mxu0 %vm598_vm0, %v4631_v42  ;;  %4450 = vmatmul.mubr.msk.bf16.gmra.mrb[172].mxu1 %vm598_vm0, %v4631_v42 }
 0x4df   : > { %2708 = vmatprep.mubr.bf16.mxu0 %v4729_v2  ;;  %2901 = vmatprep.mubr.bf16.mxu1 %v4729_v2 }
 0x4e6   : > { %4435 = vmatmul.mubr.msk.bf16.gmra.mrb[176].mxu0 %vm598_vm0, %v4632_v43  ;;  %4451 = vmatmul.mubr.msk.bf16.gmra.mrb[176].mxu1 %vm598_vm0, %v4632_v43 }
 0x4e7   : > { %2718 = vmatprep.mubr.bf16.mxu0 %v4729_v2  ;;  %2911 = vmatprep.mubr.bf16.mxu1 %v4729_v2 }
 0x4ee   : > { %4436 = vmatmul.mubr.msk.bf16.gmra.mrb[180].mxu0 %vm598_vm0, %v4633_v29  ;;  %4452 = vmatmul.mubr.msk.bf16.gmra.mrb[180].mxu1 %vm598_vm0, %v4633_v29 }
 0x4ef   : > { %2728 = vmatprep.mubr.bf16.mxu0 %v4729_v2  ;;  %2921 = vmatprep.mubr.bf16.mxu1 %v4729_v2 }
 0x4f6   : > { %4437 = vmatmul.mubr.msk.bf16.gmra.mrb[184].mxu0 %vm598_vm0, %v4634_v10  ;;  %4453 = vmatmul.mubr.msk.bf16.gmra.mrb[184].mxu1 %vm598_vm0, %v4634_v10 }
 0x4f7   : > { %3348 = vmatprep.mubr.bf16.mxu0 %v4637_v15  ;;  %3461 = vmatprep.mubr.bf16.mxu1 %v4637_v15 }
 0x545   : > { %v2233_v25 = vpop.f32.mrb[120].mxu0  ;;  %v2274_v39 = vpop.f32.mrb[120].mxu1 }
 0x546   : > { %v2234_v48 = vadd.f32 %v2233_v25, %v2193_v24  ;;  %v2275_v35 = vadd.f32 %v2274_v39, %v2193_v24  ;;  %v2235_v36 = vpop.f32.mrb[121].mxu0  ;;  %v2276_v26 = vpop.f32.mrb[121].mxu1 }
 0x547   : > { %v2236_v27 = vadd.f32 %v2235_v36, %v2193_v24  ;;  %v2277_v28 = vadd.f32 %v2276_v26, %v2193_v24  ;;  %v2237_v32 = vpop.f32.mrb[122].mxu0  ;;  %v2278_v18 = vpop.f32.mrb[122].mxu1 }
 0x548   : > { %v2238_v19 = vpop.f32.mrb[123].mxu0  ;;  %v2279_v4 = vpop.f32.mrb[123].mxu1 }
 0x549   : > { %v2285_v5 = vcombine.low %v2234_v48, %v2236_v27  ;;  %v2286_v31 = vcombine.low %v2275_v35, %v2277_v28 }
 0x54b   : > { %2289 = vst [vmem:[%s5556_s26] sm:$0xff] %v2285_v5  ;;  %2290 = vst [vmem:[%s5556_s26 + $0x8] sm:$0xff] %v2286_v31 }
 0x551   : > { %v2580_v54 = vpop.f32.mrb[124].mxu0  ;;  %v2773_v55 = vpop.f32.mrb[124].mxu1 }
 0x552   : > { %v2581_v60 = vadd.f32 %v2580_v54, %v5565_v52  ;;  %v2774_v61 = vadd.f32 %v2773_v55, %v5569_v53  ;;  %v2582_v37 = vpop.f32.mrb[125].mxu0  ;;  %v2775_v56 = vpop.f32.mrb[125].mxu1 }
 0x553   : > { %v2583_v1 = vadd.f32 %v2582_v37, %v5573_v57  ;;  %v2776_v38 = vadd.f32 %v2775_v56, %v5577_v58  ;;  %v2584_v6 = vpop.f32.mrb[126].mxu0  ;;  %v2777_v7 = vpop.f32.mrb[126].mxu1 }
 0x554   : > { %v2585_v40 = vadd.f32 %v2584_v6, %v5565_v52  ;;  %v2778_v34 = vadd.f32 %v2777_v7, %v5569_v53  ;;  %v2586_v41 = vpop.f32.mrb[127].mxu0  ;;  %v2779_v0 = vpop.f32.mrb[127].mxu1  ;;  %v2932_v8 = vmax.f32 %v2581_v60, 0.0  ;;  %v2934_v9 = vmax.f32 %v2774_v61, 0.0 }
 0x555   : > { %v2587_v3 = vadd.f32 %v2586_v41, %v5573_v57  ;;  %v2780_v14 = vadd.f32 %v2779_v0, %v5577_v58  ;;  %v2933_v23 = vmax.f32 %v2583_v1, 0.0  ;;  %v2935_v45 = vmax.f32 %v2776_v38, 0.0 }
 0x556   : > { %v2936_v22 = vmax.f32 %v2585_v40, 0.0  ;;  %v2938_v44 = vmax.f32 %v2778_v34, 0.0 }
 0x557   : > { %v2937_v46 = vmax.f32 %v2587_v3, 0.0  ;;  %v2939_v47 = vmax.f32 %v2780_v14, 0.0 }
 0x558   : > { %v3076_v42 = vpack.c.bf16 %v2936_v22, %v2932_v8  ;;  %v3078_v43 = vpack.c.bf16 %v2938_v44, %v2934_v9 }
 0x559   : > { %v3077_v29 = vpack.c.bf16 %v2937_v46, %v2933_v23  ;;  %v3079_v10 = vpack.c.bf16 %v2939_v47, %v2935_v45  ;;  %v2590_v24 = vpop.f32.mrb[128].mxu0  ;;  %v2783_v25 = vpop.f32.mrb[128].mxu1 }
 0x55a   : > { %v2591_v39 = vadd.f32 %v2590_v24, %v5565_v52  ;;  %v2784_v48 = vadd.f32 %v2783_v25, %v5569_v53  ;;  %v2592_v35 = vpop.f32.mrb[129].mxu0  ;;  %v2785_v36 = vpop.f32.mrb[129].mxu1 }
 0x55b   : > { %v2593_v26 = vadd.f32 %v2592_v35, %v5573_v57  ;;  %v2786_v27 = vadd.f32 %v2785_v36, %v5577_v58  ;;  %v2594_v28 = vpop.f32.mrb[130].mxu0  ;;  %v2787_v32 = vpop.f32.mrb[130].mxu1  ;;  %3316 = vmatprep.subr.bf16.mxu0 %v3077_v29  ;;  %3429 = vmatprep.subr.bf16.mxu1 %v3079_v10 }
 0x55c   : > { %v2595_v18 = vadd.f32 %v2594_v28, %v5565_v52  ;;  %v2788_v19 = vadd.f32 %v2787_v32, %v5569_v53  ;;  %v2596_v4 = vpop.f32.mrb[131].mxu0  ;;  %v2789_v5 = vpop.f32.mrb[131].mxu1  ;;  %3317 = vmatpush1.bf16.msra.mxu0 %v3076_v42  ;;  %3430 = vmatpush1.bf16.msra.mxu1 %v3078_v43  ;;  %v2940_v54 = vmax.f32 %v2591_v39, 0.0  ;;  %v2942_v55 = vmax.f32 %v2784_v48, 0.0 }
 0x55d   : > { %v2597_v31 = vadd.f32 %v2596_v4, %v5573_v57  ;;  %v2790_v49 = vadd.f32 %v2789_v5, %v5577_v58  ;;  %v2941_v37 = vmax.f32 %v2593_v26, 0.0  ;;  %v2943_v56 = vmax.f32 %v2786_v27, 0.0 }
 0x55e   : > { %v2944_v60 = vmax.f32 %v2595_v18, 0.0  ;;  %v2946_v61 = vmax.f32 %v2788_v19, 0.0 }
 0x55f   : > { %v2945_v1 = vmax.f32 %v2597_v31, 0.0  ;;  %v2947_v38 = vmax.f32 %v2790_v49, 0.0 }
 0x560   : > { %v3080_v6 = vpack.c.bf16 %v2944_v60, %v2940_v54  ;;  %v3082_v7 = vpack.c.bf16 %v2946_v61, %v2942_v55 }
 0x561   : > { %v3081_v40 = vpack.c.bf16 %v2945_v1, %v2941_v37  ;;  %v3083_v34 = vpack.c.bf16 %v2947_v38, %v2943_v56  ;;  %v2600_v41 = vpop.f32.mrb[132].mxu0  ;;  %v2793_v0 = vpop.f32.mrb[132].mxu1 }
 0x562   : > { %v2601_v3 = vadd.f32 %v2600_v41, %v5565_v52  ;;  %v2794_v14 = vadd.f32 %v2793_v0, %v5569_v53  ;;  %v2602_v15 = vpop.f32.mrb[133].mxu0  ;;  %v2795_v8 = vpop.f32.mrb[133].mxu1 }
 0x563   : > { %v2603_v9 = vadd.f32 %v2602_v15, %v5573_v57  ;;  %v2796_v22 = vadd.f32 %v2795_v8, %v5577_v58  ;;  %v2604_v44 = vpop.f32.mrb[134].mxu0  ;;  %v2797_v23 = vpop.f32.mrb[134].mxu1  ;;  %3318 = vmatprep.subr.bf16.mxu0 %v3081_v40  ;;  %3431 = vmatprep.subr.bf16.mxu1 %v3083_v34 }
 0x564   : > { %v2605_v45 = vadd.f32 %v2604_v44, %v5565_v52  ;;  %v2798_v46 = vadd.f32 %v2797_v23, %v5569_v53  ;;  %v2606_v47 = vpop.f32.mrb[135].mxu0  ;;  %v2799_v42 = vpop.f32.mrb[135].mxu1  ;;  %3319 = vmatpush1.bf16.msra.mxu0 %v3080_v6  ;;  %3432 = vmatpush1.bf16.msra.mxu1 %v3082_v7  ;;  %v2948_v10 = vmax.f32 %v2601_v3, 0.0  ;;  %v2950_v24 = vmax.f32 %v2794_v14, 0.0 }
 0x565   : > { %v2607_v43 = vadd.f32 %v2606_v47, %v5573_v57  ;;  %v2800_v29 = vadd.f32 %v2799_v42, %v5577_v58  ;;  %v2949_v48 = vmax.f32 %v2603_v9, 0.0  ;;  %v2951_v35 = vmax.f32 %v2796_v22, 0.0 }
 0x566   : > { %v2952_v25 = vmax.f32 %v2605_v45, 0.0  ;;  %v2954_v39 = vmax.f32 %v2798_v46, 0.0 }
 0x567   : > { %v2953_v36 = vmax.f32 %v2607_v43, 0.0  ;;  %v2955_v26 = vmax.f32 %v2800_v29, 0.0 }
 0x568   : > { %v3084_v27 = vpack.c.bf16 %v2952_v25, %v2948_v10  ;;  %v3086_v28 = vpack.c.bf16 %v2954_v39, %v2950_v24 }
 0x569   : > { %v3085_v32 = vpack.c.bf16 %v2953_v36, %v2949_v48  ;;  %v3087_v18 = vpack.c.bf16 %v2955_v26, %v2951_v35  ;;  %v2610_v19 = vpop.f32.mrb[136].mxu0  ;;  %v2803_v4 = vpop.f32.mrb[136].mxu1 }
 0x56a   : > { %v2611_v5 = vadd.f32 %v2610_v19, %v5565_v52  ;;  %v2804_v31 = vadd.f32 %v2803_v4, %v5569_v53  ;;  %v2612_v49 = vpop.f32.mrb[137].mxu0  ;;  %v2805_v54 = vpop.f32.mrb[137].mxu1 }
 0x56b   : > { %v2613_v55 = vadd.f32 %v2612_v49, %v5573_v57  ;;  %v2806_v60 = vadd.f32 %v2805_v54, %v5577_v58  ;;  %v2614_v61 = vpop.f32.mrb[138].mxu0  ;;  %v2807_v37 = vpop.f32.mrb[138].mxu1  ;;  %3320 = vmatprep.subr.bf16.mxu0 %v3085_v32  ;;  %3433 = vmatprep.subr.bf16.mxu1 %v3087_v18 }
 0x56c   : > { %v2615_v56 = vadd.f32 %v2614_v61, %v5565_v52  ;;  %v2808_v1 = vadd.f32 %v2807_v37, %v5569_v53  ;;  %v2616_v38 = vpop.f32.mrb[139].mxu0  ;;  %v2809_v6 = vpop.f32.mrb[139].mxu1  ;;  %3321 = vmatpush1.bf16.msra.mxu0 %v3084_v27  ;;  %3434 = vmatpush1.bf16.msra.mxu1 %v3086_v28  ;;  %v2956_v34 = vmax.f32 %v2611_v5, 0.0  ;;  %v2958_v41 = vmax.f32 %v2804_v31, 0.0 }
 0x56d   : > { %v2617_v7 = vadd.f32 %v2616_v38, %v5573_v57  ;;  %v2810_v40 = vadd.f32 %v2809_v6, %v5577_v58  ;;  %v2957_v14 = vmax.f32 %v2613_v55, 0.0  ;;  %v2959_v15 = vmax.f32 %v2806_v60, 0.0 }
 0x56e   : > { %v2960_v0 = vmax.f32 %v2615_v56, 0.0  ;;  %v2962_v3 = vmax.f32 %v2808_v1, 0.0 }
 0x56f   : > { %v2961_v8 = vmax.f32 %v2617_v7, 0.0  ;;  %v2963_v9 = vmax.f32 %v2810_v40, 0.0 }
 0x570   : > { %v3088_v22 = vpack.c.bf16 %v2960_v0, %v2956_v34  ;;  %v3090_v44 = vpack.c.bf16 %v2962_v3, %v2958_v41 }
 0x571   : > { %v3089_v23 = vpack.c.bf16 %v2961_v8, %v2957_v14  ;;  %v3091_v45 = vpack.c.bf16 %v2963_v9, %v2959_v15  ;;  %v2620_v46 = vpop.f32.mrb[140].mxu0  ;;  %v2813_v47 = vpop.f32.mrb[140].mxu1 }
 0x572   : > { %v2621_v42 = vadd.f32 %v2620_v46, %v5565_v52  ;;  %v2814_v43 = vadd.f32 %v2813_v47, %v5569_v53  ;;  %v2622_v29 = vpop.f32.mrb[141].mxu0  ;;  %v2815_v10 = vpop.f32.mrb[141].mxu1 }
 0x573   : > { %v2623_v24 = vadd.f32 %v2622_v29, %v5573_v57  ;;  %v2816_v25 = vadd.f32 %v2815_v10, %v5577_v58  ;;  %v2624_v39 = vpop.f32.mrb[142].mxu0  ;;  %v2817_v48 = vpop.f32.mrb[142].mxu1  ;;  %3322 = vmatprep.subr.bf16.mxu0 %v3089_v23  ;;  %3435 = vmatprep.subr.bf16.mxu1 %v3091_v45 }
 0x574   : > { %v2625_v35 = vadd.f32 %v2624_v39, %v5565_v52  ;;  %v2818_v36 = vadd.f32 %v2817_v48, %v5569_v53  ;;  %v2626_v26 = vpop.f32.mrb[143].mxu0  ;;  %v2819_v27 = vpop.f32.mrb[143].mxu1  ;;  %3323 = vmatpush1.bf16.msra.mxu0 %v3088_v22  ;;  %3436 = vmatpush1.bf16.msra.mxu1 %v3090_v44  ;;  %v2964_v18 = vmax.f32 %v2621_v42, 0.0  ;;  %v2966_v19 = vmax.f32 %v2814_v43, 0.0 }
 0x575   : > { %v2627_v28 = vadd.f32 %v2626_v26, %v5573_v57  ;;  %v2820_v32 = vadd.f32 %v2819_v27, %v5577_v58  ;;  %v2965_v31 = vmax.f32 %v2623_v24, 0.0  ;;  %v2967_v49 = vmax.f32 %v2816_v25, 0.0 }
 0x576   : > { %v2968_v4 = vmax.f32 %v2625_v35, 0.0  ;;  %v2970_v5 = vmax.f32 %v2818_v36, 0.0 }
 0x577   : > { %v2969_v54 = vmax.f32 %v2627_v28, 0.0  ;;  %v2971_v55 = vmax.f32 %v2820_v32, 0.0 }
 0x578   : > { %v3092_v60 = vpack.c.bf16 %v2968_v4, %v2964_v18  ;;  %v3094_v61 = vpack.c.bf16 %v2970_v5, %v2966_v19 }
 0x579   : > { %v3093_v37 = vpack.c.bf16 %v2969_v54, %v2965_v31  ;;  %v3095_v56 = vpack.c.bf16 %v2971_v55, %v2967_v49  ;;  %v2630_v1 = vpop.f32.mrb[144].mxu0  ;;  %v2823_v38 = vpop.f32.mrb[144].mxu1 }
 0x57a   : > { %v2631_v6 = vadd.f32 %v2630_v1, %v5565_v52  ;;  %v2824_v7 = vadd.f32 %v2823_v38, %v5569_v53  ;;  %v2632_v40 = vpop.f32.mrb[145].mxu0  ;;  %v2825_v34 = vpop.f32.mrb[145].mxu1 }
 0x57b   : > { %v2633_v41 = vadd.f32 %v2632_v40, %v5573_v57  ;;  %v2826_v0 = vadd.f32 %v2825_v34, %v5577_v58  ;;  %v2634_v3 = vpop.f32.mrb[146].mxu0  ;;  %v2827_v14 = vpop.f32.mrb[146].mxu1  ;;  %3324 = vmatprep.subr.bf16.mxu0 %v3093_v37  ;;  %3437 = vmatprep.subr.bf16.mxu1 %v3095_v56 }
 0x57c   : > { %v2635_v15 = vadd.f32 %v2634_v3, %v5565_v52  ;;  %v2828_v8 = vadd.f32 %v2827_v14, %v5569_v53  ;;  %v2636_v9 = vpop.f32.mrb[147].mxu0  ;;  %v2829_v22 = vpop.f32.mrb[147].mxu1  ;;  %3325 = vmatpush1.bf16.msra.mxu0 %v3092_v60  ;;  %3438 = vmatpush1.bf16.msra.mxu1 %v3094_v61  ;;  %v2972_v45 = vmax.f32 %v2631_v6, 0.0  ;;  %v2974_v46 = vmax.f32 %v2824_v7, 0.0 }
 0x57d   : > { %v2637_v44 = vadd.f32 %v2636_v9, %v5573_v57  ;;  %v2830_v23 = vadd.f32 %v2829_v22, %v5577_v58  ;;  %v2973_v43 = vmax.f32 %v2633_v41, 0.0  ;;  %v2975_v29 = vmax.f32 %v2826_v0, 0.0 }
 0x57e   : > { %v2976_v47 = vmax.f32 %v2635_v15, 0.0  ;;  %v2978_v42 = vmax.f32 %v2828_v8, 0.0 }
 0x57f   : > { %v2977_v10 = vmax.f32 %v2637_v44, 0.0  ;;  %v2979_v24 = vmax.f32 %v2830_v23, 0.0 }
 0x580   : > { %v3096_v25 = vpack.c.bf16 %v2976_v47, %v2972_v45  ;;  %v3098_v39 = vpack.c.bf16 %v2978_v42, %v2974_v46 }
 0x581   : > { %v3097_v48 = vpack.c.bf16 %v2977_v10, %v2973_v43  ;;  %v3099_v35 = vpack.c.bf16 %v2979_v24, %v2975_v29  ;;  %v2640_v36 = vpop.f32.mrb[148].mxu0  ;;  %v2833_v26 = vpop.f32.mrb[148].mxu1 }
 0x582   : > { %v2641_v27 = vadd.f32 %v2640_v36, %v5565_v52  ;;  %v2834_v28 = vadd.f32 %v2833_v26, %v5569_v53  ;;  %v2642_v32 = vpop.f32.mrb[149].mxu0  ;;  %v2835_v18 = vpop.f32.mrb[149].mxu1 }
 0x583   : > { %v2643_v19 = vadd.f32 %v2642_v32, %v5573_v57  ;;  %v2836_v4 = vadd.f32 %v2835_v18, %v5577_v58  ;;  %v2644_v5 = vpop.f32.mrb[150].mxu0  ;;  %v2837_v31 = vpop.f32.mrb[150].mxu1  ;;  %3326 = vmatprep.subr.bf16.mxu0 %v3097_v48  ;;  %3439 = vmatprep.subr.bf16.mxu1 %v3099_v35 }
 0x584   : > { %v2645_v49 = vadd.f32 %v2644_v5, %v5565_v52  ;;  %v2838_v54 = vadd.f32 %v2837_v31, %v5569_v53  ;;  %v2646_v55 = vpop.f32.mrb[151].mxu0  ;;  %v2839_v60 = vpop.f32.mrb[151].mxu1  ;;  %3327 = vmatpush1.bf16.msra.mxu0 %v3096_v25  ;;  %3440 = vmatpush1.bf16.msra.mxu1 %v3098_v39  ;;  %v2980_v56 = vmax.f32 %v2641_v27, 0.0  ;;  %v2982_v1 = vmax.f32 %v2834_v28, 0.0 }
 0x585   : > { %v2647_v61 = vadd.f32 %v2646_v55, %v5573_v57  ;;  %v2840_v37 = vadd.f32 %v2839_v60, %v5577_v58  ;;  %v2981_v7 = vmax.f32 %v2643_v19, 0.0  ;;  %v2983_v40 = vmax.f32 %v2836_v4, 0.0 }
 0x586   : > { %v2984_v38 = vmax.f32 %v2645_v49, 0.0  ;;  %v2986_v6 = vmax.f32 %v2838_v54, 0.0 }
 0x587   : > { %v2985_v34 = vmax.f32 %v2647_v61, 0.0  ;;  %v2987_v41 = vmax.f32 %v2840_v37, 0.0 }
 0x588   : > { %v3100_v0 = vpack.c.bf16 %v2984_v38, %v2980_v56  ;;  %v3102_v3 = vpack.c.bf16 %v2986_v6, %v2982_v1 }
 0x589   : > { %v3101_v14 = vpack.c.bf16 %v2985_v34, %v2981_v7  ;;  %v3103_v15 = vpack.c.bf16 %v2987_v41, %v2983_v40  ;;  %v2650_v8 = vpop.f32.mrb[152].mxu0  ;;  %v2843_v9 = vpop.f32.mrb[152].mxu1 }
 0x58a   : > { %v2651_v22 = vadd.f32 %v2650_v8, %v5565_v52  ;;  %v2844_v44 = vadd.f32 %v2843_v9, %v5569_v53  ;;  %v2652_v23 = vpop.f32.mrb[153].mxu0  ;;  %v2845_v45 = vpop.f32.mrb[153].mxu1 }
 0x58b   : > { %v2653_v46 = vadd.f32 %v2652_v23, %v5573_v57  ;;  %v2846_v47 = vadd.f32 %v2845_v45, %v5577_v58  ;;  %v2654_v42 = vpop.f32.mrb[154].mxu0  ;;  %v2847_v43 = vpop.f32.mrb[154].mxu1  ;;  %3328 = vmatprep.subr.bf16.mxu0 %v3101_v14  ;;  %3441 = vmatprep.subr.bf16.mxu1 %v3103_v15 }
 0x58c   : > { %v2655_v29 = vadd.f32 %v2654_v42, %v5565_v52  ;;  %v2848_v10 = vadd.f32 %v2847_v43, %v5569_v53  ;;  %v2656_v24 = vpop.f32.mrb[155].mxu0  ;;  %v2849_v25 = vpop.f32.mrb[155].mxu1  ;;  %3329 = vmatpush1.bf16.msra.mxu0 %v3100_v0  ;;  %3442 = vmatpush1.bf16.msra.mxu1 %v3102_v3  ;;  %v2988_v35 = vmax.f32 %v2651_v22, 0.0  ;;  %v2990_v36 = vmax.f32 %v2844_v44, 0.0 }
 0x58d   : > { %v2657_v39 = vadd.f32 %v2656_v24, %v5573_v57  ;;  %v2850_v48 = vadd.f32 %v2849_v25, %v5577_v58  ;;  %v2989_v28 = vmax.f32 %v2653_v46, 0.0  ;;  %v2991_v32 = vmax.f32 %v2846_v47, 0.0 }
 0x58e   : > { %v2992_v26 = vmax.f32 %v2655_v29, 0.0  ;;  %v2994_v27 = vmax.f32 %v2848_v10, 0.0 }
 0x58f   : > { %v2993_v18 = vmax.f32 %v2657_v39, 0.0  ;;  %v2995_v19 = vmax.f32 %v2850_v48, 0.0 }
 0x590   : > { %v3104_v4 = vpack.c.bf16 %v2992_v26, %v2988_v35  ;;  %v3106_v5 = vpack.c.bf16 %v2994_v27, %v2990_v36 }
 0x591   : > { %v3105_v31 = vpack.c.bf16 %v2993_v18, %v2989_v28  ;;  %v3107_v49 = vpack.c.bf16 %v2995_v19, %v2991_v32  ;;  %v2660_v54 = vpop.f32.mrb[156].mxu0  ;;  %v2853_v55 = vpop.f32.mrb[156].mxu1 }
 0x592   : > { %v2661_v60 = vadd.f32 %v2660_v54, %v5565_v52  ;;  %v2854_v61 = vadd.f32 %v2853_v55, %v5569_v53  ;;  %v2662_v37 = vpop.f32.mrb[157].mxu0  ;;  %v2855_v56 = vpop.f32.mrb[157].mxu1 }
 0x593   : > { %v2663_v1 = vadd.f32 %v2662_v37, %v5573_v57  ;;  %v2856_v38 = vadd.f32 %v2855_v56, %v5577_v58  ;;  %v2664_v6 = vpop.f32.mrb[158].mxu0  ;;  %v2857_v7 = vpop.f32.mrb[158].mxu1  ;;  %3330 = vmatprep.subr.bf16.mxu0 %v3105_v31  ;;  %3443 = vmatprep.subr.bf16.mxu1 %v3107_v49 }
 0x594   : > { %v2665_v40 = vadd.f32 %v2664_v6, %v5565_v52  ;;  %v2858_v34 = vadd.f32 %v2857_v7, %v5569_v53  ;;  %v2666_v41 = vpop.f32.mrb[159].mxu0  ;;  %v2859_v0 = vpop.f32.mrb[159].mxu1  ;;  %3331 = vmatpush1.bf16.msra.mxu0 %v3104_v4  ;;  %3444 = vmatpush1.bf16.msra.mxu1 %v3106_v5  ;;  %v2996_v15 = vmax.f32 %v2661_v60, 0.0  ;;  %v2998_v8 = vmax.f32 %v2854_v61, 0.0 }
 0x595   : > { %v2667_v3 = vadd.f32 %v2666_v41, %v5573_v57  ;;  %v2860_v14 = vadd.f32 %v2859_v0, %v5577_v58  ;;  %v2997_v44 = vmax.f32 %v2663_v1, 0.0  ;;  %v2999_v23 = vmax.f32 %v2856_v38, 0.0 }
 0x596   : > { %v3000_v9 = vmax.f32 %v2665_v40, 0.0  ;;  %v3002_v22 = vmax.f32 %v2858_v34, 0.0 }
 0x597   : > { %v3001_v45 = vmax.f32 %v2667_v3, 0.0  ;;  %v3003_v46 = vmax.f32 %v2860_v14, 0.0 }
 0x598   : > { %v3108_v47 = vpack.c.bf16 %v3000_v9, %v2996_v15  ;;  %v3110_v42 = vpack.c.bf16 %v3002_v22, %v2998_v8 }
 0x599   : > { %v3109_v43 = vpack.c.bf16 %v3001_v45, %v2997_v44  ;;  %v3111_v29 = vpack.c.bf16 %v3003_v46, %v2999_v23  ;;  %v2670_v10 = vpop.f32.mrb[160].mxu0  ;;  %v2863_v24 = vpop.f32.mrb[160].mxu1 }
 0x59a   : > { %v2671_v25 = vadd.f32 %v2670_v10, %v5565_v52  ;;  %v2864_v39 = vadd.f32 %v2863_v24, %v5569_v53  ;;  %v2672_v48 = vpop.f32.mrb[161].mxu0  ;;  %v2865_v35 = vpop.f32.mrb[161].mxu1 }
 0x59b   : > { %v2673_v36 = vadd.f32 %v2672_v48, %v5573_v57  ;;  %v2866_v26 = vadd.f32 %v2865_v35, %v5577_v58  ;;  %v2674_v27 = vpop.f32.mrb[162].mxu0  ;;  %v2867_v28 = vpop.f32.mrb[162].mxu1  ;;  %3332 = vmatprep.subr.bf16.mxu0 %v3109_v43  ;;  %3445 = vmatprep.subr.bf16.mxu1 %v3111_v29 }
 0x59c   : > { %v2675_v32 = vadd.f32 %v2674_v27, %v5565_v52  ;;  %v2868_v18 = vadd.f32 %v2867_v28, %v5569_v53  ;;  %v2676_v19 = vpop.f32.mrb[163].mxu0  ;;  %v2869_v4 = vpop.f32.mrb[163].mxu1  ;;  %3333 = vmatpush1.bf16.msra.mxu0 %v3108_v47  ;;  %3446 = vmatpush1.bf16.msra.mxu1 %v3110_v42  ;;  %v3004_v49 = vmax.f32 %v2671_v25, 0.0  ;;  %v3006_v54 = vmax.f32 %v2864_v39, 0.0 }
 0x59d   : > { %v2677_v5 = vadd.f32 %v2676_v19, %v5573_v57  ;;  %v2870_v31 = vadd.f32 %v2869_v4, %v5577_v58  ;;  %v3005_v61 = vmax.f32 %v2673_v36, 0.0  ;;  %v3007_v37 = vmax.f32 %v2866_v26, 0.0 }
 0x59e   : > { %v3008_v55 = vmax.f32 %v2675_v32, 0.0  ;;  %v3010_v60 = vmax.f32 %v2868_v18, 0.0 }
 0x59f   : > { %v3009_v56 = vmax.f32 %v2677_v5, 0.0  ;;  %v3011_v1 = vmax.f32 %v2870_v31, 0.0 }
 0x5a0   : > { %v3112_v38 = vpack.c.bf16 %v3008_v55, %v3004_v49  ;;  %v3114_v6 = vpack.c.bf16 %v3010_v60, %v3006_v54 }
 0x5a1   : > { %v3113_v7 = vpack.c.bf16 %v3009_v56, %v3005_v61  ;;  %v3115_v40 = vpack.c.bf16 %v3011_v1, %v3007_v37  ;;  %v2680_v34 = vpop.f32.mrb[164].mxu0  ;;  %v2873_v41 = vpop.f32.mrb[164].mxu1 }
 0x5a2   : > { %v2681_v0 = vadd.f32 %v2680_v34, %v5565_v52  ;;  %v2874_v3 = vadd.f32 %v2873_v41, %v5569_v53  ;;  %v2682_v14 = vpop.f32.mrb[165].mxu0  ;;  %v2875_v15 = vpop.f32.mrb[165].mxu1 }
 0x5a3   : > { %v2683_v8 = vadd.f32 %v2682_v14, %v5573_v57  ;;  %v2876_v9 = vadd.f32 %v2875_v15, %v5577_v58  ;;  %v2684_v22 = vpop.f32.mrb[166].mxu0  ;;  %v2877_v44 = vpop.f32.mrb[166].mxu1  ;;  %3334 = vmatprep.subr.bf16.mxu0 %v3113_v7  ;;  %3447 = vmatprep.subr.bf16.mxu1 %v3115_v40 }
 0x5a4   : > { %v2685_v23 = vadd.f32 %v2684_v22, %v5565_v52  ;;  %v2878_v45 = vadd.f32 %v2877_v44, %v5569_v53  ;;  %v2686_v46 = vpop.f32.mrb[167].mxu0  ;;  %v2879_v47 = vpop.f32.mrb[167].mxu1  ;;  %3335 = vmatpush1.bf16.msra.mxu0 %v3112_v38  ;;  %3448 = vmatpush1.bf16.msra.mxu1 %v3114_v6  ;;  %v3012_v29 = vmax.f32 %v2681_v0, 0.0  ;;  %v3014_v10 = vmax.f32 %v2874_v3, 0.0 }
 0x5a5   : > { %v2687_v42 = vadd.f32 %v2686_v46, %v5573_v57  ;;  %v2880_v43 = vadd.f32 %v2879_v47, %v5577_v58  ;;  %v3013_v39 = vmax.f32 %v2683_v8, 0.0  ;;  %v3015_v48 = vmax.f32 %v2876_v9, 0.0 }
 0x5a6   : > { %v3016_v24 = vmax.f32 %v2685_v23, 0.0  ;;  %v3018_v25 = vmax.f32 %v2878_v45, 0.0 }
 0x5a7   : > { %v3017_v35 = vmax.f32 %v2687_v42, 0.0  ;;  %v3019_v36 = vmax.f32 %v2880_v43, 0.0 }
 0x5a8   : > { %v3116_v26 = vpack.c.bf16 %v3016_v24, %v3012_v29  ;;  %v3118_v27 = vpack.c.bf16 %v3018_v25, %v3014_v10 }
 0x5a9   : > { %v3117_v28 = vpack.c.bf16 %v3017_v35, %v3013_v39  ;;  %v3119_v32 = vpack.c.bf16 %v3019_v36, %v3015_v48  ;;  %v2690_v18 = vpop.f32.mrb[168].mxu0  ;;  %v2883_v19 = vpop.f32.mrb[168].mxu1 }
 0x5aa   : > { %v2691_v4 = vadd.f32 %v2690_v18, %v5565_v52  ;;  %v2884_v5 = vadd.f32 %v2883_v19, %v5569_v53  ;;  %v2692_v31 = vpop.f32.mrb[169].mxu0  ;;  %v2885_v49 = vpop.f32.mrb[169].mxu1 }
 0x5ab   : > { %v2693_v54 = vadd.f32 %v2692_v31, %v5573_v57  ;;  %v2886_v55 = vadd.f32 %v2885_v49, %v5577_v58  ;;  %v2694_v60 = vpop.f32.mrb[170].mxu0  ;;  %v2887_v61 = vpop.f32.mrb[170].mxu1  ;;  %3336 = vmatprep.subr.bf16.mxu0 %v3117_v28  ;;  %3449 = vmatprep.subr.bf16.mxu1 %v3119_v32 }
 0x5ac   : > { %v2695_v37 = vadd.f32 %v2694_v60, %v5565_v52  ;;  %v2888_v56 = vadd.f32 %v2887_v61, %v5569_v53  ;;  %v2696_v1 = vpop.f32.mrb[171].mxu0  ;;  %v2889_v38 = vpop.f32.mrb[171].mxu1  ;;  %3337 = vmatpush1.bf16.msra.mxu0 %v3116_v26  ;;  %3450 = vmatpush1.bf16.msra.mxu1 %v3118_v27  ;;  %v3020_v40 = vmax.f32 %v2691_v4, 0.0  ;;  %v3022_v34 = vmax.f32 %v2884_v5, 0.0 }
 0x5ad   : > { %v2697_v6 = vadd.f32 %v2696_v1, %v5573_v57  ;;  %v2890_v7 = vadd.f32 %v2889_v38, %v5577_v58  ;;  %v3021_v3 = vmax.f32 %v2693_v54, 0.0  ;;  %v3023_v14 = vmax.f32 %v2886_v55, 0.0 }
 0x5ae   : > { %v3024_v41 = vmax.f32 %v2695_v37, 0.0  ;;  %v3026_v0 = vmax.f32 %v2888_v56, 0.0 }
 0x5af   : > { %v3025_v15 = vmax.f32 %v2697_v6, 0.0  ;;  %v3027_v8 = vmax.f32 %v2890_v7, 0.0 }
 0x5b0   : > { %v3120_v9 = vpack.c.bf16 %v3024_v41, %v3020_v40  ;;  %v3122_v22 = vpack.c.bf16 %v3026_v0, %v3022_v34 }
 0x5b1   : > { %v3121_v44 = vpack.c.bf16 %v3025_v15, %v3021_v3  ;;  %v3123_v23 = vpack.c.bf16 %v3027_v8, %v3023_v14  ;;  %v2700_v45 = vpop.f32.mrb[172].mxu0  ;;  %v2893_v46 = vpop.f32.mrb[172].mxu1 }
 0x5b2   : > { %v2701_v47 = vadd.f32 %v2700_v45, %v5565_v52  ;;  %v2894_v42 = vadd.f32 %v2893_v46, %v5569_v53  ;;  %v2702_v43 = vpop.f32.mrb[173].mxu0  ;;  %v2895_v29 = vpop.f32.mrb[173].mxu1 }
 0x5b3   : > { %v2703_v10 = vadd.f32 %v2702_v43, %v5573_v57  ;;  %v2896_v24 = vadd.f32 %v2895_v29, %v5577_v58  ;;  %v2704_v25 = vpop.f32.mrb[174].mxu0  ;;  %v2897_v39 = vpop.f32.mrb[174].mxu1  ;;  %3338 = vmatprep.subr.bf16.mxu0 %v3121_v44  ;;  %3451 = vmatprep.subr.bf16.mxu1 %v3123_v23 }
 0x5b4   : > { %v2705_v48 = vadd.f32 %v2704_v25, %v5565_v52  ;;  %v2898_v35 = vadd.f32 %v2897_v39, %v5569_v53  ;;  %v2706_v36 = vpop.f32.mrb[175].mxu0  ;;  %v2899_v26 = vpop.f32.mrb[175].mxu1  ;;  %3339 = vmatpush1.bf16.msra.mxu0 %v3120_v9  ;;  %3452 = vmatpush1.bf16.msra.mxu1 %v3122_v22  ;;  %v3028_v32 = vmax.f32 %v2701_v47, 0.0  ;;  %v3030_v18 = vmax.f32 %v2894_v42, 0.0 }
 0x5b5   : > { %v2707_v27 = vadd.f32 %v2706_v36, %v5573_v57  ;;  %v2900_v28 = vadd.f32 %v2899_v26, %v5577_v58  ;;  %v3029_v5 = vmax.f32 %v2703_v10, 0.0  ;;  %v3031_v31 = vmax.f32 %v2896_v24, 0.0 }
 0x5b6   : > { %v3032_v19 = vmax.f32 %v2705_v48, 0.0  ;;  %v3034_v4 = vmax.f32 %v2898_v35, 0.0 }
 0x5b7   : > { %v3033_v49 = vmax.f32 %v2707_v27, 0.0  ;;  %v3035_v54 = vmax.f32 %v2900_v28, 0.0 }
 0x5b8   : > { %v3124_v55 = vpack.c.bf16 %v3032_v19, %v3028_v32  ;;  %v3126_v60 = vpack.c.bf16 %v3034_v4, %v3030_v18 }
 0x5b9   : > { %v3125_v61 = vpack.c.bf16 %v3033_v49, %v3029_v5  ;;  %v3127_v37 = vpack.c.bf16 %v3035_v54, %v3031_v31  ;;  %v2710_v56 = vpop.f32.mrb[176].mxu0  ;;  %v2903_v1 = vpop.f32.mrb[176].mxu1 }
 0x5ba   : > { %v2711_v38 = vadd.f32 %v2710_v56, %v5565_v52  ;;  %v2904_v6 = vadd.f32 %v2903_v1, %v5569_v53  ;;  %v2712_v7 = vpop.f32.mrb[177].mxu0  ;;  %v2905_v40 = vpop.f32.mrb[177].mxu1 }
 0x5bb   : > { %v2713_v34 = vadd.f32 %v2712_v7, %v5573_v57  ;;  %v2906_v41 = vadd.f32 %v2905_v40, %v5577_v58  ;;  %v2714_v0 = vpop.f32.mrb[178].mxu0  ;;  %v2907_v3 = vpop.f32.mrb[178].mxu1  ;;  %3340 = vmatprep.subr.bf16.mxu0 %v3125_v61  ;;  %3453 = vmatprep.subr.bf16.mxu1 %v3127_v37 }
 0x5bc   : > { %v2715_v14 = vadd.f32 %v2714_v0, %v5565_v52  ;;  %v2908_v15 = vadd.f32 %v2907_v3, %v5569_v53  ;;  %v2716_v8 = vpop.f32.mrb[179].mxu0  ;;  %v2909_v9 = vpop.f32.mrb[179].mxu1  ;;  %3341 = vmatpush1.bf16.msra.mxu0 %v3124_v55  ;;  %3454 = vmatpush1.bf16.msra.mxu1 %v3126_v60  ;;  %v3036_v23 = vmax.f32 %v2711_v38, 0.0  ;;  %v3038_v45 = vmax.f32 %v2904_v6, 0.0 }
 0x5bd   : > { %v2717_v22 = vadd.f32 %v2716_v8, %v5573_v57  ;;  %v2910_v44 = vadd.f32 %v2909_v9, %v5577_v58  ;;  %v3037_v42 = vmax.f32 %v2713_v34, 0.0  ;;  %v3039_v43 = vmax.f32 %v2906_v41, 0.0 }
 0x5be   : > { %v3040_v46 = vmax.f32 %v2715_v14, 0.0  ;;  %v3042_v47 = vmax.f32 %v2908_v15, 0.0 }
 0x5bf   : > { %v3041_v29 = vmax.f32 %v2717_v22, 0.0  ;;  %v3043_v10 = vmax.f32 %v2910_v44, 0.0 }
 0x5c0   : > { %v3128_v24 = vpack.c.bf16 %v3040_v46, %v3036_v23  ;;  %v3130_v25 = vpack.c.bf16 %v3042_v47, %v3038_v45 }
 0x5c1   : > { %v3129_v39 = vpack.c.bf16 %v3041_v29, %v3037_v42  ;;  %v3131_v48 = vpack.c.bf16 %v3043_v10, %v3039_v43  ;;  %v2720_v35 = vpop.f32.mrb[180].mxu0  ;;  %v2913_v36 = vpop.f32.mrb[180].mxu1 }
 0x5c2   : > { %v2721_v26 = vadd.f32 %v2720_v35, %v5565_v52  ;;  %v2914_v27 = vadd.f32 %v2913_v36, %v5569_v53  ;;  %v2722_v28 = vpop.f32.mrb[181].mxu0  ;;  %v2915_v32 = vpop.f32.mrb[181].mxu1 }
 0x5c3   : > { %v2723_v18 = vadd.f32 %v2722_v28, %v5573_v57  ;;  %v2916_v19 = vadd.f32 %v2915_v32, %v5577_v58  ;;  %v2724_v4 = vpop.f32.mrb[182].mxu0  ;;  %v2917_v5 = vpop.f32.mrb[182].mxu1  ;;  %3342 = vmatprep.subr.bf16.mxu0 %v3129_v39  ;;  %3455 = vmatprep.subr.bf16.mxu1 %v3131_v48 }
 0x5c4   : > { %v2725_v31 = vadd.f32 %v2724_v4, %v5565_v52  ;;  %v2918_v49 = vadd.f32 %v2917_v5, %v5569_v53  ;;  %v2726_v54 = vpop.f32.mrb[183].mxu0  ;;  %v2919_v55 = vpop.f32.mrb[183].mxu1  ;;  %3343 = vmatpush1.bf16.msra.mxu0 %v3128_v24  ;;  %3456 = vmatpush1.bf16.msra.mxu1 %v3130_v25  ;;  %v3044_v37 = vmax.f32 %v2721_v26, 0.0  ;;  %v3046_v56 = vmax.f32 %v2914_v27, 0.0  ;;  %v4640_v5 = vld [vmem:[%s5909_s3 + $0x10] ss:$8 sps:$4 sm:$0xff]  }
 0x5c5   : > { %v2727_v60 = vadd.f32 %v2726_v54, %v5573_v57  ;;  %v2920_v61 = vadd.f32 %v2919_v55, %v5577_v58  ;;  %v3045_v6 = vmax.f32 %v2723_v18, 0.0  ;;  %v3047_v7 = vmax.f32 %v2916_v19, 0.0  ;;  %v4644_v54 = vld [vmem:[%s5909_s3 + $0x34] ss:$8 sps:$4 sm:$0xff]   ;;  %v4646_v55 = vld [vmem:[%s5909_s3 + $0x30] ss:$8 sps:$4 sm:$0xff]  }
 0x5c6   : > { %v3048_v1 = vmax.f32 %v2725_v31, 0.0  ;;  %v3050_v38 = vmax.f32 %v2918_v49, 0.0  ;;  %v4641_v31 = vld [vmem:[%s5909_s3 + $0x24] ss:$8 sps:$4 sm:$0xff]   ;;  %v4643_v49 = vld [vmem:[%s5909_s3 + $0x20] ss:$8 sps:$4 sm:$0xff]  }
 0x5c7   : > { %v3049_v40 = vmax.f32 %v2727_v60, 0.0  ;;  %v3051_v34 = vmax.f32 %v2920_v61, 0.0  ;;  %v4647_v60 = vld [vmem:[%s5909_s3 + $0x44] ss:$8 sps:$4 sm:$0xff]   ;;  %v4649_v61 = vld [vmem:[%s5909_s3 + $0x40] ss:$8 sps:$4 sm:$0xff]  }
 0x5c8   : > { %v3132_v41 = vpack.c.bf16 %v3048_v1, %v3044_v37  ;;  %v3134_v0 = vpack.c.bf16 %v3050_v38, %v3046_v56  ;;  %v4650_v37 = vld [vmem:[%s5909_s3 + $0x54] ss:$8 sps:$4 sm:$0xff]   ;;  %v4652_v56 = vld [vmem:[%s5909_s3 + $0x50] ss:$8 sps:$4 sm:$0xff]   ;;  %v4653_v1 = vld [vmem:[%s5909_s3 + $0x64] ss:$8 sps:$4 sm:$0xff]  }
 0x5c9   : > { %v3133_v3 = vpack.c.bf16 %v3049_v40, %v3045_v6  ;;  %v3135_v14 = vpack.c.bf16 %v3051_v34, %v3047_v7  ;;  %v2730_v15 = vpop.f32.mrb[184].mxu0  ;;  %v2923_v8 = vpop.f32.mrb[184].mxu1  ;;  %v4655_v38 = vld [vmem:[%s5909_s3 + $0x60] ss:$8 sps:$4 sm:$0xff]   ;;  %v4656_v6 = vld [vmem:[%s5909_s3 + $0x74] ss:$8 sps:$4 sm:$0xff]  }
 0x5ca   : > { %v2731_v9 = vadd.f32 %v2730_v15, %v5565_v52  ;;  %v2924_v22 = vadd.f32 %v2923_v8, %v5569_v53  ;;  %v2732_v44 = vpop.f32.mrb[185].mxu0  ;;  %v2925_v23 = vpop.f32.mrb[185].mxu1  ;;  %v4658_v7 = vld [vmem:[%s5909_s3 + $0x70] ss:$8 sps:$4 sm:$0xff]  }
 0x5cb   : > { %v2733_v45 = vadd.f32 %v2732_v44, %v5573_v57  ;;  %v2926_v46 = vadd.f32 %v2925_v23, %v5577_v58  ;;  %v2734_v47 = vpop.f32.mrb[186].mxu0  ;;  %v2927_v42 = vpop.f32.mrb[186].mxu1  ;;  %3344 = vmatprep.subr.bf16.mxu0 %v3133_v3  ;;  %3457 = vmatprep.subr.bf16.mxu1 %v3135_v14 }
 0x5cc   : > { %v2735_v43 = vadd.f32 %v2734_v47, %v5565_v52  ;;  %v2928_v29 = vadd.f32 %v2927_v42, %v5569_v53  ;;  %v2736_v10 = vpop.f32.mrb[187].mxu0  ;;  %v2929_v24 = vpop.f32.mrb[187].mxu1  ;;  %3345 = vmatpush1.bf16.msra.mxu0 %v3132_v41  ;;  %3458 = vmatpush1.bf16.msra.mxu1 %v3134_v0  ;;  %v3052_v48 = vmax.f32 %v2731_v9, 0.0  ;;  %v3054_v35 = vmax.f32 %v2924_v22, 0.0 }
 0x5cd   : > { %v2737_v25 = vadd.f32 %v2736_v10, %v5573_v57  ;;  %v2930_v39 = vadd.f32 %v2929_v24, %v5577_v58  ;;  %v3053_v27 = vmax.f32 %v2733_v45, 0.0  ;;  %v3055_v28 = vmax.f32 %v2926_v46, 0.0  ;;  %v4635_v57 = vld [vmem:[%s5909_s3] ss:$8 sps:$4 sm:$0xff]   ;;  %v4638_v58 = vld [vmem:[%s5909_s3 + $0x14] ss:$8 sps:$4 sm:$0xff]   ;;  %v3164_v40 = vpop.permute.xlu1 %3163 }
 0x5ce   : > { %v3056_v36 = vmax.f32 %v2735_v43, 0.0  ;;  %v3058_v26 = vmax.f32 %v2928_v29, 0.0 }
 0x5cf   : > { %v3057_v32 = vmax.f32 %v2737_v25, 0.0  ;;  %v3059_v18 = vmax.f32 %v2930_v39, 0.0 }
 0x5d0   : > { %v3136_v19 = vpack.c.bf16 %v3056_v36, %v3052_v48  ;;  %v3138_v52 = vpack.c.bf16 %v3058_v26, %v3054_v35 }
 0x5d1   : > { %v3137_v4 = vpack.c.bf16 %v3057_v32, %v3053_v27  ;;  %v3139_v53 = vpack.c.bf16 %v3059_v18, %v3055_v28  ;;  %v3174_v26 = vpop.permute.xlu1 %3173 }
 0x5d3   : > { %3346 = vmatprep.subr.bf16.mxu0 %v3137_v4  ;;  %3459 = vmatprep.subr.bf16.mxu1 %v3139_v53 }
 0x5d4   : > { %3347 = vmatpush1.bf16.msra.mxu0 %v3136_v19  ;;  %3460 = vmatpush1.bf16.msra.mxu1 %v3138_v52 }
 0x5d7   : > { %3349 = vmatmul.mubr.bf16.vlgmr.msra.gmra.mrb[188].mxu0 %v4635_v57  ;;  %3462 = vmatmul.mubr.bf16.vlgmr.msra.gmra.mrb[188].mxu1 %v4635_v57 }
 0x5d8   : > { %3358 = vmatprep.mubr.bf16.mxu0 %v4638_v58  ;;  %3471 = vmatprep.mubr.bf16.mxu1 %v4638_v58 }
 0x5df   : > { %3359 = vmatmul.mubr.bf16.gmra.mrb[192].mxu0 %v4640_v5  ;;  %3472 = vmatmul.mubr.bf16.gmra.mrb[192].mxu1 %v4640_v5 }
 0x5e0   : > { %3368 = vmatprep.mubr.bf16.mxu0 %v4641_v31  ;;  %3481 = vmatprep.mubr.bf16.mxu1 %v4641_v31 }
 0x5e7   : > { %3369 = vmatmul.mubr.bf16.gmra.mrb[196].mxu0 %v4643_v49  ;;  %3482 = vmatmul.mubr.bf16.gmra.mrb[196].mxu1 %v4643_v49 }
 0x5e8   : > { %3378 = vmatprep.mubr.bf16.mxu0 %v4644_v54  ;;  %3491 = vmatprep.mubr.bf16.mxu1 %v4644_v54 }
 0x5ef   : > { %3379 = vmatmul.mubr.bf16.gmra.mrb[200].mxu0 %v4646_v55  ;;  %3492 = vmatmul.mubr.bf16.gmra.mrb[200].mxu1 %v4646_v55 }
 0x5f0   : > { %3388 = vmatprep.mubr.bf16.mxu0 %v4647_v60  ;;  %3501 = vmatprep.mubr.bf16.mxu1 %v4647_v60 }
 0x5f7   : > { %3389 = vmatmul.mubr.bf16.gmra.mrb[204].mxu0 %v4649_v61  ;;  %3502 = vmatmul.mubr.bf16.gmra.mrb[204].mxu1 %v4649_v61 }
 0x5f8   : > { %3398 = vmatprep.mubr.bf16.mxu0 %v4650_v37  ;;  %3511 = vmatprep.mubr.bf16.mxu1 %v4650_v37 }
 0x5ff   : > { %3399 = vmatmul.mubr.bf16.gmra.mrb[208].mxu0 %v4652_v56  ;;  %3512 = vmatmul.mubr.bf16.gmra.mrb[208].mxu1 %v4652_v56 }
 0x600   : > { %3408 = vmatprep.mubr.bf16.mxu0 %v4653_v1  ;;  %3521 = vmatprep.mubr.bf16.mxu1 %v4653_v1 }
 0x607   : > { %3409 = vmatmul.mubr.bf16.gmra.mrb[212].mxu0 %v4655_v38  ;;  %3522 = vmatmul.mubr.bf16.gmra.mrb[212].mxu1 %v4655_v38 }
 0x608   : > { %3418 = vmatprep.mubr.bf16.mxu0 %v4656_v6  ;;  %3531 = vmatprep.mubr.bf16.mxu1 %v4656_v6 }
 0x60f   : > { %3419 = vmatmul.mubr.bf16.gmra.mrb[216].mxu0 %v4658_v7  ;;  %3532 = vmatmul.mubr.bf16.gmra.mrb[216].mxu1 %v4658_v7 }
 0x610   : > { %3750 = vmatprep.mubr.bf16.mxu0 %v4729_v2  ;;  %3823 = vmatprep.mubr.bf16.mxu1 %v4729_v2 }
 0x6aa   : > { %v3350_v34 = vpop.f32.mrb[188].mxu0  ;;  %v3463_v41 = vpop.f32.mrb[188].mxu1 }
 0x6ab   : > { %v3351_v0 = vadd.f32 %v3350_v34, %v5522_v20  ;;  %v3464_v3 = vadd.f32 %v3463_v41, %v5522_v20  ;;  %v3352_v14 = vpop.f32.mrb[189].mxu0  ;;  %v3465_v15 = vpop.f32.mrb[189].mxu1 }
 0x6ac   : > { %v3353_v8 = vadd.f32 %v3352_v14, %v5522_v20  ;;  %v3466_v9 = vadd.f32 %v3465_v15, %v5522_v20  ;;  %v3354_v22 = vpop.f32.mrb[190].mxu0  ;;  %v3467_v44 = vpop.f32.mrb[190].mxu1 }
 0x6ad   : > { %v3355_v23 = vadd.f32 %v3354_v22, %v3164_v40  ;;  %v3468_v45 = vadd.f32 %v3467_v44, %v3164_v40  ;;  %v3356_v46 = vpop.f32.mrb[191].mxu0  ;;  %v3469_v47 = vpop.f32.mrb[191].mxu1  ;;  %v3542_v29 = vmax.f32 %v3351_v0, 0.0  ;;  %v3544_v10 = vmax.f32 %v3464_v3, 0.0 }
 0x6ae   : > { %v3357_v42 = vadd.f32 %v3356_v46, %v3164_v40  ;;  %v3470_v43 = vadd.f32 %v3469_v47, %v3164_v40  ;;  %v3543_v39 = vmax.f32 %v3353_v8, 0.0  ;;  %v3545_v48 = vmax.f32 %v3466_v9, 0.0  ;;  %v3184_v0 = vpop.permute.xlu1 %3183 }
 0x6af   : > { %v3546_v24 = vmax.f32 %v3355_v23, 0.0  ;;  %v3548_v25 = vmax.f32 %v3468_v45, 0.0 }
 0x6b0   : > { %v3547_v35 = vmax.f32 %v3357_v42, 0.0  ;;  %v3549_v36 = vmax.f32 %v3470_v43, 0.0 }
 0x6b1   : > { %v3614_v27 = vpack.c.bf16 %v3546_v24, %v3542_v29  ;;  %v3616_v28 = vpack.c.bf16 %v3548_v25, %v3544_v10 }
 0x6b2   : > { %v3615_v20 = vpack.c.bf16 %v3547_v35, %v3543_v39  ;;  %v3617_v32 = vpack.c.bf16 %v3549_v36, %v3545_v48  ;;  %v3360_v18 = vpop.f32.mrb[192].mxu0  ;;  %v3473_v19 = vpop.f32.mrb[192].mxu1 }
 0x6b3   : > { %v3361_v52 = vadd.f32 %v3360_v18, %v5525_v11  ;;  %v3474_v4 = vadd.f32 %v3473_v19, %v5525_v11  ;;  %v3362_v53 = vpop.f32.mrb[193].mxu0  ;;  %v3475_v57 = vpop.f32.mrb[193].mxu1 }
 0x6b4   : > { %v3363_v58 = vadd.f32 %v3362_v53, %v5525_v11  ;;  %v3476_v5 = vadd.f32 %v3475_v57, %v5525_v11  ;;  %v3364_v31 = vpop.f32.mrb[194].mxu0  ;;  %v3477_v49 = vpop.f32.mrb[194].mxu1  ;;  %3718 = vmatprep.subr.bf16.mxu0 %v3615_v20  ;;  %3791 = vmatprep.subr.bf16.mxu1 %v3617_v32 }
 0x6b5   : > { %v3365_v54 = vadd.f32 %v3364_v31, %v3174_v26  ;;  %v3478_v55 = vadd.f32 %v3477_v49, %v3174_v26  ;;  %v3366_v60 = vpop.f32.mrb[195].mxu0  ;;  %v3479_v61 = vpop.f32.mrb[195].mxu1  ;;  %3719 = vmatpush1.bf16.msra.mxu0 %v3614_v27  ;;  %3792 = vmatpush1.bf16.msra.mxu1 %v3616_v28  ;;  %v3550_v1 = vmax.f32 %v3361_v52, 0.0  ;;  %v3552_v38 = vmax.f32 %v3474_v4, 0.0 }
 0x6b6   : > { %v3367_v37 = vadd.f32 %v3366_v60, %v3174_v26  ;;  %v3480_v56 = vadd.f32 %v3479_v61, %v3174_v26  ;;  %v3551_v40 = vmax.f32 %v3363_v58, 0.0  ;;  %v3553_v34 = vmax.f32 %v3476_v5, 0.0  ;;  %v3194_v19 = vpop.permute.xlu1 %3193 }
 0x6b7   : > { %v3554_v6 = vmax.f32 %v3365_v54, 0.0  ;;  %v3556_v7 = vmax.f32 %v3478_v55, 0.0 }
 0x6b8   : > { %v3555_v41 = vmax.f32 %v3367_v37, 0.0  ;;  %v3557_v11 = vmax.f32 %v3480_v56, 0.0 }
 0x6b9   : > { %v3618_v3 = vpack.c.bf16 %v3554_v6, %v3550_v1  ;;  %v3620_v14 = vpack.c.bf16 %v3556_v7, %v3552_v38 }
 0x6ba   : > { %v3619_v15 = vpack.c.bf16 %v3555_v41, %v3551_v40  ;;  %v3621_v8 = vpack.c.bf16 %v3557_v11, %v3553_v34  ;;  %v3370_v9 = vpop.f32.mrb[196].mxu0  ;;  %v3483_v22 = vpop.f32.mrb[196].mxu1 }
 0x6bb   : > { %v3371_v44 = vadd.f32 %v3370_v9, %v5529_v12  ;;  %v3484_v23 = vadd.f32 %v3483_v22, %v5529_v12  ;;  %v3372_v45 = vpop.f32.mrb[197].mxu0  ;;  %v3485_v46 = vpop.f32.mrb[197].mxu1 }
 0x6bc   : > { %v3373_v47 = vadd.f32 %v3372_v45, %v5529_v12  ;;  %v3486_v42 = vadd.f32 %v3485_v46, %v5529_v12  ;;  %v3374_v43 = vpop.f32.mrb[198].mxu0  ;;  %v3487_v29 = vpop.f32.mrb[198].mxu1  ;;  %3720 = vmatprep.subr.bf16.mxu0 %v3619_v15  ;;  %3793 = vmatprep.subr.bf16.mxu1 %v3621_v8 }
 0x6bd   : > { %v3375_v10 = vadd.f32 %v3374_v43, %v3184_v0  ;;  %v3488_v24 = vadd.f32 %v3487_v29, %v3184_v0  ;;  %v3376_v25 = vpop.f32.mrb[199].mxu0  ;;  %v3489_v39 = vpop.f32.mrb[199].mxu1  ;;  %3721 = vmatpush1.bf16.msra.mxu0 %v3618_v3  ;;  %3794 = vmatpush1.bf16.msra.mxu1 %v3620_v14  ;;  %v3558_v36 = vmax.f32 %v3371_v44, 0.0  ;;  %v3560_v26 = vmax.f32 %v3484_v23, 0.0 }
 0x6be   : > { %v3377_v48 = vadd.f32 %v3376_v25, %v3184_v0  ;;  %v3490_v35 = vadd.f32 %v3489_v39, %v3184_v0  ;;  %v3559_v20 = vmax.f32 %v3373_v47, 0.0  ;;  %v3561_v32 = vmax.f32 %v3486_v42, 0.0  ;;  %v3204_v9 = vpop.permute.xlu1 %3203 }
 0x6bf   : > { %v3562_v27 = vmax.f32 %v3375_v10, 0.0  ;;  %v3564_v28 = vmax.f32 %v3488_v24, 0.0 }
 0x6c0   : > { %v3563_v18 = vmax.f32 %v3377_v48, 0.0  ;;  %v3565_v12 = vmax.f32 %v3490_v35, 0.0 }
 0x6c1   : > { %v3622_v52 = vpack.c.bf16 %v3562_v27, %v3558_v36  ;;  %v3624_v4 = vpack.c.bf16 %v3564_v28, %v3560_v26 }
 0x6c2   : > { %v3623_v53 = vpack.c.bf16 %v3563_v18, %v3559_v20  ;;  %v3625_v57 = vpack.c.bf16 %v3565_v12, %v3561_v32  ;;  %v3380_v58 = vpop.f32.mrb[200].mxu0  ;;  %v3493_v5 = vpop.f32.mrb[200].mxu1 }
 0x6c3   : > { %v3381_v31 = vadd.f32 %v3380_v58, %v5531_v59  ;;  %v3494_v49 = vadd.f32 %v3493_v5, %v5531_v59  ;;  %v3382_v54 = vpop.f32.mrb[201].mxu0  ;;  %v3495_v55 = vpop.f32.mrb[201].mxu1 }
 0x6c4   : > { %v3383_v60 = vadd.f32 %v3382_v54, %v5531_v59  ;;  %v3496_v61 = vadd.f32 %v3495_v55, %v5531_v59  ;;  %v3384_v37 = vpop.f32.mrb[202].mxu0  ;;  %v3497_v56 = vpop.f32.mrb[202].mxu1  ;;  %3722 = vmatprep.subr.bf16.mxu0 %v3623_v53  ;;  %3795 = vmatprep.subr.bf16.mxu1 %v3625_v57 }
 0x6c5   : > { %v3385_v1 = vadd.f32 %v3384_v37, %v3194_v19  ;;  %v3498_v38 = vadd.f32 %v3497_v56, %v3194_v19  ;;  %v3386_v6 = vpop.f32.mrb[203].mxu0  ;;  %v3499_v7 = vpop.f32.mrb[203].mxu1  ;;  %3723 = vmatpush1.bf16.msra.mxu0 %v3622_v52  ;;  %3796 = vmatpush1.bf16.msra.mxu1 %v3624_v4  ;;  %v3566_v41 = vmax.f32 %v3381_v31, 0.0  ;;  %v3568_v11 = vmax.f32 %v3494_v49, 0.0 }
 0x6c6   : > { %v3387_v40 = vadd.f32 %v3386_v6, %v3194_v19  ;;  %v3500_v34 = vadd.f32 %v3499_v7, %v3194_v19  ;;  %v3567_v14 = vmax.f32 %v3383_v60, 0.0  ;;  %v3569_v15 = vmax.f32 %v3496_v61, 0.0  ;;  %v3214_v57 = vpop.permute.xlu1 %3213 }
 0x6c7   : > { %v3570_v0 = vmax.f32 %v3385_v1, 0.0  ;;  %v3572_v3 = vmax.f32 %v3498_v38, 0.0 }
 0x6c8   : > { %v3571_v8 = vmax.f32 %v3387_v40, 0.0  ;;  %v3573_v59 = vmax.f32 %v3500_v34, 0.0 }
 0x6c9   : > { %v3626_v22 = vpack.c.bf16 %v3570_v0, %v3566_v41  ;;  %v3628_v44 = vpack.c.bf16 %v3572_v3, %v3568_v11 }
 0x6ca   : > { %v3627_v23 = vpack.c.bf16 %v3571_v8, %v3567_v14  ;;  %v3629_v45 = vpack.c.bf16 %v3573_v59, %v3569_v15  ;;  %v3390_v46 = vpop.f32.mrb[204].mxu0  ;;  %v3503_v47 = vpop.f32.mrb[204].mxu1 }
 0x6cb   : > { %v3391_v42 = vadd.f32 %v3390_v46, %v5533_v62  ;;  %v3504_v43 = vadd.f32 %v3503_v47, %v5533_v62  ;;  %v3392_v29 = vpop.f32.mrb[205].mxu0  ;;  %v3505_v10 = vpop.f32.mrb[205].mxu1 }
 0x6cc   : > { %v3393_v24 = vadd.f32 %v3392_v29, %v5533_v62  ;;  %v3506_v25 = vadd.f32 %v3505_v10, %v5533_v62  ;;  %v3394_v39 = vpop.f32.mrb[206].mxu0  ;;  %v3507_v48 = vpop.f32.mrb[206].mxu1  ;;  %3724 = vmatprep.subr.bf16.mxu0 %v3627_v23  ;;  %3797 = vmatprep.subr.bf16.mxu1 %v3629_v45 }
 0x6cd   : > { %v3395_v35 = vadd.f32 %v3394_v39, %v3204_v9  ;;  %v3508_v36 = vadd.f32 %v3507_v48, %v3204_v9  ;;  %v3396_v26 = vpop.f32.mrb[207].mxu0  ;;  %v3509_v27 = vpop.f32.mrb[207].mxu1  ;;  %3725 = vmatpush1.bf16.msra.mxu0 %v3626_v22  ;;  %3798 = vmatpush1.bf16.msra.mxu1 %v3628_v44  ;;  %v3574_v32 = vmax.f32 %v3391_v42, 0.0  ;;  %v3576_v18 = vmax.f32 %v3504_v43, 0.0 }
 0x6ce   : > { %v3397_v28 = vadd.f32 %v3396_v26, %v3204_v9  ;;  %v3510_v20 = vadd.f32 %v3509_v27, %v3204_v9  ;;  %v3575_v52 = vmax.f32 %v3393_v24, 0.0  ;;  %v3577_v4 = vmax.f32 %v3506_v25, 0.0  ;;  %v3224_v23 = vpop.permute.xlu1 %3223 }
 0x6cf   : > { %v3578_v12 = vmax.f32 %v3395_v35, 0.0  ;;  %v3580_v19 = vmax.f32 %v3508_v36, 0.0 }
 0x6d0   : > { %v3579_v53 = vmax.f32 %v3397_v28, 0.0  ;;  %v3581_v62 = vmax.f32 %v3510_v20, 0.0 }
 0x6d1   : > { %v3630_v58 = vpack.c.bf16 %v3578_v12, %v3574_v32  ;;  %v3632_v5 = vpack.c.bf16 %v3580_v19, %v3576_v18 }
 0x6d2   : > { %v3631_v31 = vpack.c.bf16 %v3579_v53, %v3575_v52  ;;  %v3633_v49 = vpack.c.bf16 %v3581_v62, %v3577_v4  ;;  %v3400_v54 = vpop.f32.mrb[208].mxu0  ;;  %v3513_v55 = vpop.f32.mrb[208].mxu1 }
 0x6d3   : > { %v3401_v60 = vadd.f32 %v3400_v54, %v5535_v30  ;;  %v3514_v61 = vadd.f32 %v3513_v55, %v5535_v30  ;;  %v3402_v37 = vpop.f32.mrb[209].mxu0  ;;  %v3515_v56 = vpop.f32.mrb[209].mxu1 }
 0x6d4   : > { %v3403_v1 = vadd.f32 %v3402_v37, %v5535_v30  ;;  %v3516_v38 = vadd.f32 %v3515_v56, %v5535_v30  ;;  %v3404_v6 = vpop.f32.mrb[210].mxu0  ;;  %v3517_v7 = vpop.f32.mrb[210].mxu1  ;;  %3726 = vmatprep.subr.bf16.mxu0 %v3631_v31  ;;  %3799 = vmatprep.subr.bf16.mxu1 %v3633_v49 }
 0x6d5   : > { %v3405_v40 = vadd.f32 %v3404_v6, %v3214_v57  ;;  %v3518_v34 = vadd.f32 %v3517_v7, %v3214_v57  ;;  %v3406_v41 = vpop.f32.mrb[211].mxu0  ;;  %v3519_v11 = vpop.f32.mrb[211].mxu1  ;;  %3727 = vmatpush1.bf16.msra.mxu0 %v3630_v58  ;;  %3800 = vmatpush1.bf16.msra.mxu1 %v3632_v5  ;;  %v3582_v14 = vmax.f32 %v3401_v60, 0.0  ;;  %v3584_v15 = vmax.f32 %v3514_v61, 0.0 }
 0x6d6   : > { %v3407_v0 = vadd.f32 %v3406_v41, %v3214_v57  ;;  %v3520_v3 = vadd.f32 %v3519_v11, %v3214_v57  ;;  %v3583_v9 = vmax.f32 %v3403_v1, 0.0  ;;  %v3585_v22 = vmax.f32 %v3516_v38, 0.0  ;;  %v3234_v5 = vpop.permute.xlu1 %3233 }
 0x6d7   : > { %v3586_v8 = vmax.f32 %v3405_v40, 0.0  ;;  %v3588_v59 = vmax.f32 %v3518_v34, 0.0 }
 0x6d8   : > { %v3587_v44 = vmax.f32 %v3407_v0, 0.0  ;;  %v3589_v30 = vmax.f32 %v3520_v3, 0.0 }
 0x6d9   : > { %v3634_v45 = vpack.c.bf16 %v3586_v8, %v3582_v14  ;;  %v3636_v46 = vpack.c.bf16 %v3588_v59, %v3584_v15 }
 0x6da   : > { %v3635_v47 = vpack.c.bf16 %v3587_v44, %v3583_v9  ;;  %v3637_v42 = vpack.c.bf16 %v3589_v30, %v3585_v22  ;;  %v3410_v43 = vpop.f32.mrb[212].mxu0  ;;  %v3523_v29 = vpop.f32.mrb[212].mxu1 }
 0x6db   : > { %v3411_v10 = vadd.f32 %v3410_v43, %v5537_v33  ;;  %v3524_v24 = vadd.f32 %v3523_v29, %v5537_v33  ;;  %v3412_v25 = vpop.f32.mrb[213].mxu0  ;;  %v3525_v39 = vpop.f32.mrb[213].mxu1  ;;  %v4659_v43 = vld [vmem:[%s5911_s5] sm:$0xff]   ;;  %v4660_v29 = vld [vmem:[%s5911_s5 + $0x8] sm:$0xff]  }
 0x6dc   : > { %v3413_v48 = vadd.f32 %v3412_v25, %v5537_v33  ;;  %v3526_v35 = vadd.f32 %v3525_v39, %v5537_v33  ;;  %v3414_v36 = vpop.f32.mrb[214].mxu0  ;;  %v3527_v26 = vpop.f32.mrb[214].mxu1  ;;  %3728 = vmatprep.subr.bf16.mxu0 %v3635_v47  ;;  %3801 = vmatprep.subr.bf16.mxu1 %v3637_v42 }
 0x6dd   : > { %v3415_v27 = vadd.f32 %v3414_v36, %v3224_v23  ;;  %v3528_v28 = vadd.f32 %v3527_v26, %v3224_v23  ;;  %v3416_v20 = vpop.f32.mrb[215].mxu0  ;;  %v3529_v32 = vpop.f32.mrb[215].mxu1  ;;  %3729 = vmatpush1.bf16.msra.mxu0 %v3634_v45  ;;  %3802 = vmatpush1.bf16.msra.mxu1 %v3636_v46  ;;  %v3590_v19 = vmax.f32 %v3411_v10, 0.0  ;;  %v3592_v52 = vmax.f32 %v3524_v24, 0.0  ;;  %v4661_v10 = vld [vmem:[%s5911_s5 + $0x10] sm:$0xff]   ;;  %v4662_v24 = vld [vmem:[%s5911_s5 + $0x18] sm:$0xff]  }
 0x6de   : > { %v3417_v18 = vadd.f32 %v3416_v20, %v3224_v23  ;;  %v3530_v12 = vadd.f32 %v3529_v32, %v3224_v23  ;;  %v3591_v62 = vmax.f32 %v3413_v48, 0.0  ;;  %v3593_v57 = vmax.f32 %v3526_v35, 0.0  ;;  %v3662_v25 = vpop.permute.xlu1 %3661 }
 0x6df   : > { %v3594_v4 = vmax.f32 %v3415_v27, 0.0  ;;  %v3596_v53 = vmax.f32 %v3528_v28, 0.0 }
 0x6e0   : > { %v3595_v58 = vmax.f32 %v3417_v18, 0.0  ;;  %v3597_v33 = vmax.f32 %v3530_v12, 0.0 }
 0x6e1   : > { %v3638_v31 = vpack.c.bf16 %v3594_v4, %v3590_v19  ;;  %v3640_v49 = vpack.c.bf16 %v3596_v53, %v3592_v52 }
 0x6e2   : > { %v3639_v54 = vpack.c.bf16 %v3595_v58, %v3591_v62  ;;  %v3641_v55 = vpack.c.bf16 %v3597_v33, %v3593_v57  ;;  %v3420_v60 = vpop.f32.mrb[216].mxu0  ;;  %v3533_v61 = vpop.f32.mrb[216].mxu1 }
 0x6e3   : > { %v3421_v37 = vadd.f32 %v3420_v60, %v5539_v50  ;;  %v3534_v56 = vadd.f32 %v3533_v61, %v5539_v50  ;;  %v3422_v1 = vpop.f32.mrb[217].mxu0  ;;  %v3535_v38 = vpop.f32.mrb[217].mxu1 }
 0x6e4   : > { %v3423_v6 = vadd.f32 %v3422_v1, %v5539_v50  ;;  %v3536_v7 = vadd.f32 %v3535_v38, %v5539_v50  ;;  %v3424_v40 = vpop.f32.mrb[218].mxu0  ;;  %v3537_v34 = vpop.f32.mrb[218].mxu1  ;;  %3730 = vmatprep.subr.bf16.mxu0 %v3639_v54  ;;  %3803 = vmatprep.subr.bf16.mxu1 %v3641_v55 }
 0x6e5   : > { %v3425_v41 = vadd.f32 %v3424_v40, %v3234_v5  ;;  %v3538_v11 = vadd.f32 %v3537_v34, %v3234_v5  ;;  %v3426_v0 = vpop.f32.mrb[219].mxu0  ;;  %v3539_v3 = vpop.f32.mrb[219].mxu1  ;;  %3731 = vmatpush1.bf16.msra.mxu0 %v3638_v31  ;;  %3804 = vmatpush1.bf16.msra.mxu1 %v3640_v49  ;;  %v3598_v8 = vmax.f32 %v3421_v37, 0.0  ;;  %v3600_v59 = vmax.f32 %v3534_v56, 0.0 }
 0x6e6   : > { %v3427_v14 = vadd.f32 %v3426_v0, %v3234_v5  ;;  %v3540_v15 = vadd.f32 %v3539_v3, %v3234_v5  ;;  %v3599_v44 = vmax.f32 %v3423_v6, 0.0  ;;  %v3601_v30 = vmax.f32 %v3536_v7, 0.0  ;;  %v3672_v60 = vpop.permute.xlu1 %3671 }
 0x6e7   : > { %v3602_v9 = vmax.f32 %v3425_v41, 0.0  ;;  %v3604_v22 = vmax.f32 %v3538_v11, 0.0 }
 0x6e8   : > { %v3603_v23 = vmax.f32 %v3427_v14, 0.0  ;;  %v3605_v50 = vmax.f32 %v3540_v15, 0.0 }
 0x6e9   : > { %v3642_v45 = vpack.c.bf16 %v3602_v9, %v3598_v8  ;;  %v3644_v46 = vpack.c.bf16 %v3604_v22, %v3600_v59 }
 0x6ea   : > { %v3643_v47 = vpack.c.bf16 %v3603_v23, %v3599_v44  ;;  %v3645_v42 = vpack.c.bf16 %v3605_v50, %v3601_v30 }
 0x6ec   : > { %3732 = vmatprep.subr.bf16.mxu0 %v3643_v47  ;;  %3805 = vmatprep.subr.bf16.mxu1 %v3645_v42  ;;  %v3682_v42 = vpop.permute.xlu1 %3681 }
 0x6ed   : > { %3733 = vmatpush1.bf16.msra.mxu0 %v3642_v45  ;;  %3806 = vmatpush1.bf16.msra.mxu1 %v3644_v46 }
 0x6f0   : > { %3751 = vmatmul.mubr.bf16.vlgmr.msra.gmra.mrb[220].mxu0 %v4659_v43  ;;  %3824 = vmatmul.mubr.bf16.vlgmr.msra.gmra.mrb[220].mxu1 %v4659_v43 }
 0x6f1   : > { %3760 = vmatprep.mubr.bf16.mxu0 %v4729_v2  ;;  %3833 = vmatprep.mubr.bf16.mxu1 %v4729_v2 }
 0x6f8   : > { %3761 = vmatmul.mubr.bf16.gmra.mrb[224].mxu0 %v4660_v29  ;;  %3834 = vmatmul.mubr.bf16.gmra.mrb[224].mxu1 %v4660_v29 }
 0x6f9   : > { %3770 = vmatprep.mubr.bf16.mxu0 %v4729_v2  ;;  %3843 = vmatprep.mubr.bf16.mxu1 %v4729_v2 }
 0x700   : > { %3771 = vmatmul.mubr.bf16.gmra.mrb[228].mxu0 %v4661_v10  ;;  %3844 = vmatmul.mubr.bf16.gmra.mrb[228].mxu1 %v4661_v10 }
 0x701   : > { %3780 = vmatprep.mubr.bf16.mxu0 %v4729_v2  ;;  %3853 = vmatprep.mubr.bf16.mxu1 %v4729_v2 }
 0x708   : > { %3781 = vmatmul.mubr.bf16.gmra.mrb[232].mxu0 %v4662_v24  ;;  %3854 = vmatmul.mubr.bf16.gmra.mrb[232].mxu1 %v4662_v24 }
 0x709   : > { %3988 = vmatprep.mubr.bf16.mxu0 %v4729_v2  ;;  %4041 = vmatprep.mubr.bf16.mxu1 %v4729_v2 }
 0x7c3   : > { %v3752_v39 = vpop.f32.mrb[220].mxu0  ;;  %v3825_v48 = vpop.f32.mrb[220].mxu1 }
 0x7c4   : > { %v3753_v35 = vadd.f32 %v3752_v39, %v5541_v63  ;;  %v3826_v36 = vadd.f32 %v3825_v48, %v5541_v63  ;;  %v3754_v26 = vpop.f32.mrb[221].mxu0  ;;  %v3827_v27 = vpop.f32.mrb[221].mxu1 }
 0x7c5   : > { %v3755_v28 = vadd.f32 %v3754_v26, %v5541_v63  ;;  %v3828_v20 = vadd.f32 %v3827_v27, %v5541_v63  ;;  %v3756_v32 = vpop.f32.mrb[222].mxu0  ;;  %v3829_v18 = vpop.f32.mrb[222].mxu1 }
 0x7c6   : > { %v3757_v12 = vadd.f32 %v3756_v32, %v3662_v25  ;;  %v3830_v19 = vadd.f32 %v3829_v18, %v3662_v25  ;;  %v3758_v52 = vpop.f32.mrb[223].mxu0  ;;  %v3831_v4 = vpop.f32.mrb[223].mxu1  ;;  %v3864_v57 = vmax.f32 %v3753_v35, 0.0  ;;  %v3866_v58 = vmax.f32 %v3826_v36, 0.0 }
 0x7c7   : > { %v3759_v53 = vadd.f32 %v3758_v52, %v3662_v25  ;;  %v3832_v62 = vadd.f32 %v3831_v4, %v3662_v25  ;;  %v3865_v31 = vmax.f32 %v3755_v28, 0.0  ;;  %v3867_v49 = vmax.f32 %v3828_v20, 0.0 }
 0x7c8   : > { %v3868_v33 = vmax.f32 %v3757_v12, 0.0  ;;  %v3870_v5 = vmax.f32 %v3830_v19, 0.0 }
 0x7c9   : > { %v3869_v54 = vmax.f32 %v3759_v53, 0.0  ;;  %v3871_v55 = vmax.f32 %v3832_v62, 0.0 }
 0x7ca   : > { %v3900_v61 = vpack.c.bf16 %v3868_v33, %v3864_v57  ;;  %v3902_v37 = vpack.c.bf16 %v3870_v5, %v3866_v58 }
 0x7cb   : > { %v3901_v63 = vpack.c.bf16 %v3869_v54, %v3865_v31  ;;  %v3903_v56 = vpack.c.bf16 %v3871_v55, %v3867_v49  ;;  %v3762_v1 = vpop.f32.mrb[224].mxu0  ;;  %v3835_v38 = vpop.f32.mrb[224].mxu1 }
 0x7cc   : > { %v3763_v6 = vadd.f32 %v3762_v1, %v5543_v51  ;;  %v3836_v7 = vadd.f32 %v3835_v38, %v5543_v51  ;;  %v3764_v40 = vpop.f32.mrb[225].mxu0  ;;  %v3837_v34 = vpop.f32.mrb[225].mxu1 }
 0x7cd   : > { %v3765_v41 = vadd.f32 %v3764_v40, %v5543_v51  ;;  %v3838_v11 = vadd.f32 %v3837_v34, %v5543_v51  ;;  %v3766_v0 = vpop.f32.mrb[226].mxu0  ;;  %v3839_v3 = vpop.f32.mrb[226].mxu1  ;;  %3956 = vmatprep.subr.bf16.mxu0 %v3901_v63  ;;  %4009 = vmatprep.subr.bf16.mxu1 %v3903_v56 }
 0x7ce   : > { %v3767_v14 = vadd.f32 %v3766_v0, %v3672_v60  ;;  %v3840_v15 = vadd.f32 %v3839_v3, %v3672_v60  ;;  %v3768_v8 = vpop.f32.mrb[227].mxu0  ;;  %v3841_v59 = vpop.f32.mrb[227].mxu1  ;;  %3957 = vmatpush1.bf16.msra.mxu0 %v3900_v61  ;;  %4010 = vmatpush1.bf16.msra.mxu1 %v3902_v37  ;;  %v3872_v44 = vmax.f32 %v3763_v6, 0.0  ;;  %v3874_v30 = vmax.f32 %v3836_v7, 0.0 }
 0x7cf   : > { %v3769_v9 = vadd.f32 %v3768_v8, %v3672_v60  ;;  %v3842_v22 = vadd.f32 %v3841_v59, %v3672_v60  ;;  %v3873_v45 = vmax.f32 %v3765_v41, 0.0  ;;  %v3875_v46 = vmax.f32 %v3838_v11, 0.0  ;;  %v3692_v54 = vpop.permute.xlu1 %3691 }
 0x7d0   : > { %v3876_v23 = vmax.f32 %v3767_v14, 0.0  ;;  %v3878_v50 = vmax.f32 %v3840_v15, 0.0 }
 0x7d1   : > { %v3877_v47 = vmax.f32 %v3769_v9, 0.0  ;;  %v3879_v51 = vmax.f32 %v3842_v22, 0.0 }
 0x7d2   : > { %v3904_v43 = vpack.c.bf16 %v3876_v23, %v3872_v44  ;;  %v3906_v29 = vpack.c.bf16 %v3878_v50, %v3874_v30 }
 0x7d3   : > { %v3905_v10 = vpack.c.bf16 %v3877_v47, %v3873_v45  ;;  %v3907_v24 = vpack.c.bf16 %v3879_v51, %v3875_v46  ;;  %v3772_v25 = vpop.f32.mrb[228].mxu0  ;;  %v3845_v39 = vpop.f32.mrb[228].mxu1 }
 0x7d4   : > { %v3773_v48 = vadd.f32 %v3772_v25, %v5545_v13  ;;  %v3846_v35 = vadd.f32 %v3845_v39, %v5545_v13  ;;  %v3774_v36 = vpop.f32.mrb[229].mxu0  ;;  %v3847_v26 = vpop.f32.mrb[229].mxu1 }
 0x7d5   : > { %v3775_v27 = vadd.f32 %v3774_v36, %v5545_v13  ;;  %v3848_v28 = vadd.f32 %v3847_v26, %v5545_v13  ;;  %v3776_v20 = vpop.f32.mrb[230].mxu0  ;;  %v3849_v32 = vpop.f32.mrb[230].mxu1  ;;  %3958 = vmatprep.subr.bf16.mxu0 %v3905_v10  ;;  %4011 = vmatprep.subr.bf16.mxu1 %v3907_v24 }
 0x7d6   : > { %v3777_v18 = vadd.f32 %v3776_v20, %v3682_v42  ;;  %v3850_v12 = vadd.f32 %v3849_v32, %v3682_v42  ;;  %v3778_v19 = vpop.f32.mrb[231].mxu0  ;;  %v3851_v52 = vpop.f32.mrb[231].mxu1  ;;  %3959 = vmatpush1.bf16.msra.mxu0 %v3904_v43  ;;  %4012 = vmatpush1.bf16.msra.mxu1 %v3906_v29  ;;  %v3880_v62 = vmax.f32 %v3773_v48, 0.0  ;;  %v3882_v57 = vmax.f32 %v3846_v35, 0.0  ;;  %v4663_v43 = vld [vmem:[%s5913_s7] sm:$0xff]   ;;  %v4664_v29 = vld [vmem:[%s5913_s7 + $0x8] sm:$0xff]  }
 0x7d7   : > { %v3779_v4 = vadd.f32 %v3778_v19, %v3682_v42  ;;  %v3852_v53 = vadd.f32 %v3851_v52, %v3682_v42  ;;  %v3881_v5 = vmax.f32 %v3775_v27, 0.0  ;;  %v3883_v31 = vmax.f32 %v3848_v28, 0.0  ;;  %v3928_v10 = vpop.permute.xlu1 %3927 }
 0x7d8   : > { %v3884_v58 = vmax.f32 %v3777_v18, 0.0  ;;  %v3886_v33 = vmax.f32 %v3850_v12, 0.0 }
 0x7d9   : > { %v3885_v49 = vmax.f32 %v3779_v4, 0.0  ;;  %v3887_v13 = vmax.f32 %v3852_v53, 0.0 }
 0x7da   : > { %v3908_v55 = vpack.c.bf16 %v3884_v58, %v3880_v62  ;;  %v3910_v60 = vpack.c.bf16 %v3886_v33, %v3882_v57 }
 0x7db   : > { %v3909_v61 = vpack.c.bf16 %v3885_v49, %v3881_v5  ;;  %v3911_v37 = vpack.c.bf16 %v3887_v13, %v3883_v31  ;;  %v3782_v63 = vpop.f32.mrb[232].mxu0  ;;  %v3855_v56 = vpop.f32.mrb[232].mxu1 }
 0x7dc   : > { %v3783_v1 = vadd.f32 %v3782_v63, %v5547_v16  ;;  %v3856_v38 = vadd.f32 %v3855_v56, %v5547_v16  ;;  %v3784_v6 = vpop.f32.mrb[233].mxu0  ;;  %v3857_v7 = vpop.f32.mrb[233].mxu1 }
 0x7dd   : > { %v3785_v40 = vadd.f32 %v3784_v6, %v5547_v16  ;;  %v3858_v34 = vadd.f32 %v3857_v7, %v5547_v16  ;;  %v3786_v41 = vpop.f32.mrb[234].mxu0  ;;  %v3859_v11 = vpop.f32.mrb[234].mxu1  ;;  %3960 = vmatprep.subr.bf16.mxu0 %v3909_v61  ;;  %4013 = vmatprep.subr.bf16.mxu1 %v3911_v37 }
 0x7de   : > { %v3787_v0 = vadd.f32 %v3786_v41, %v3692_v54  ;;  %v3860_v3 = vadd.f32 %v3859_v11, %v3692_v54  ;;  %v3788_v14 = vpop.f32.mrb[235].mxu0  ;;  %v3861_v15 = vpop.f32.mrb[235].mxu1  ;;  %3961 = vmatpush1.bf16.msra.mxu0 %v3908_v55  ;;  %4014 = vmatpush1.bf16.msra.mxu1 %v3910_v60  ;;  %v3888_v9 = vmax.f32 %v3783_v1, 0.0  ;;  %v3890_v22 = vmax.f32 %v3856_v38, 0.0 }
 0x7df   : > { %v3789_v8 = vadd.f32 %v3788_v14, %v3692_v54  ;;  %v3862_v59 = vadd.f32 %v3861_v15, %v3692_v54  ;;  %v3889_v23 = vmax.f32 %v3785_v40, 0.0  ;;  %v3891_v50 = vmax.f32 %v3858_v34, 0.0  ;;  %v3938_v49 = vpop.permute.xlu1 %3937 }
 0x7e0   : > { %v3892_v44 = vmax.f32 %v3787_v0, 0.0  ;;  %v3894_v30 = vmax.f32 %v3860_v3, 0.0 }
 0x7e1   : > { %v3893_v45 = vmax.f32 %v3789_v8, 0.0  ;;  %v3895_v16 = vmax.f32 %v3862_v59, 0.0 }
 0x7e2   : > { %v3912_v46 = vpack.c.bf16 %v3892_v44, %v3888_v9  ;;  %v3914_v47 = vpack.c.bf16 %v3894_v30, %v3890_v22 }
 0x7e3   : > { %v3913_v51 = vpack.c.bf16 %v3893_v45, %v3889_v23  ;;  %v3915_v42 = vpack.c.bf16 %v3895_v16, %v3891_v50 }
 0x7e5   : > { %3962 = vmatprep.subr.bf16.mxu0 %v3913_v51  ;;  %4015 = vmatprep.subr.bf16.mxu1 %v3915_v42 }
 0x7e6   : > { %3963 = vmatpush1.bf16.msra.mxu0 %v3912_v46  ;;  %4016 = vmatpush1.bf16.msra.mxu1 %v3914_v47  ;;  %v4078_v46 = vld [vmem:[%s5915_s9] sm:$0x3]  ;;  %v4091_v47 = vpop.permute.xlu1 %4090 }
 0x7e9   : > { %4476 = vmatmul.mubr.msk.bf16.vlgmr.msra.gmra.mrb[236].mxu0 %vm2051_vm1, %v4663_v43  ;;  %4478 = vmatmul.mubr.msk.bf16.vlgmr.msra.gmra.mrb[236].mxu1 %vm2051_vm1, %v4663_v43 }
 0x7ea   : > { %3998 = vmatprep.mubr.bf16.mxu0 %v4729_v2  ;;  %4051 = vmatprep.mubr.bf16.mxu1 %v4729_v2 }
 0x7f1   : > { %4477 = vmatmul.mubr.msk.bf16.gmra.mrb[240].mxu0 %vm2051_vm1, %v4664_v29  ;;  %4479 = vmatmul.mubr.msk.bf16.gmra.mrb[240].mxu1 %vm2051_vm1, %v4664_v29 }
 0x7f2   : > { %4128 = vmatprep.mubr.bf16.mxu0 %v4729_v2  ;;  %4169 = vmatprep.mubr.bf16.mxu1 %v4729_v2 }
 0x8bc   : > { %v3990_v24 = vpop.f32.mrb[236].mxu0  ;;  %v4043_v25 = vpop.f32.mrb[236].mxu1 }
 0x8bd   : > { %v3991_v39 = vadd.f32 %v3990_v24, %v5549_v17  ;;  %v4044_v48 = vadd.f32 %v4043_v25, %v5549_v17  ;;  %v3992_v35 = vpop.f32.mrb[237].mxu0  ;;  %v4045_v36 = vpop.f32.mrb[237].mxu1 }
 0x8be   : > { %v3993_v26 = vadd.f32 %v3992_v35, %v5549_v17  ;;  %v4046_v27 = vadd.f32 %v4045_v36, %v5549_v17  ;;  %v3994_v28 = vpop.f32.mrb[238].mxu0  ;;  %v4047_v20 = vpop.f32.mrb[238].mxu1 }
 0x8bf   : > { %v3995_v32 = vadd.f32 %v3994_v28, %v3928_v10  ;;  %v4048_v18 = vadd.f32 %v4047_v20, %v3928_v10  ;;  %v3996_v12 = vpop.f32.mrb[239].mxu0  ;;  %v4049_v19 = vpop.f32.mrb[239].mxu1  ;;  %v4062_v4 = vmax.f32 %v3991_v39, 0.0  ;;  %v4064_v53 = vmax.f32 %v4044_v48, 0.0 }
 0x8c0   : > { %v3997_v2 = vadd.f32 %v3996_v12, %v3928_v10  ;;  %v4050_v52 = vadd.f32 %v4049_v19, %v3928_v10  ;;  %v4063_v58 = vmax.f32 %v3993_v26, 0.0  ;;  %v4065_v33 = vmax.f32 %v4046_v27, 0.0 }
 0x8c1   : > { %v4066_v62 = vmax.f32 %v3995_v32, 0.0  ;;  %v4068_v57 = vmax.f32 %v4048_v18, 0.0 }
 0x8c2   : > { %v4067_v5 = vmax.f32 %v3997_v2, 0.0  ;;  %v4069_v31 = vmax.f32 %v4050_v52, 0.0 }
 0x8c3   : > { %v4079_v13 = vpack.c.bf16 %v4066_v62, %v4062_v4  ;;  %v4081_v54 = vpack.c.bf16 %v4068_v57, %v4064_v53 }
 0x8c4   : > { %v4080_v17 = vpack.c.bf16 %v4067_v5, %v4063_v58  ;;  %v4082_v55 = vpack.c.bf16 %v4069_v31, %v4065_v33  ;;  %v4000_v60 = vpop.f32.mrb[240].mxu0  ;;  %v4053_v61 = vpop.f32.mrb[240].mxu1 }
 0x8c5   : > { %v4001_v37 = vadd.f32 %v4000_v60, %v5551_v21  ;;  %v4054_v63 = vadd.f32 %v4053_v61, %v5551_v21  ;;  %v4002_v56 = vpop.f32.mrb[241].mxu0  ;;  %v4055_v1 = vpop.f32.mrb[241].mxu1 }
 0x8c6   : > { %v4003_v38 = vadd.f32 %v4002_v56, %v5551_v21  ;;  %v4056_v6 = vadd.f32 %v4055_v1, %v5551_v21  ;;  %v4004_v7 = vpop.f32.mrb[242].mxu0  ;;  %v4057_v40 = vpop.f32.mrb[242].mxu1  ;;  %4096 = vmatprep.subr.bf16.mxu0 %v4080_v17  ;;  %4137 = vmatprep.subr.bf16.mxu1 %v4082_v55 }
 0x8c7   : > { %v4005_v34 = vadd.f32 %v4004_v7, %v3938_v49  ;;  %v4058_v41 = vadd.f32 %v4057_v40, %v3938_v49  ;;  %v4006_v11 = vpop.f32.mrb[243].mxu0  ;;  %v4059_v0 = vpop.f32.mrb[243].mxu1  ;;  %4097 = vmatpush1.bf16.msra.mxu0 %v4079_v13  ;;  %4138 = vmatpush1.bf16.msra.mxu1 %v4081_v54  ;;  %v4070_v15 = vmax.f32 %v4001_v37, 0.0  ;;  %v4072_v8 = vmax.f32 %v4054_v63, 0.0 }
 0x8c8   : > { %v4007_v3 = vadd.f32 %v4006_v11, %v3938_v49  ;;  %v4060_v14 = vadd.f32 %v4059_v0, %v3938_v49  ;;  %v4071_v22 = vmax.f32 %v4003_v38, 0.0  ;;  %v4073_v44 = vmax.f32 %v4056_v6, 0.0 }
 0x8c9   : > { %v4074_v59 = vmax.f32 %v4005_v34, 0.0  ;;  %v4076_v9 = vmax.f32 %v4058_v41, 0.0 }
 0x8ca   : > { %v4075_v21 = vmax.f32 %v4007_v3, 0.0  ;;  %v4077_v30 = vmax.f32 %v4060_v14, 0.0 }
 0x8cb   : > { %v4083_v23 = vpack.c.bf16 %v4074_v59, %v4070_v15  ;;  %v4085_v50 = vpack.c.bf16 %v4076_v9, %v4072_v8 }
 0x8cc   : > { %v4084_v45 = vpack.c.bf16 %v4075_v21, %v4071_v22  ;;  %v4086_v16 = vpack.c.bf16 %v4077_v30, %v4073_v44 }
 0x8ce   : > { %4098 = vmatprep.subr.bf16.mxu0 %v4084_v45  ;;  %4139 = vmatprep.subr.bf16.mxu1 %v4086_v16 }
 0x8cf   : > { %4099 = vmatpush1.bf16.msra.mxu0 %v4083_v23  ;;  %4140 = vmatpush1.bf16.msra.mxu1 %v4085_v50 }
 0x8d2   : > { %4480 = vmatmul.mubr.msk.bf16.vlgmr.msra.gmra.mrb[244].mxu0 %vm2195_vm2, %v4078_v46  ;;  %4481 = vmatmul.mubr.msk.bf16.vlgmr.msra.gmra.mrb[244].mxu1 %vm2195_vm2, %v4078_v46 }
 0x9a5   : > { %v4130_v51 = vpop.f32.mrb[244].mxu0  ;;  %v4171_v42 = vpop.f32.mrb[244].mxu1 }
 0x9a6   : > { %v4131_v43 = vadd.f32 %v4130_v51, %v4091_v47  ;;  %v4172_v29 = vadd.f32 %v4171_v42, %v4091_v47  ;;  %v4132_v10 = vpop.f32.mrb[245].mxu0  ;;  %v4173_v24 = vpop.f32.mrb[245].mxu1 }
 0x9a7   : > { %v4133_v25 = vadd.f32 %v4132_v10, %v4091_v47  ;;  %v4174_v39 = vadd.f32 %v4173_v24, %v4091_v47  ;;  %v4134_v48 = vpop.f32.mrb[246].mxu0  ;;  %v4175_v35 = vpop.f32.mrb[246].mxu1 }
 0x9a8   : > { %v4135_v36 = vpop.f32.mrb[247].mxu0  ;;  %v4176_v26 = vpop.f32.mrb[247].mxu1 }
 0x9a9   : > { %v4182_v27 = vcombine.low %v4131_v43, %v4133_v25  ;;  %v4183_v28 = vcombine.low %v4172_v29, %v4174_v39 }
 0x9ab   : > { %4482 = vst [vmem:[%s5556_s26 + $0x10] sm:$0xff] %v4182_v27  ;;  %4483 = vst [vmem:[%s5556_s26 + $0x18] sm:$0xff] %v4183_v28 }
 0x9ac   : > { %4678 = shalt.err (!%p4675_p3)
}
 0x9ad   : > { %s4679_s23 = scalar_lea.hbm %s5859_s15, 512  ;;  %s4683_s29 = scalar_lea.hbm %s5917_s11, 1024 }
 0x9ae   : > { %p4680_p4 = scmp.ne.s32.totalorder %s5859_s15, %s4679_s23  ;;  %p4684_p9 = scmp.lt.u32.totalorder %s5859_s15, %s5917_s11 }
 0x9af   : > { %p4685_p10 = scmp.lt.u32.totalorder %s4683_s29, %s4679_s23  ;;  %p4687_p12 = scmp.lt.u32.totalorder %s4679_s23, %s5859_s15 }
 0x9b0   : > { %p4681_p7 = pnand %p4680_p4, %p4831_p5 }
 0x9b1   : > { %p4686_p11 = por %p4685_p10, %p4684_p9 }
 0x9b2   : > { %p4682_p8 = pneg %p4681_p7 }
 0x9b3   : > { %p4688_p13 = por %p4687_p12, %p4686_p11 }
 0x9b5   : > { %p4689_p0 = pnand %p4688_p13, %p4682_p8 }
 0x9b7   : > { %4692 = shalt.err (!%p4689_p0)
}
 0x9b8   : > { %s4731_s21 = smov 256   ;;  %s4732_s16 = smov 16  }
 0x9b9   : > { %4493 = dma.vmem_to_hbm [thread:$0]  (%p4831_p5), %s5854_s30, 512, %s5859_s15, %s5865_s12, %s4731_s21, %s4731_s21, %s4732_s16  }
 0x9ba PF: > { %p4499_p1 = scmp.ge.s32.totalorder %s4727_s20, 2  ;;  %s4219_s19 = sand.u32 1, %s4715_s17  }
 0x9bb   : > { %s4220_s22 = scalar_lea.sflag [#allocation3], %s4219_s19 }
 0x9bc   : > { %p4496_p2 = pnand %p4499_p1, %p4835_p6 }
 0x9be   : > { %4710 = dma.done.wait (!%p4496_p2), %s4220_s22, 512  }
 0x9bf   : > { %4712 = vsyncadd (!%p4496_p2), %s4220_s22, 4294966784  ;;  %s5926_s20 = sld [smem:[#allocation6_spill]]  ;;  %s5927_s24 = sld [smem:[#allocation5_spill]] }
 0x9c0   : > { %s5928_s19 = sld [smem:[#allocation7_spill]]  ;;  %s5929_s17 = smov %s4719_s18 }
 0x9c5   : > { %p21_p3 = scmp.ge.s32.totalorder %s5926_s20, 4   ;;  %s5930_s18 = smov %s5927_s24 }
 0x9c7   :  { %23 = sbr.rel (!%p21_p3) target bundleno = 3 (0x3), region = 101 }
 0x9ce   :  { %4225 = vsyncpa [#allocation3], 1 }
 0x9cf   :  { %4227 = vsyncpa [#allocation3 + $0x1], 1 }

</bundles_post_ra>
